<compile_context>
chip_gen: v7x
topology: tpu7x:2x2x1
jax: 0.10.0
libtpu: 0.0.40
codegen_flags: <defaults>
</compile_context>

<pallas_src>
import math

import jax
import jax.numpy as jnp
from jax import lax
from jax.experimental import pallas as pl
from jax.experimental.pallas import tpu as pltpu  # noqa: F401  (TPU backend)

# ----- config (small, synthetic) -------------------------------------------
HIDDEN = 32                 # config.hidden_size
NUM_HEADS = 4               # config.num_attention_heads
DH = HIDDEN // NUM_HEADS    # attention_head_size
INTER = 4 * HIDDEN          # config.intermediate_size (128 -> lane-dense FFN mid / slab width)
LN_EPS = 1e-12
NEG = -1e30                 # finite "minus infinity" (no NaN risk for masked rows)
INV_SQRT_DH = 1.0 / math.sqrt(DH)

B = 2        # batch
L_LANG = 8   # language sequence length
L_AUDIO = 8  # audio sequence length

NL = B * L_LANG
NA = B * L_AUDIO
NMAX = max(NL, NA)

# packed-slab layout constants
FFN_W_BASE = 4 * HIDDEN     # weight-slab rows 0..4H-1 are the 4 attention blocks
FFN_V_BASE = 8              # vec-slab rows 0..7 are the 4 attention blocks (2 rows each)


# ----- in-kernel math helpers ----------------------------------------------
def _erf(x):
    # Abramowitz & Stegun 7.1.26 rational approximation, |error| <= 1.5e-7.
    a1, a2, a3, a4, a5 = 0.254829592, -0.284496736, 1.421413741, -1.453152027, 1.061405429
    pp = 0.3275911
    sgn = jnp.where(x >= 0.0, 1.0, -1.0)
    z = jnp.abs(x)
    t = 1.0 / (1.0 + pp * z)
    poly = ((((a5 * t + a4) * t + a3) * t + a2) * t + a1) * t
    return sgn * (1.0 - poly * jnp.exp(-z * z))


def _gelu(x):
    return x * 0.5 * (1.0 + _erf(x * (1.0 / math.sqrt(2.0))))


def _layer_norm(y, gamma, beta):
    # fused statistics: single pass, var = E[y^2] - mean^2 (one fewer dependent reduce)
    mean = jnp.mean(y, axis=-1, keepdims=True)
    msq = jnp.mean(y * y, axis=-1, keepdims=True)
    var = msq - mean * mean
    return (y - mean) * lax.rsqrt(var + LN_EPS) * gamma + beta


def _split_heads(x):
    # (n, H) -> (NUM_HEADS, n, DH) via lane slices + stack (avoids a minor-dim reshape)
    return jnp.stack([x[:, h * DH:(h + 1) * DH] for h in range(NUM_HEADS)], axis=0)


# ----- the fused CMELayer kernel --------------------------------------------
def cme_kernel(act_ref, w_ref, vec_ref, bias_ref, posk_ref, out_ref):
    act = act_ref[...]                       # (NMAX, 2H)
    x_lang = act[:NL, :HIDDEN]
    x_audio = act[:NA, HIDDEN:2 * HIDDEN]

    def att_block(i, xq, xkv, nq, nk, is_self):
        """BertAttention + BertAttOutput on batch-flattened activations."""
        wblk = w_ref[i * HIDDEN:(i + 1) * HIDDEN, :]       # (H, 4H) = [Wq|Wk|Wv|Wo]
        bvec = vec_ref[2 * i:2 * i + 1, :]                 # (1, 4H) = [bq|bk|bv|bo]
        lnv = vec_ref[2 * i + 1:2 * i + 2, :]              # (1, 4H) = [gamma|beta|0|0]
        bias_full = bias_ref[i]                            # (NMAX, NMAX)
        bias = bias_full[:nq, :nk]                         # (nq, nk)
        pk = posk_ref[:nk, i * HIDDEN:(i + 1) * HIDDEN]    # (nk, H)

        wqkv = wblk[:, :3 * HIDDEN]
        wo = wblk[:, 3 * HIDDEN:]
        bqkv = bvec[:, :3 * HIDDEN]
        bo = bvec[:, 3 * HIDDEN:]
        gamma = lnv[:, :HIDDEN]
        beta = lnv[:, HIDDEN:2 * HIDDEN]

        if is_self:
            qkv = jnp.dot(xq, wqkv, preferred_element_type=jnp.float32) + bqkv
            q = qkv[:, :HIDDEN]
            k = qkv[:, HIDDEN:2 * HIDDEN]
            v = qkv[:, 2 * HIDDEN:]
        else:
            q = (jnp.dot(xq, wqkv[:, :HIDDEN], preferred_element_type=jnp.float32)
                 + bqkv[:, :HIDDEN])
            kv = (jnp.dot(xkv, wqkv[:, HIDDEN:], preferred_element_type=jnp.float32)
                  + bqkv[:, HIDDEN:])
            k = kv[:, :HIDDEN]
            v = kv[:, HIDDEN:]

        k = k + pk                                         # fold (q+posq)·posk^T into K once

        qh = _split_heads(q)                               # (NH, nq, DH)
        kh = _split_heads(k)                               # (NH, nk, DH)
        vh = _split_heads(v)                               # (NH, nk, DH)

        s = jnp.einsum('hqd,hkd->hqk', qh, kh, preferred_element_type=jnp.float32)
        s = s * INV_SQRT_DH + bias[None, :, :]
        s = s - jnp.max(s, axis=-1, keepdims=True)
        e = jnp.exp(s)
        p = e * pl.reciprocal(jnp.sum(e, axis=-1, keepdims=True), approx=True)
        ctx = jnp.einsum('hqk,hkd->hqd', p, vh, preferred_element_type=jnp.float32)
        ctx2d = jnp.concatenate([ctx[h] for h in range(NUM_HEADS)], axis=1)  # (nq, H)
        proj = jnp.dot(ctx2d, wo, preferred_element_type=jnp.float32) + bo
        # dense bias + residual + LayerNorm (dropout = identity)
        return _layer_norm(proj + xq, gamma, beta)

    def ffn_block(j, x):
        """BertIntermediate (gelu) + BertOutput (dense + residual + LayerNorm)."""
        r0 = FFN_W_BASE + j * 2 * HIDDEN
        w1 = w_ref[r0:r0 + HIDDEN, :]                      # (H, INTER)
        w2t = w_ref[r0 + HIDDEN:r0 + 2 * HIDDEN, :]        # (H, INTER) -> W2 stored transposed
        b1 = vec_ref[FFN_V_BASE + 2 * j:FFN_V_BASE + 2 * j + 1, :]        # (1, INTER)
        misc = vec_ref[FFN_V_BASE + 2 * j + 1:FFN_V_BASE + 2 * j + 2, :]  # (1, 4H)
        b2 = misc[:, :HIDDEN]
        gamma = misc[:, HIDDEN:2 * HIDDEN]
        beta = misc[:, 2 * HIDDEN:3 * HIDDEN]

        hmid = _gelu(jnp.dot(x, w1, preferred_element_type=jnp.float32) + b1)
        # last-dim contraction against transposed W2 (no in-kernel transpose)
        out = lax.dot_general(hmid, w2t, (((1,), (1,)), ((), ())),
                              preferred_element_type=jnp.float32) + b2
        return _layer_norm(out + x, gamma, beta)

    # cross attention (both directions read the ORIGINAL inputs, as in the module)
    lang_x = att_block(0, x_lang, x_audio, NL, NA, False)
    audio_x = att_block(1, x_audio, x_lang, NA, NL, False)
    # self attention
    lang_s = att_block(2, lang_x, lang_x, NL, NL, True)
    audio_s = att_block(3, audio_x, audio_x, NA, NA, True)
    # feed-forward
    lang_o = ffn_block(0, lang_s)
    audio_o = ffn_block(1, audio_s)

    def _pad_rows(x):
        n = x.shape[0]
        if n == NMAX:
            return x
        return jnp.concatenate([x, jnp.zeros((NMAX - n, x.shape[1]), x.dtype)], axis=0)

    # lane-dense merged output: [lang | audio] along the last dim, one store / one DMA
    out_ref[...] = jnp.concatenate([_pad_rows(lang_o), _pad_rows(audio_o)], axis=1)


# ----- wrapper ---------------------------------------------------------------
def _build_bias(q_len, k_len, key_mask, pos_q, pos_k):
    """(B*q_len, B*k_len) additive bias: scaled posq@posk^T on the per-batch diagonal
    blocks; masked keys and cross-batch pairs get a finite -1e30."""
    pos = (pos_q @ pos_k.T) * INV_SQRT_DH                     # (q_len, k_len)
    bias = jnp.full((B * q_len, B * k_len), NEG, jnp.float32)
    for bb in range(B):
        block = pos + jnp.where(key_mask[bb] == 0.0, NEG, 0.0)[None, :]
        bias = bias.at[bb * q_len:(bb + 1) * q_len, bb * k_len:(bb + 1) * k_len].set(block)
    return bias


def prepare_cme_packed(params, lang_mask, audio_mask):
    """Activation-independent packing (run ONCE per params/masks, outside the per-call path)."""
    att_cfg = [
        ("lang_att",   L_LANG,  L_AUDIO, audio_mask),   # q = lang,  k = audio
        ("audio_att",  L_AUDIO, L_LANG,  lang_mask),    # q = audio, k = lang
        ("lang_self",  L_LANG,  L_LANG,  lang_mask),
        ("audio_self", L_AUDIO, L_AUDIO, audio_mask),
    ]

    w_rows, vec_rows, bias_list, posk_cols = [], [], [], []
    for name, qlen, klen, mask in att_cfg:
        p = params[name]
        wqkv = jnp.concatenate([p["wq"], p["wk"], p["wv"]], axis=1)            # (H, 3H)
        w_rows.append(jnp.concatenate([wqkv, p["wo"]], axis=1))                # (H, 4H)
        vec_rows.append(jnp.concatenate([p["bq"], p["bk"], p["bv"], p["bo"]], axis=1))
        vec_rows.append(jnp.concatenate(
            [p["gamma"], p["beta"], jnp.zeros((1, 2 * HIDDEN), jnp.float32)], axis=1))
        pos_q = p["abs_pos_emb"][:qlen]
        pos_k = p["abs_pos_emb"][:klen]
        bias = _build_bias(qlen, klen, mask, pos_q, pos_k)                     # (B*q, B*k)
        bias = jnp.pad(bias, ((0, NMAX - B * qlen), (0, NMAX - B * klen)))
        bias_list.append(bias)
        pk = jnp.tile(pos_k, (B, NUM_HEADS))                                   # (B*k, H)
        pk = jnp.pad(pk, ((0, NMAX - B * klen), (0, 0)))
        posk_cols.append(pk)

    for name in ("lang_ffn", "audio_ffn"):
        p = params[name]
        w_rows.append(p["w1"])            # (H, INTER)
        w_rows.append(p["w2"].T)          # (H, INTER)  (transposed once here)
        vec_rows.append(p["b1"])          # (1, INTER)
        vec_rows.append(jnp.concatenate(
            [p["b2"], p["gamma"], p["beta"], jnp.zeros((1, HIDDEN), jnp.float32)], axis=1))

    w_slab = jnp.concatenate(w_rows, axis=0)           # (8H, 4H) = (256, 128)
    vec_slab = jnp.concatenate(vec_rows, axis=0)       # (12, 128)
    bias_slab = jnp.stack(bias_list, axis=0)           # (4, NMAX, NMAX)
    posk_slab = jnp.concatenate(posk_cols, axis=1)     # (NMAX, 4H)
    return (w_slab, vec_slab, bias_slab, posk_slab)


@jax.jit
def cme_forward(lang_feats, audio_feats, packed):
    w_slab, vec_slab, bias_slab, posk_slab = packed

    # single lane-dense activation slab: [lang | audio]
    act = jnp.zeros((NMAX, 2 * HIDDEN), jnp.float32)
    act = act.at[:NL, :HIDDEN].set(lang_feats.reshape(NL, HIDDEN))
    act = act.at[:NA, HIDDEN:].set(audio_feats.reshape(NA, HIDDEN))

    out = pl.pallas_call(
        cme_kernel,
        out_shape=jax.ShapeDtypeStruct((NMAX, 2 * HIDDEN), jnp.float32),
    )(act, w_slab, vec_slab, bias_slab, posk_slab)

    lang_out = out[:NL, :HIDDEN].reshape(B, L_LANG, HIDDEN)
    audio_out = out[:NA, HIDDEN:].reshape(B, L_AUDIO, HIDDEN)
    return lang_out, audio_out


def cme_layer(lang_feats, lang_mask, audio_feats, audio_mask, params):
    packed = prepare_cme_packed(params, lang_mask, audio_mask)
    return cme_forward(lang_feats, audio_feats, packed)


# ----- pure-JAX reference (mirrors the PyTorch CMELayer.forward) -------------
def _ref_layer_norm(y, gamma, beta):
    mean = y.mean(-1, keepdims=True)
    var = ((y - mean) ** 2).mean(-1, keepdims=True)
    return (y - mean) / jnp.sqrt(var + LN_EPS) * gamma + beta


def _ref_attention_layer(q_in, ctx, key_mask, p):
    bsz, lq, _ = q_in.shape
    lk = ctx.shape[1]
    q = q_in @ p["wq"] + p["bq"]
    k = ctx @ p["wk"] + p["bk"]
    v = ctx @ p["wv"] + p["bv"]

    def heads(t, seq):
        return t.reshape(bsz, seq, NUM_HEADS, DH).transpose(0, 2, 1, 3)

    qh, kh, vh = heads(q, lq), heads(k, lk), heads(v, lk)
    scores = jnp.einsum("bhqd,bhkd->bhqk", qh, kh)
    pos_k = p["abs_pos_emb"][:lk]
    pos_q = p["abs_pos_emb"][:lq]
    scores = scores + jnp.einsum("bhqd,kd->bhqk", qh + pos_q[None, None], pos_k)
    scores = scores / math.sqrt(DH)
    scores = scores + jnp.where(key_mask[:, None, None, :] == 0.0, -jnp.inf, 0.0)
    probs = jax.nn.softmax(scores, axis=-1)
    ctx_layer = jnp.einsum("bhqk,bhkd->bhqd", probs, vh)
    ctx_layer = ctx_layer.transpose(0, 2, 1, 3).reshape(bsz, lq, HIDDEN)
    proj = ctx_layer @ p["wo"] + p["bo"]
    return _ref_layer_norm(proj + q_in, p["gamma"], p["beta"])


def _ref_ffn(x, p):
    hmid = x @ p["w1"] + p["b1"]
    hmid = jax.nn.gelu(hmid, approximate=False)            # exact erf gelu (module's gelu)
    out = hmid @ p["w2"] + p["b2"]
    return _ref_layer_norm(out + x, p["gamma"], p["beta"])


def reference_cme(lang, lmask, audio, amask, P):
    lang_x = _ref_attention_layer(lang, audio, amask, P["lang_att"])
    audio_x = _ref_attention_layer(audio, lang, lmask, P["audio_att"])
    lang_s = _ref_attention_layer(lang_x, lang_x, lmask, P["lang_self"])
    audio_s = _ref_attention_layer(audio_x, audio_x, amask, P["audio_self"])
    return _ref_ffn(lang_s, P["lang_ffn"]), _ref_ffn(audio_s, P["audio_ffn"])


# ----- parameters ------------------------------------------------------------
def make_params(key):
    keys = iter(jax.random.split(key, 64))

    def nrm(shape, scale=0.02):
        return scale * jax.random.normal(next(keys), shape, jnp.float32)

    def att_params():
        return {
            "wq": nrm((HIDDEN, HIDDEN)), "bq": nrm((1, HIDDEN), 0.01),
            "wk": nrm((HIDDEN, HIDDEN)), "bk": nrm((1, HIDDEN), 0.01),
            "wv": nrm((HIDDEN, HIDDEN)), "bv": nrm((1, HIDDEN), 0.01),
            "wo": nrm((HIDDEN, HIDDEN)), "bo": nrm((1, HIDDEN), 0.01),
            "abs_pos_emb": jax.random.normal(next(keys), (512, DH), jnp.float32),
            "gamma": 1.0 + nrm((1, HIDDEN), 0.05),
            "beta": nrm((1, HIDDEN), 0.02),
        }

    def ffn_params():
        return {
            "w1": nrm((HIDDEN, INTER)), "b1": nrm((1, INTER), 0.01),
            "w2": nrm((INTER, HIDDEN)), "b2": nrm((1, HIDDEN), 0.01),
            "gamma": 1.0 + nrm((1, HIDDEN), 0.05),
            "beta": nrm((1, HIDDEN), 0.02),
        }

    return {
        "lang_att": att_params(), "audio_att": att_params(),
        "lang_self": att_params(), "audio_self": att_params(),
        "lang_ffn": ffn_params(), "audio_ffn": ffn_params(),
    }


if __name__ == "__main__":
    root = jax.random.PRNGKey(0)
    kp, kl, ka = jax.random.split(root, 3)
    params = make_params(kp)

    lang_feats = jax.random.normal(kl, (B, L_LANG, HIDDEN), jnp.float32)
    audio_feats = jax.random.normal(ka, (B, L_AUDIO, HIDDEN), jnp.float32)
    # attention masks (1 = keep, 0 = padding); valid lengths differ per batch element
    lang_mask = (jnp.arange(L_LANG)[None, :] <
                 jnp.array([L_LANG, L_LANG - 2])[:, None]).astype(jnp.float32)
    audio_mask = (jnp.arange(L_AUDIO)[None, :] <
                  jnp.array([L_AUDIO - 1, L_AUDIO])[:, None]).astype(jnp.float32)

    # activation-independent packing hoisted out of the per-call path (run once)
    packed = jax.block_until_ready(prepare_cme_packed(params, lang_mask, audio_mask))

    lang_out, audio_out = jax.block_until_ready(
        cme_forward(lang_feats, audio_feats, packed))

    ref_lang, ref_audio = reference_cme(lang_feats, lang_mask, audio_feats, audio_mask, params)

    assert lang_out.shape == (B, L_LANG, HIDDEN)
    assert audio_out.shape == (B, L_AUDIO, HIDDEN)
    max_err = max(float(jnp.abs(lang_out - ref_lang).max()),
                  float(jnp.abs(audio_out - ref_audio).max()))
    assert jnp.allclose(lang_out, ref_lang, rtol=3e-3, atol=3e-3), max_err
    assert jnp.allclose(audio_out, ref_audio, rtol=3e-3, atol=3e-3), max_err
    print("KERNEL_OK")
</pallas_src>

<mosaic_0001>
module attributes {stable_mosaic.version = 11 : i64} {
  func.func @cme_kernel(%arg0: memref<16x64xf32, #tpu.memory_space<vmem>>, %arg1: memref<256x128xf32, #tpu.memory_space<vmem>>, %arg2: memref<12x128xf32, #tpu.memory_space<vmem>>, %arg3: memref<4x16x16xf32, #tpu.memory_space<vmem>>, %arg4: memref<16x128xf32, #tpu.memory_space<vmem>>, %arg5: memref<16x64xf32, #tpu.memory_space<vmem>>) attributes {dimension_semantics = [], scalar_prefetch = 0 : i64, scratch_operands = 0 : i64, tpu.core_type = #tpu.core_type<tc>} {
    %c0 = arith.constant 0 : index
    %c0_0 = arith.constant 0 : index
    %0 = vector.load %arg0[%c0, %c0_0] : memref<16x64xf32, #tpu.memory_space<vmem>>, vector<16x64xf32>
    %1 = vector.extract_strided_slice %0 {offsets = [0, 0], sizes = [16, 32], strides = [1, 1]} : vector<16x64xf32> to vector<16x32xf32>
    %2 = vector.extract_strided_slice %0 {offsets = [0, 32], sizes = [16, 32], strides = [1, 1]} : vector<16x64xf32> to vector<16x32xf32>
    %c0_1 = arith.constant 0 : index
    %c0_2 = arith.constant 0 : index
    %3 = vector.load %arg1[%c0_1, %c0_2] : memref<256x128xf32, #tpu.memory_space<vmem>>, vector<32x128xf32>
    %c0_3 = arith.constant 0 : index
    %c0_4 = arith.constant 0 : index
    %4 = vector.load %arg2[%c0_3, %c0_4] : memref<12x128xf32, #tpu.memory_space<vmem>>, vector<1x128xf32>
    %c1 = arith.constant 1 : index
    %c0_5 = arith.constant 0 : index
    %5 = vector.load %arg2[%c1, %c0_5] : memref<12x128xf32, #tpu.memory_space<vmem>>, vector<1x128xf32>
    %c0_6 = arith.constant 0 : index
    %c0_7 = arith.constant 0 : index
    %c0_8 = arith.constant 0 : index
    %6 = vector.load %arg3[%c0_6, %c0_7, %c0_8] : memref<4x16x16xf32, #tpu.memory_space<vmem>>, vector<1x16x16xf32>
    %7 = vector.shape_cast %6 : vector<1x16x16xf32> to vector<16x16xf32>
    %c0_9 = arith.constant 0 : index
    %c0_10 = arith.constant 0 : index
    %8 = vector.load %arg4[%c0_9, %c0_10] : memref<16x128xf32, #tpu.memory_space<vmem>>, vector<16x32xf32>
    %9 = vector.extract_strided_slice %3 {offsets = [0, 0], sizes = [32, 96], strides = [1, 1]} : vector<32x128xf32> to vector<32x96xf32>
    %10 = vector.extract_strided_slice %3 {offsets = [0, 96], sizes = [32, 32], strides = [1, 1]} : vector<32x128xf32> to vector<32x32xf32>
    %11 = vector.extract_strided_slice %4 {offsets = [0, 0], sizes = [1, 96], strides = [1, 1]} : vector<1x128xf32> to vector<1x96xf32>
    %12 = vector.extract_strided_slice %4 {offsets = [0, 96], sizes = [1, 32], strides = [1, 1]} : vector<1x128xf32> to vector<1x32xf32>
    %13 = vector.extract_strided_slice %5 {offsets = [0, 0], sizes = [1, 32], strides = [1, 1]} : vector<1x128xf32> to vector<1x32xf32>
    %14 = vector.extract_strided_slice %5 {offsets = [0, 32], sizes = [1, 32], strides = [1, 1]} : vector<1x128xf32> to vector<1x32xf32>
    %15 = vector.extract_strided_slice %9 {offsets = [0, 0], sizes = [32, 32], strides = [1, 1]} : vector<32x96xf32> to vector<32x32xf32>
    %cst = arith.constant dense<0.000000e+00> : vector<16x32xf32>
    %16 = tpu.matmul %1, %15, %cst {dimension_numbers = #tpu.dot_dimension_numbers<[1], [0], [0], [1], [0, 0, 1, 1], [], []>} : vector<16x32xf32>, vector<32x32xf32>, vector<16x32xf32> -> vector<16x32xf32>
    %17 = vector.extract_strided_slice %11 {offsets = [0, 0], sizes = [1, 32], strides = [1, 1]} : vector<1x96xf32> to vector<1x32xf32>
    %18 = vector.broadcast %17 : vector<1x32xf32> to vector<16x32xf32>
    %19 = arith.addf %16, %18 : vector<16x32xf32>
    %20 = vector.extract_strided_slice %9 {offsets = [0, 32], sizes = [32, 64], strides = [1, 1]} : vector<32x96xf32> to vector<32x64xf32>
    %cst_11 = arith.constant dense<0.000000e+00> : vector<16x64xf32>
    %21 = tpu.matmul %2, %20, %cst_11 {dimension_numbers = #tpu.dot_dimension_numbers<[1], [0], [0], [1], [0, 0, 1, 1], [], []>} : vector<16x32xf32>, vector<32x64xf32>, vector<16x64xf32> -> vector<16x64xf32>
    %22 = vector.extract_strided_slice %11 {offsets = [0, 32], sizes = [1, 64], strides = [1, 1]} : vector<1x96xf32> to vector<1x64xf32>
    %23 = vector.broadcast %22 : vector<1x64xf32> to vector<16x64xf32>
    %24 = arith.addf %21, %23 : vector<16x64xf32>
    %25 = vector.extract_strided_slice %24 {offsets = [0, 0], sizes = [16, 32], strides = [1, 1]} : vector<16x64xf32> to vector<16x32xf32>
    %26 = vector.extract_strided_slice %24 {offsets = [0, 32], sizes = [16, 32], strides = [1, 1]} : vector<16x64xf32> to vector<16x32xf32>
    %27 = arith.addf %25, %8 : vector<16x32xf32>
    %28 = vector.extract_strided_slice %19 {offsets = [0, 0], sizes = [16, 8], strides = [1, 1]} : vector<16x32xf32> to vector<16x8xf32>
    %29 = vector.extract_strided_slice %19 {offsets = [0, 8], sizes = [16, 8], strides = [1, 1]} : vector<16x32xf32> to vector<16x8xf32>
    %30 = vector.extract_strided_slice %19 {offsets = [0, 16], sizes = [16, 8], strides = [1, 1]} : vector<16x32xf32> to vector<16x8xf32>
    %31 = vector.extract_strided_slice %19 {offsets = [0, 24], sizes = [16, 8], strides = [1, 1]} : vector<16x32xf32> to vector<16x8xf32>
    %32 = vector.shape_cast %28 : vector<16x8xf32> to vector<1x16x8xf32>
    %33 = vector.shape_cast %29 : vector<16x8xf32> to vector<1x16x8xf32>
    %34 = vector.shape_cast %30 : vector<16x8xf32> to vector<1x16x8xf32>
    %35 = vector.shape_cast %31 : vector<16x8xf32> to vector<1x16x8xf32>
    %36 = tpu.concatenate %32, %33, %34, %35 in 0 : vector<1x16x8xf32>, vector<1x16x8xf32>, vector<1x16x8xf32>, vector<1x16x8xf32> -> vector<4x16x8xf32>
    %37 = vector.extract_strided_slice %27 {offsets = [0, 0], sizes = [16, 8], strides = [1, 1]} : vector<16x32xf32> to vector<16x8xf32>
    %38 = vector.extract_strided_slice %27 {offsets = [0, 8], sizes = [16, 8], strides = [1, 1]} : vector<16x32xf32> to vector<16x8xf32>
    %39 = vector.extract_strided_slice %27 {offsets = [0, 16], sizes = [16, 8], strides = [1, 1]} : vector<16x32xf32> to vector<16x8xf32>
    %40 = vector.extract_strided_slice %27 {offsets = [0, 24], sizes = [16, 8], strides = [1, 1]} : vector<16x32xf32> to vector<16x8xf32>
    %41 = vector.shape_cast %37 : vector<16x8xf32> to vector<1x16x8xf32>
    %42 = vector.shape_cast %38 : vector<16x8xf32> to vector<1x16x8xf32>
    %43 = vector.shape_cast %39 : vector<16x8xf32> to vector<1x16x8xf32>
    %44 = vector.shape_cast %40 : vector<16x8xf32> to vector<1x16x8xf32>
    %45 = tpu.concatenate %41, %42, %43, %44 in 0 : vector<1x16x8xf32>, vector<1x16x8xf32>, vector<1x16x8xf32>, vector<1x16x8xf32> -> vector<4x16x8xf32>
    %46 = vector.extract_strided_slice %26 {offsets = [0, 0], sizes = [16, 8], strides = [1, 1]} : vector<16x32xf32> to vector<16x8xf32>
    %47 = vector.extract_strided_slice %26 {offsets = [0, 8], sizes = [16, 8], strides = [1, 1]} : vector<16x32xf32> to vector<16x8xf32>
    %48 = vector.extract_strided_slice %26 {offsets = [0, 16], sizes = [16, 8], strides = [1, 1]} : vector<16x32xf32> to vector<16x8xf32>
    %49 = vector.extract_strided_slice %26 {offsets = [0, 24], sizes = [16, 8], strides = [1, 1]} : vector<16x32xf32> to vector<16x8xf32>
    %50 = vector.shape_cast %46 : vector<16x8xf32> to vector<1x16x8xf32>
    %51 = vector.shape_cast %47 : vector<16x8xf32> to vector<1x16x8xf32>
    %52 = vector.shape_cast %48 : vector<16x8xf32> to vector<1x16x8xf32>
    %53 = vector.shape_cast %49 : vector<16x8xf32> to vector<1x16x8xf32>
    %54 = tpu.concatenate %50, %51, %52, %53 in 0 : vector<1x16x8xf32>, vector<1x16x8xf32>, vector<1x16x8xf32>, vector<1x16x8xf32> -> vector<4x16x8xf32>
    "tpu.trace_start"() <{level = 10 : i32, message = "hqd,hkd->hqk"}> : () -> ()
    %cst_12 = arith.constant dense<0.000000e+00> : vector<4x16x16xf32>
    %55 = tpu.matmul %36, %45, %cst_12 {dimension_numbers = #tpu.dot_dimension_numbers<[2], [2], [1], [1], [0, 0, 0, 1, 1, 1], [0], [0]>} : vector<4x16x8xf32>, vector<4x16x8xf32>, vector<4x16x16xf32> -> vector<4x16x16xf32>
    "tpu.trace_stop"() : () -> ()
    %cst_13 = arith.constant 0.353553385 : f32
    %56 = vector.broadcast %cst_13 : f32 to vector<4x16x16xf32>
    %57 = arith.mulf %55, %56 : vector<4x16x16xf32>
    %58 = vector.shape_cast %7 : vector<16x16xf32> to vector<1x16x16xf32>
    %59 = vector.broadcast %58 : vector<1x16x16xf32> to vector<4x16x16xf32>
    %60 = arith.addf %57, %59 : vector<4x16x16xf32>
    %cst_14 = arith.constant dense<0xFF800000> : vector<4x16xf32>
    %61 = vector.multi_reduction <maximumf>, %60, %cst_14 [2] : vector<4x16x16xf32> to vector<4x16xf32>
    %62 = vector.shape_cast %61 : vector<4x16xf32> to vector<4x16x1xf32>
    %63 = vector.broadcast %62 : vector<4x16x1xf32> to vector<4x16x16xf32>
    %64 = arith.subf %60, %63 : vector<4x16x16xf32>
    %65 = math.exp %64 : vector<4x16x16xf32>
    %cst_15 = arith.constant dense<0.000000e+00> : vector<4x16xf32>
    %66 = vector.multi_reduction <add>, %65, %cst_15 [2] : vector<4x16x16xf32> to vector<4x16xf32>
    %67 = vector.shape_cast %66 : vector<4x16xf32> to vector<4x16x1xf32>
    %68 = tpu.reciprocal %67 {approx = true} : vector<4x16x1xf32> -> vector<4x16x1xf32>
    %69 = vector.broadcast %68 : vector<4x16x1xf32> to vector<4x16x16xf32>
    %70 = arith.mulf %65, %69 : vector<4x16x16xf32>
    "tpu.trace_start"() <{level = 10 : i32, message = "hqk,hkd->hqd"}> : () -> ()
    %cst_16 = arith.constant dense<0.000000e+00> : vector<4x16x8xf32>
    %71 = tpu.matmul %70, %54, %cst_16 {dimension_numbers = #tpu.dot_dimension_numbers<[2], [1], [1], [2], [0, 0, 0, 1, 1, 2], [0], [0]>} : vector<4x16x16xf32>, vector<4x16x8xf32>, vector<4x16x8xf32> -> vector<4x16x8xf32>
    "tpu.trace_stop"() : () -> ()
    %72 = vector.extract_strided_slice %71 {offsets = [0, 0, 0], sizes = [1, 16, 8], strides = [1, 1, 1]} : vector<4x16x8xf32> to vector<1x16x8xf32>
    %73 = vector.shape_cast %72 : vector<1x16x8xf32> to vector<16x8xf32>
    %74 = vector.extract_strided_slice %71 {offsets = [1, 0, 0], sizes = [1, 16, 8], strides = [1, 1, 1]} : vector<4x16x8xf32> to vector<1x16x8xf32>
    %75 = vector.shape_cast %74 : vector<1x16x8xf32> to vector<16x8xf32>
    %76 = vector.extract_strided_slice %71 {offsets = [2, 0, 0], sizes = [1, 16, 8], strides = [1, 1, 1]} : vector<4x16x8xf32> to vector<1x16x8xf32>
    %77 = vector.shape_cast %76 : vector<1x16x8xf32> to vector<16x8xf32>
    %78 = vector.extract_strided_slice %71 {offsets = [3, 0, 0], sizes = [1, 16, 8], strides = [1, 1, 1]} : vector<4x16x8xf32> to vector<1x16x8xf32>
    %79 = vector.shape_cast %78 : vector<1x16x8xf32> to vector<16x8xf32>
    %80 = tpu.concatenate %73, %75, %77, %79 in 1 : vector<16x8xf32>, vector<16x8xf32>, vector<16x8xf32>, vector<16x8xf32> -> vector<16x32xf32>
    %cst_17 = arith.constant dense<0.000000e+00> : vector<16x32xf32>
    %81 = tpu.matmul %80, %10, %cst_17 {dimension_numbers = #tpu.dot_dimension_numbers<[1], [0], [0], [1], [0, 0, 1, 1], [], []>} : vector<16x32xf32>, vector<32x32xf32>, vector<16x32xf32> -> vector<16x32xf32>
    %82 = vector.broadcast %12 : vector<1x32xf32> to vector<16x32xf32>
    %83 = arith.addf %81, %82 : vector<16x32xf32>
    %84 = arith.addf %83, %1 : vector<16x32xf32>
    %cst_18 = arith.constant dense<0.000000e+00> : vector<16xf32>
    %85 = vector.multi_reduction <add>, %84, %cst_18 [1] : vector<16x32xf32> to vector<16xf32>
    %86 = vector.shape_cast %85 : vector<16xf32> to vector<16x1xf32>
    %cst_19 = arith.constant 3.200000e+01 : f32
    %87 = vector.broadcast %cst_19 : f32 to vector<16x1xf32>
    %88 = arith.divf %86, %87 : vector<16x1xf32>
    %89 = arith.mulf %84, %84 : vector<16x32xf32>
    %cst_20 = arith.constant dense<0.000000e+00> : vector<16xf32>
    %90 = vector.multi_reduction <add>, %89, %cst_20 [1] : vector<16x32xf32> to vector<16xf32>
    %91 = vector.shape_cast %90 : vector<16xf32> to vector<16x1xf32>
    %cst_21 = arith.constant 3.200000e+01 : f32
    %92 = vector.broadcast %cst_21 : f32 to vector<16x1xf32>
    %93 = arith.divf %91, %92 : vector<16x1xf32>
    %94 = arith.mulf %88, %88 : vector<16x1xf32>
    %95 = arith.subf %93, %94 : vector<16x1xf32>
    %96 = vector.broadcast %88 : vector<16x1xf32> to vector<16x32xf32>
    %97 = arith.subf %84, %96 : vector<16x32xf32>
    %cst_22 = arith.constant 9.99999996E-13 : f32
    %98 = vector.broadcast %cst_22 : f32 to vector<16x1xf32>
    %99 = arith.addf %95, %98 : vector<16x1xf32>
    %100 = math.rsqrt %99 : vector<16x1xf32>
    %101 = vector.broadcast %100 : vector<16x1xf32> to vector<16x32xf32>
    %102 = arith.mulf %97, %101 : vector<16x32xf32>
    %103 = vector.broadcast %13 : vector<1x32xf32> to vector<16x32xf32>
    %104 = arith.mulf %102, %103 : vector<16x32xf32>
    %105 = vector.broadcast %14 : vector<1x32xf32> to vector<16x32xf32>
    %106 = arith.addf %104, %105 : vector<16x32xf32>
    %c32 = arith.constant 32 : index
    %c0_23 = arith.constant 0 : index
    %107 = vector.load %arg1[%c32, %c0_23] : memref<256x128xf32, #tpu.memory_space<vmem>>, vector<32x128xf32>
    %c2 = arith.constant 2 : index
    %c0_24 = arith.constant 0 : index
    %108 = vector.load %arg2[%c2, %c0_24] : memref<12x128xf32, #tpu.memory_space<vmem>>, vector<1x128xf32>
    %c3 = arith.constant 3 : index
    %c0_25 = arith.constant 0 : index
    %109 = vector.load %arg2[%c3, %c0_25] : memref<12x128xf32, #tpu.memory_space<vmem>>, vector<1x128xf32>
    %c1_26 = arith.constant 1 : index
    %c0_27 = arith.constant 0 : index
    %c0_28 = arith.constant 0 : index
    %110 = vector.load %arg3[%c1_26, %c0_27, %c0_28] : memref<4x16x16xf32, #tpu.memory_space<vmem>>, vector<1x16x16xf32>
    %111 = vector.shape_cast %110 : vector<1x16x16xf32> to vector<16x16xf32>
    %c0_29 = arith.constant 0 : index
    %c32_30 = arith.constant 32 : index
    %112 = vector.load %arg4[%c0_29, %c32_30] : memref<16x128xf32, #tpu.memory_space<vmem>>, vector<16x32xf32>
    %113 = vector.extract_strided_slice %107 {offsets = [0, 0], sizes = [32, 96], strides = [1, 1]} : vector<32x128xf32> to vector<32x96xf32>
    %114 = vector.extract_strided_slice %107 {offsets = [0, 96], sizes = [32, 32], strides = [1, 1]} : vector<32x128xf32> to vector<32x32xf32>
    %115 = vector.extract_strided_slice %108 {offsets = [0, 0], sizes = [1, 96], strides = [1, 1]} : vector<1x128xf32> to vector<1x96xf32>
    %116 = vector.extract_strided_slice %108 {offsets = [0, 96], sizes = [1, 32], strides = [1, 1]} : vector<1x128xf32> to vector<1x32xf32>
    %117 = vector.extract_strided_slice %109 {offsets = [0, 0], sizes = [1, 32], strides = [1, 1]} : vector<1x128xf32> to vector<1x32xf32>
    %118 = vector.extract_strided_slice %109 {offsets = [0, 32], sizes = [1, 32], strides = [1, 1]} : vector<1x128xf32> to vector<1x32xf32>
    %119 = vector.extract_strided_slice %113 {offsets = [0, 0], sizes = [32, 32], strides = [1, 1]} : vector<32x96xf32> to vector<32x32xf32>
    %cst_31 = arith.constant dense<0.000000e+00> : vector<16x32xf32>
    %120 = tpu.matmul %2, %119, %cst_31 {dimension_numbers = #tpu.dot_dimension_numbers<[1], [0], [0], [1], [0, 0, 1, 1], [], []>} : vector<16x32xf32>, vector<32x32xf32>, vector<16x32xf32> -> vector<16x32xf32>
    %121 = vector.extract_strided_slice %115 {offsets = [0, 0], sizes = [1, 32], strides = [1, 1]} : vector<1x96xf32> to vector<1x32xf32>
    %122 = vector.broadcast %121 : vector<1x32xf32> to vector<16x32xf32>
    %123 = arith.addf %120, %122 : vector<16x32xf32>
    %124 = vector.extract_strided_slice %113 {offsets = [0, 32], sizes = [32, 64], strides = [1, 1]} : vector<32x96xf32> to vector<32x64xf32>
    %cst_32 = arith.constant dense<0.000000e+00> : vector<16x64xf32>
    %125 = tpu.matmul %1, %124, %cst_32 {dimension_numbers = #tpu.dot_dimension_numbers<[1], [0], [0], [1], [0, 0, 1, 1], [], []>} : vector<16x32xf32>, vector<32x64xf32>, vector<16x64xf32> -> vector<16x64xf32>
    %126 = vector.extract_strided_slice %115 {offsets = [0, 32], sizes = [1, 64], strides = [1, 1]} : vector<1x96xf32> to vector<1x64xf32>
    %127 = vector.broadcast %126 : vector<1x64xf32> to vector<16x64xf32>
    %128 = arith.addf %125, %127 : vector<16x64xf32>
    %129 = vector.extract_strided_slice %128 {offsets = [0, 0], sizes = [16, 32], strides = [1, 1]} : vector<16x64xf32> to vector<16x32xf32>
    %130 = vector.extract_strided_slice %128 {offsets = [0, 32], sizes = [16, 32], strides = [1, 1]} : vector<16x64xf32> to vector<16x32xf32>
    %131 = arith.addf %129, %112 : vector<16x32xf32>
    %132 = vector.extract_strided_slice %123 {offsets = [0, 0], sizes = [16, 8], strides = [1, 1]} : vector<16x32xf32> to vector<16x8xf32>
    %133 = vector.extract_strided_slice %123 {offsets = [0, 8], sizes = [16, 8], strides = [1, 1]} : vector<16x32xf32> to vector<16x8xf32>
    %134 = vector.extract_strided_slice %123 {offsets = [0, 16], sizes = [16, 8], strides = [1, 1]} : vector<16x32xf32> to vector<16x8xf32>
    %135 = vector.extract_strided_slice %123 {offsets = [0, 24], sizes = [16, 8], strides = [1, 1]} : vector<16x32xf32> to vector<16x8xf32>
    %136 = vector.shape_cast %132 : vector<16x8xf32> to vector<1x16x8xf32>
    %137 = vector.shape_cast %133 : vector<16x8xf32> to vector<1x16x8xf32>
    %138 = vector.shape_cast %134 : vector<16x8xf32> to vector<1x16x8xf32>
    %139 = vector.shape_cast %135 : vector<16x8xf32> to vector<1x16x8xf32>
    %140 = tpu.concatenate %136, %137, %138, %139 in 0 : vector<1x16x8xf32>, vector<1x16x8xf32>, vector<1x16x8xf32>, vector<1x16x8xf32> -> vector<4x16x8xf32>
    %141 = vector.extract_strided_slice %131 {offsets = [0, 0], sizes = [16, 8], strides = [1, 1]} : vector<16x32xf32> to vector<16x8xf32>
    %142 = vector.extract_strided_slice %131 {offsets = [0, 8], sizes = [16, 8], strides = [1, 1]} : vector<16x32xf32> to vector<16x8xf32>
    %143 = vector.extract_strided_slice %131 {offsets = [0, 16], sizes = [16, 8], strides = [1, 1]} : vector<16x32xf32> to vector<16x8xf32>
    %144 = vector.extract_strided_slice %131 {offsets = [0, 24], sizes = [16, 8], strides = [1, 1]} : vector<16x32xf32> to vector<16x8xf32>
    %145 = vector.shape_cast %141 : vector<16x8xf32> to vector<1x16x8xf32>
    %146 = vector.shape_cast %142 : vector<16x8xf32> to vector<1x16x8xf32>
    %147 = vector.shape_cast %143 : vector<16x8xf32> to vector<1x16x8xf32>
    %148 = vector.shape_cast %144 : vector<16x8xf32> to vector<1x16x8xf32>
    %149 = tpu.concatenate %145, %146, %147, %148 in 0 : vector<1x16x8xf32>, vector<1x16x8xf32>, vector<1x16x8xf32>, vector<1x16x8xf32> -> vector<4x16x8xf32>
    %150 = vector.extract_strided_slice %130 {offsets = [0, 0], sizes = [16, 8], strides = [1, 1]} : vector<16x32xf32> to vector<16x8xf32>
    %151 = vector.extract_strided_slice %130 {offsets = [0, 8], sizes = [16, 8], strides = [1, 1]} : vector<16x32xf32> to vector<16x8xf32>
    %152 = vector.extract_strided_slice %130 {offsets = [0, 16], sizes = [16, 8], strides = [1, 1]} : vector<16x32xf32> to vector<16x8xf32>
    %153 = vector.extract_strided_slice %130 {offsets = [0, 24], sizes = [16, 8], strides = [1, 1]} : vector<16x32xf32> to vector<16x8xf32>
    %154 = vector.shape_cast %150 : vector<16x8xf32> to vector<1x16x8xf32>
    %155 = vector.shape_cast %151 : vector<16x8xf32> to vector<1x16x8xf32>
    %156 = vector.shape_cast %152 : vector<16x8xf32> to vector<1x16x8xf32>
    %157 = vector.shape_cast %153 : vector<16x8xf32> to vector<1x16x8xf32>
    %158 = tpu.concatenate %154, %155, %156, %157 in 0 : vector<1x16x8xf32>, vector<1x16x8xf32>, vector<1x16x8xf32>, vector<1x16x8xf32> -> vector<4x16x8xf32>
    "tpu.trace_start"() <{level = 10 : i32, message = "hqd,hkd->hqk"}> : () -> ()
    %cst_33 = arith.constant dense<0.000000e+00> : vector<4x16x16xf32>
    %159 = tpu.matmul %140, %149, %cst_33 {dimension_numbers = #tpu.dot_dimension_numbers<[2], [2], [1], [1], [0, 0, 0, 1, 1, 1], [0], [0]>} : vector<4x16x8xf32>, vector<4x16x8xf32>, vector<4x16x16xf32> -> vector<4x16x16xf32>
    "tpu.trace_stop"() : () -> ()
    %cst_34 = arith.constant 0.353553385 : f32
    %160 = vector.broadcast %cst_34 : f32 to vector<4x16x16xf32>
    %161 = arith.mulf %159, %160 : vector<4x16x16xf32>
    %162 = vector.shape_cast %111 : vector<16x16xf32> to vector<1x16x16xf32>
    %163 = vector.broadcast %162 : vector<1x16x16xf32> to vector<4x16x16xf32>
    %164 = arith.addf %161, %163 : vector<4x16x16xf32>
    %cst_35 = arith.constant dense<0xFF800000> : vector<4x16xf32>
    %165 = vector.multi_reduction <maximumf>, %164, %cst_35 [2] : vector<4x16x16xf32> to vector<4x16xf32>
    %166 = vector.shape_cast %165 : vector<4x16xf32> to vector<4x16x1xf32>
    %167 = vector.broadcast %166 : vector<4x16x1xf32> to vector<4x16x16xf32>
    %168 = arith.subf %164, %167 : vector<4x16x16xf32>
    %169 = math.exp %168 : vector<4x16x16xf32>
    %cst_36 = arith.constant dense<0.000000e+00> : vector<4x16xf32>
    %170 = vector.multi_reduction <add>, %169, %cst_36 [2] : vector<4x16x16xf32> to vector<4x16xf32>
    %171 = vector.shape_cast %170 : vector<4x16xf32> to vector<4x16x1xf32>
    %172 = tpu.reciprocal %171 {approx = true} : vector<4x16x1xf32> -> vector<4x16x1xf32>
    %173 = vector.broadcast %172 : vector<4x16x1xf32> to vector<4x16x16xf32>
    %174 = arith.mulf %169, %173 : vector<4x16x16xf32>
    "tpu.trace_start"() <{level = 10 : i32, message = "hqk,hkd->hqd"}> : () -> ()
    %cst_37 = arith.constant dense<0.000000e+00> : vector<4x16x8xf32>
    %175 = tpu.matmul %174, %158, %cst_37 {dimension_numbers = #tpu.dot_dimension_numbers<[2], [1], [1], [2], [0, 0, 0, 1, 1, 2], [0], [0]>} : vector<4x16x16xf32>, vector<4x16x8xf32>, vector<4x16x8xf32> -> vector<4x16x8xf32>
    "tpu.trace_stop"() : () -> ()
    %176 = vector.extract_strided_slice %175 {offsets = [0, 0, 0], sizes = [1, 16, 8], strides = [1, 1, 1]} : vector<4x16x8xf32> to vector<1x16x8xf32>
    %177 = vector.shape_cast %176 : vector<1x16x8xf32> to vector<16x8xf32>
    %178 = vector.extract_strided_slice %175 {offsets = [1, 0, 0], sizes = [1, 16, 8], strides = [1, 1, 1]} : vector<4x16x8xf32> to vector<1x16x8xf32>
    %179 = vector.shape_cast %178 : vector<1x16x8xf32> to vector<16x8xf32>
    %180 = vector.extract_strided_slice %175 {offsets = [2, 0, 0], sizes = [1, 16, 8], strides = [1, 1, 1]} : vector<4x16x8xf32> to vector<1x16x8xf32>
    %181 = vector.shape_cast %180 : vector<1x16x8xf32> to vector<16x8xf32>
    %182 = vector.extract_strided_slice %175 {offsets = [3, 0, 0], sizes = [1, 16, 8], strides = [1, 1, 1]} : vector<4x16x8xf32> to vector<1x16x8xf32>
    %183 = vector.shape_cast %182 : vector<1x16x8xf32> to vector<16x8xf32>
    %184 = tpu.concatenate %177, %179, %181, %183 in 1 : vector<16x8xf32>, vector<16x8xf32>, vector<16x8xf32>, vector<16x8xf32> -> vector<16x32xf32>
    %cst_38 = arith.constant dense<0.000000e+00> : vector<16x32xf32>
    %185 = tpu.matmul %184, %114, %cst_38 {dimension_numbers = #tpu.dot_dimension_numbers<[1], [0], [0], [1], [0, 0, 1, 1], [], []>} : vector<16x32xf32>, vector<32x32xf32>, vector<16x32xf32> -> vector<16x32xf32>
    %186 = vector.broadcast %116 : vector<1x32xf32> to vector<16x32xf32>
    %187 = arith.addf %185, %186 : vector<16x32xf32>
    %188 = arith.addf %187, %2 : vector<16x32xf32>
    %cst_39 = arith.constant dense<0.000000e+00> : vector<16xf32>
    %189 = vector.multi_reduction <add>, %188, %cst_39 [1] : vector<16x32xf32> to vector<16xf32>
    %190 = vector.shape_cast %189 : vector<16xf32> to vector<16x1xf32>
    %cst_40 = arith.constant 3.200000e+01 : f32
    %191 = vector.broadcast %cst_40 : f32 to vector<16x1xf32>
    %192 = arith.divf %190, %191 : vector<16x1xf32>
    %193 = arith.mulf %188, %188 : vector<16x32xf32>
    %cst_41 = arith.constant dense<0.000000e+00> : vector<16xf32>
    %194 = vector.multi_reduction <add>, %193, %cst_41 [1] : vector<16x32xf32> to vector<16xf32>
    %195 = vector.shape_cast %194 : vector<16xf32> to vector<16x1xf32>
    %cst_42 = arith.constant 3.200000e+01 : f32
    %196 = vector.broadcast %cst_42 : f32 to vector<16x1xf32>
    %197 = arith.divf %195, %196 : vector<16x1xf32>
    %198 = arith.mulf %192, %192 : vector<16x1xf32>
    %199 = arith.subf %197, %198 : vector<16x1xf32>
    %200 = vector.broadcast %192 : vector<16x1xf32> to vector<16x32xf32>
    %201 = arith.subf %188, %200 : vector<16x32xf32>
    %cst_43 = arith.constant 9.99999996E-13 : f32
    %202 = vector.broadcast %cst_43 : f32 to vector<16x1xf32>
    %203 = arith.addf %199, %202 : vector<16x1xf32>
    %204 = math.rsqrt %203 : vector<16x1xf32>
    %205 = vector.broadcast %204 : vector<16x1xf32> to vector<16x32xf32>
    %206 = arith.mulf %201, %205 : vector<16x32xf32>
    %207 = vector.broadcast %117 : vector<1x32xf32> to vector<16x32xf32>
    %208 = arith.mulf %206, %207 : vector<16x32xf32>
    %209 = vector.broadcast %118 : vector<1x32xf32> to vector<16x32xf32>
    %210 = arith.addf %208, %209 : vector<16x32xf32>
    %c64 = arith.constant 64 : index
    %c0_44 = arith.constant 0 : index
    %211 = vector.load %arg1[%c64, %c0_44] : memref<256x128xf32, #tpu.memory_space<vmem>>, vector<32x128xf32>
    %c4 = arith.constant 4 : index
    %c0_45 = arith.constant 0 : index
    %212 = vector.load %arg2[%c4, %c0_45] : memref<12x128xf32, #tpu.memory_space<vmem>>, vector<1x128xf32>
    %c5 = arith.constant 5 : index
    %c0_46 = arith.constant 0 : index
    %213 = vector.load %arg2[%c5, %c0_46] : memref<12x128xf32, #tpu.memory_space<vmem>>, vector<1x128xf32>
    %c2_47 = arith.constant 2 : index
    %c0_48 = arith.constant 0 : index
    %c0_49 = arith.constant 0 : index
    %214 = vector.load %arg3[%c2_47, %c0_48, %c0_49] : memref<4x16x16xf32, #tpu.memory_space<vmem>>, vector<1x16x16xf32>
    %215 = vector.shape_cast %214 : vector<1x16x16xf32> to vector<16x16xf32>
    %c0_50 = arith.constant 0 : index
    %c64_51 = arith.constant 64 : index
    %216 = vector.load %arg4[%c0_50, %c64_51] : memref<16x128xf32, #tpu.memory_space<vmem>>, vector<16x32xf32>
    %217 = vector.extract_strided_slice %211 {offsets = [0, 0], sizes = [32, 96], strides = [1, 1]} : vector<32x128xf32> to vector<32x96xf32>
    %218 = vector.extract_strided_slice %211 {offsets = [0, 96], sizes = [32, 32], strides = [1, 1]} : vector<32x128xf32> to vector<32x32xf32>
    %219 = vector.extract_strided_slice %212 {offsets = [0, 0], sizes = [1, 96], strides = [1, 1]} : vector<1x128xf32> to vector<1x96xf32>
    %220 = vector.extract_strided_slice %212 {offsets = [0, 96], sizes = [1, 32], strides = [1, 1]} : vector<1x128xf32> to vector<1x32xf32>
    %221 = vector.extract_strided_slice %213 {offsets = [0, 0], sizes = [1, 32], strides = [1, 1]} : vector<1x128xf32> to vector<1x32xf32>
    %222 = vector.extract_strided_slice %213 {offsets = [0, 32], sizes = [1, 32], strides = [1, 1]} : vector<1x128xf32> to vector<1x32xf32>
    %cst_52 = arith.constant dense<0.000000e+00> : vector<16x96xf32>
    %223 = tpu.matmul %106, %217, %cst_52 {dimension_numbers = #tpu.dot_dimension_numbers<[1], [0], [0], [1], [0, 0, 1, 1], [], []>} : vector<16x32xf32>, vector<32x96xf32>, vector<16x96xf32> -> vector<16x96xf32>
    %224 = vector.broadcast %219 : vector<1x96xf32> to vector<16x96xf32>
    %225 = arith.addf %223, %224 : vector<16x96xf32>
    %226 = vector.extract_strided_slice %225 {offsets = [0, 0], sizes = [16, 32], strides = [1, 1]} : vector<16x96xf32> to vector<16x32xf32>
    %227 = vector.extract_strided_slice %225 {offsets = [0, 32], sizes = [16, 32], strides = [1, 1]} : vector<16x96xf32> to vector<16x32xf32>
    %228 = vector.extract_strided_slice %225 {offsets = [0, 64], sizes = [16, 32], strides = [1, 1]} : vector<16x96xf32> to vector<16x32xf32>
    %229 = arith.addf %227, %216 : vector<16x32xf32>
    %230 = vector.extract_strided_slice %226 {offsets = [0, 0], sizes = [16, 8], strides = [1, 1]} : vector<16x32xf32> to vector<16x8xf32>
    %231 = vector.extract_strided_slice %226 {offsets = [0, 8], sizes = [16, 8], strides = [1, 1]} : vector<16x32xf32> to vector<16x8xf32>
    %232 = vector.extract_strided_slice %226 {offsets = [0, 16], sizes = [16, 8], strides = [1, 1]} : vector<16x32xf32> to vector<16x8xf32>
    %233 = vector.extract_strided_slice %226 {offsets = [0, 24], sizes = [16, 8], strides = [1, 1]} : vector<16x32xf32> to vector<16x8xf32>
    %234 = vector.shape_cast %230 : vector<16x8xf32> to vector<1x16x8xf32>
    %235 = vector.shape_cast %231 : vector<16x8xf32> to vector<1x16x8xf32>
    %236 = vector.shape_cast %232 : vector<16x8xf32> to vector<1x16x8xf32>
    %237 = vector.shape_cast %233 : vector<16x8xf32> to vector<1x16x8xf32>
    %238 = tpu.concatenate %234, %235, %236, %237 in 0 : vector<1x16x8xf32>, vector<1x16x8xf32>, vector<1x16x8xf32>, vector<1x16x8xf32> -> vector<4x16x8xf32>
    %239 = vector.extract_strided_slice %229 {offsets = [0, 0], sizes = [16, 8], strides = [1, 1]} : vector<16x32xf32> to vector<16x8xf32>
    %240 = vector.extract_strided_slice %229 {offsets = [0, 8], sizes = [16, 8], strides = [1, 1]} : vector<16x32xf32> to vector<16x8xf32>
    %241 = vector.extract_strided_slice %229 {offsets = [0, 16], sizes = [16, 8], strides = [1, 1]} : vector<16x32xf32> to vector<16x8xf32>
    %242 = vector.extract_strided_slice %229 {offsets = [0, 24], sizes = [16, 8], strides = [1, 1]} : vector<16x32xf32> to vector<16x8xf32>
    %243 = vector.shape_cast %239 : vector<16x8xf32> to vector<1x16x8xf32>
    %244 = vector.shape_cast %240 : vector<16x8xf32> to vector<1x16x8xf32>
    %245 = vector.shape_cast %241 : vector<16x8xf32> to vector<1x16x8xf32>
    %246 = vector.shape_cast %242 : vector<16x8xf32> to vector<1x16x8xf32>
    %247 = tpu.concatenate %243, %244, %245, %246 in 0 : vector<1x16x8xf32>, vector<1x16x8xf32>, vector<1x16x8xf32>, vector<1x16x8xf32> -> vector<4x16x8xf32>
    %248 = vector.extract_strided_slice %228 {offsets = [0, 0], sizes = [16, 8], strides = [1, 1]} : vector<16x32xf32> to vector<16x8xf32>
    %249 = vector.extract_strided_slice %228 {offsets = [0, 8], sizes = [16, 8], strides = [1, 1]} : vector<16x32xf32> to vector<16x8xf32>
    %250 = vector.extract_strided_slice %228 {offsets = [0, 16], sizes = [16, 8], strides = [1, 1]} : vector<16x32xf32> to vector<16x8xf32>
    %251 = vector.extract_strided_slice %228 {offsets = [0, 24], sizes = [16, 8], strides = [1, 1]} : vector<16x32xf32> to vector<16x8xf32>
    %252 = vector.shape_cast %248 : vector<16x8xf32> to vector<1x16x8xf32>
    %253 = vector.shape_cast %249 : vector<16x8xf32> to vector<1x16x8xf32>
    %254 = vector.shape_cast %250 : vector<16x8xf32> to vector<1x16x8xf32>
    %255 = vector.shape_cast %251 : vector<16x8xf32> to vector<1x16x8xf32>
    %256 = tpu.concatenate %252, %253, %254, %255 in 0 : vector<1x16x8xf32>, vector<1x16x8xf32>, vector<1x16x8xf32>, vector<1x16x8xf32> -> vector<4x16x8xf32>
    "tpu.trace_start"() <{level = 10 : i32, message = "hqd,hkd->hqk"}> : () -> ()
    %cst_53 = arith.constant dense<0.000000e+00> : vector<4x16x16xf32>
    %257 = tpu.matmul %238, %247, %cst_53 {dimension_numbers = #tpu.dot_dimension_numbers<[2], [2], [1], [1], [0, 0, 0, 1, 1, 1], [0], [0]>} : vector<4x16x8xf32>, vector<4x16x8xf32>, vector<4x16x16xf32> -> vector<4x16x16xf32>
    "tpu.trace_stop"() : () -> ()
    %cst_54 = arith.constant 0.353553385 : f32
    %258 = vector.broadcast %cst_54 : f32 to vector<4x16x16xf32>
    %259 = arith.mulf %257, %258 : vector<4x16x16xf32>
    %260 = vector.shape_cast %215 : vector<16x16xf32> to vector<1x16x16xf32>
    %261 = vector.broadcast %260 : vector<1x16x16xf32> to vector<4x16x16xf32>
    %262 = arith.addf %259, %261 : vector<4x16x16xf32>
    %cst_55 = arith.constant dense<0xFF800000> : vector<4x16xf32>
    %263 = vector.multi_reduction <maximumf>, %262, %cst_55 [2] : vector<4x16x16xf32> to vector<4x16xf32>
    %264 = vector.shape_cast %263 : vector<4x16xf32> to vector<4x16x1xf32>
    %265 = vector.broadcast %264 : vector<4x16x1xf32> to vector<4x16x16xf32>
    %266 = arith.subf %262, %265 : vector<4x16x16xf32>
    %267 = math.exp %266 : vector<4x16x16xf32>
    %cst_56 = arith.constant dense<0.000000e+00> : vector<4x16xf32>
    %268 = vector.multi_reduction <add>, %267, %cst_56 [2] : vector<4x16x16xf32> to vector<4x16xf32>
    %269 = vector.shape_cast %268 : vector<4x16xf32> to vector<4x16x1xf32>
    %270 = tpu.reciprocal %269 {approx = true} : vector<4x16x1xf32> -> vector<4x16x1xf32>
    %271 = vector.broadcast %270 : vector<4x16x1xf32> to vector<4x16x16xf32>
    %272 = arith.mulf %267, %271 : vector<4x16x16xf32>
    "tpu.trace_start"() <{level = 10 : i32, message = "hqk,hkd->hqd"}> : () -> ()
    %cst_57 = arith.constant dense<0.000000e+00> : vector<4x16x8xf32>
    %273 = tpu.matmul %272, %256, %cst_57 {dimension_numbers = #tpu.dot_dimension_numbers<[2], [1], [1], [2], [0, 0, 0, 1, 1, 2], [0], [0]>} : vector<4x16x16xf32>, vector<4x16x8xf32>, vector<4x16x8xf32> -> vector<4x16x8xf32>
    "tpu.trace_stop"() : () -> ()
    %274 = vector.extract_strided_slice %273 {offsets = [0, 0, 0], sizes = [1, 16, 8], strides = [1, 1, 1]} : vector<4x16x8xf32> to vector<1x16x8xf32>
    %275 = vector.shape_cast %274 : vector<1x16x8xf32> to vector<16x8xf32>
    %276 = vector.extract_strided_slice %273 {offsets = [1, 0, 0], sizes = [1, 16, 8], strides = [1, 1, 1]} : vector<4x16x8xf32> to vector<1x16x8xf32>
    %277 = vector.shape_cast %276 : vector<1x16x8xf32> to vector<16x8xf32>
    %278 = vector.extract_strided_slice %273 {offsets = [2, 0, 0], sizes = [1, 16, 8], strides = [1, 1, 1]} : vector<4x16x8xf32> to vector<1x16x8xf32>
    %279 = vector.shape_cast %278 : vector<1x16x8xf32> to vector<16x8xf32>
    %280 = vector.extract_strided_slice %273 {offsets = [3, 0, 0], sizes = [1, 16, 8], strides = [1, 1, 1]} : vector<4x16x8xf32> to vector<1x16x8xf32>
    %281 = vector.shape_cast %280 : vector<1x16x8xf32> to vector<16x8xf32>
    %282 = tpu.concatenate %275, %277, %279, %281 in 1 : vector<16x8xf32>, vector<16x8xf32>, vector<16x8xf32>, vector<16x8xf32> -> vector<16x32xf32>
    %cst_58 = arith.constant dense<0.000000e+00> : vector<16x32xf32>
    %283 = tpu.matmul %282, %218, %cst_58 {dimension_numbers = #tpu.dot_dimension_numbers<[1], [0], [0], [1], [0, 0, 1, 1], [], []>} : vector<16x32xf32>, vector<32x32xf32>, vector<16x32xf32> -> vector<16x32xf32>
    %284 = vector.broadcast %220 : vector<1x32xf32> to vector<16x32xf32>
    %285 = arith.addf %283, %284 : vector<16x32xf32>
    %286 = arith.addf %285, %106 : vector<16x32xf32>
    %cst_59 = arith.constant dense<0.000000e+00> : vector<16xf32>
    %287 = vector.multi_reduction <add>, %286, %cst_59 [1] : vector<16x32xf32> to vector<16xf32>
    %288 = vector.shape_cast %287 : vector<16xf32> to vector<16x1xf32>
    %cst_60 = arith.constant 3.200000e+01 : f32
    %289 = vector.broadcast %cst_60 : f32 to vector<16x1xf32>
    %290 = arith.divf %288, %289 : vector<16x1xf32>
    %291 = arith.mulf %286, %286 : vector<16x32xf32>
    %cst_61 = arith.constant dense<0.000000e+00> : vector<16xf32>
    %292 = vector.multi_reduction <add>, %291, %cst_61 [1] : vector<16x32xf32> to vector<16xf32>
    %293 = vector.shape_cast %292 : vector<16xf32> to vector<16x1xf32>
    %cst_62 = arith.constant 3.200000e+01 : f32
    %294 = vector.broadcast %cst_62 : f32 to vector<16x1xf32>
    %295 = arith.divf %293, %294 : vector<16x1xf32>
    %296 = arith.mulf %290, %290 : vector<16x1xf32>
    %297 = arith.subf %295, %296 : vector<16x1xf32>
    %298 = vector.broadcast %290 : vector<16x1xf32> to vector<16x32xf32>
    %299 = arith.subf %286, %298 : vector<16x32xf32>
    %cst_63 = arith.constant 9.99999996E-13 : f32
    %300 = vector.broadcast %cst_63 : f32 to vector<16x1xf32>
    %301 = arith.addf %297, %300 : vector<16x1xf32>
    %302 = math.rsqrt %301 : vector<16x1xf32>
    %303 = vector.broadcast %302 : vector<16x1xf32> to vector<16x32xf32>
    %304 = arith.mulf %299, %303 : vector<16x32xf32>
    %305 = vector.broadcast %221 : vector<1x32xf32> to vector<16x32xf32>
    %306 = arith.mulf %304, %305 : vector<16x32xf32>
    %307 = vector.broadcast %222 : vector<1x32xf32> to vector<16x32xf32>
    %308 = arith.addf %306, %307 : vector<16x32xf32>
    %c96 = arith.constant 96 : index
    %c0_64 = arith.constant 0 : index
    %309 = vector.load %arg1[%c96, %c0_64] : memref<256x128xf32, #tpu.memory_space<vmem>>, vector<32x128xf32>
    %c6 = arith.constant 6 : index
    %c0_65 = arith.constant 0 : index
    %310 = vector.load %arg2[%c6, %c0_65] : memref<12x128xf32, #tpu.memory_space<vmem>>, vector<1x128xf32>
    %c7 = arith.constant 7 : index
    %c0_66 = arith.constant 0 : index
    %311 = vector.load %arg2[%c7, %c0_66] : memref<12x128xf32, #tpu.memory_space<vmem>>, vector<1x128xf32>
    %c3_67 = arith.constant 3 : index
    %c0_68 = arith.constant 0 : index
    %c0_69 = arith.constant 0 : index
    %312 = vector.load %arg3[%c3_67, %c0_68, %c0_69] : memref<4x16x16xf32, #tpu.memory_space<vmem>>, vector<1x16x16xf32>
    %313 = vector.shape_cast %312 : vector<1x16x16xf32> to vector<16x16xf32>
    %c0_70 = arith.constant 0 : index
    %c96_71 = arith.constant 96 : index
    %314 = vector.load %arg4[%c0_70, %c96_71] : memref<16x128xf32, #tpu.memory_space<vmem>>, vector<16x32xf32>
    %315 = vector.extract_strided_slice %309 {offsets = [0, 0], sizes = [32, 96], strides = [1, 1]} : vector<32x128xf32> to vector<32x96xf32>
    %316 = vector.extract_strided_slice %309 {offsets = [0, 96], sizes = [32, 32], strides = [1, 1]} : vector<32x128xf32> to vector<32x32xf32>
    %317 = vector.extract_strided_slice %310 {offsets = [0, 0], sizes = [1, 96], strides = [1, 1]} : vector<1x128xf32> to vector<1x96xf32>
    %318 = vector.extract_strided_slice %310 {offsets = [0, 96], sizes = [1, 32], strides = [1, 1]} : vector<1x128xf32> to vector<1x32xf32>
    %319 = vector.extract_strided_slice %311 {offsets = [0, 0], sizes = [1, 32], strides = [1, 1]} : vector<1x128xf32> to vector<1x32xf32>
    %320 = vector.extract_strided_slice %311 {offsets = [0, 32], sizes = [1, 32], strides = [1, 1]} : vector<1x128xf32> to vector<1x32xf32>
    %cst_72 = arith.constant dense<0.000000e+00> : vector<16x96xf32>
    %321 = tpu.matmul %210, %315, %cst_72 {dimension_numbers = #tpu.dot_dimension_numbers<[1], [0], [0], [1], [0, 0, 1, 1], [], []>} : vector<16x32xf32>, vector<32x96xf32>, vector<16x96xf32> -> vector<16x96xf32>
    %322 = vector.broadcast %317 : vector<1x96xf32> to vector<16x96xf32>
    %323 = arith.addf %321, %322 : vector<16x96xf32>
    %324 = vector.extract_strided_slice %323 {offsets = [0, 0], sizes = [16, 32], strides = [1, 1]} : vector<16x96xf32> to vector<16x32xf32>
    %325 = vector.extract_strided_slice %323 {offsets = [0, 32], sizes = [16, 32], strides = [1, 1]} : vector<16x96xf32> to vector<16x32xf32>
    %326 = vector.extract_strided_slice %323 {offsets = [0, 64], sizes = [16, 32], strides = [1, 1]} : vector<16x96xf32> to vector<16x32xf32>
    %327 = arith.addf %325, %314 : vector<16x32xf32>
    %328 = vector.extract_strided_slice %324 {offsets = [0, 0], sizes = [16, 8], strides = [1, 1]} : vector<16x32xf32> to vector<16x8xf32>
    %329 = vector.extract_strided_slice %324 {offsets = [0, 8], sizes = [16, 8], strides = [1, 1]} : vector<16x32xf32> to vector<16x8xf32>
    %330 = vector.extract_strided_slice %324 {offsets = [0, 16], sizes = [16, 8], strides = [1, 1]} : vector<16x32xf32> to vector<16x8xf32>
    %331 = vector.extract_strided_slice %324 {offsets = [0, 24], sizes = [16, 8], strides = [1, 1]} : vector<16x32xf32> to vector<16x8xf32>
    %332 = vector.shape_cast %328 : vector<16x8xf32> to vector<1x16x8xf32>
    %333 = vector.shape_cast %329 : vector<16x8xf32> to vector<1x16x8xf32>
    %334 = vector.shape_cast %330 : vector<16x8xf32> to vector<1x16x8xf32>
    %335 = vector.shape_cast %331 : vector<16x8xf32> to vector<1x16x8xf32>
    %336 = tpu.concatenate %332, %333, %334, %335 in 0 : vector<1x16x8xf32>, vector<1x16x8xf32>, vector<1x16x8xf32>, vector<1x16x8xf32> -> vector<4x16x8xf32>
    %337 = vector.extract_strided_slice %327 {offsets = [0, 0], sizes = [16, 8], strides = [1, 1]} : vector<16x32xf32> to vector<16x8xf32>
    %338 = vector.extract_strided_slice %327 {offsets = [0, 8], sizes = [16, 8], strides = [1, 1]} : vector<16x32xf32> to vector<16x8xf32>
    %339 = vector.extract_strided_slice %327 {offsets = [0, 16], sizes = [16, 8], strides = [1, 1]} : vector<16x32xf32> to vector<16x8xf32>
    %340 = vector.extract_strided_slice %327 {offsets = [0, 24], sizes = [16, 8], strides = [1, 1]} : vector<16x32xf32> to vector<16x8xf32>
    %341 = vector.shape_cast %337 : vector<16x8xf32> to vector<1x16x8xf32>
    %342 = vector.shape_cast %338 : vector<16x8xf32> to vector<1x16x8xf32>
    %343 = vector.shape_cast %339 : vector<16x8xf32> to vector<1x16x8xf32>
    %344 = vector.shape_cast %340 : vector<16x8xf32> to vector<1x16x8xf32>
    %345 = tpu.concatenate %341, %342, %343, %344 in 0 : vector<1x16x8xf32>, vector<1x16x8xf32>, vector<1x16x8xf32>, vector<1x16x8xf32> -> vector<4x16x8xf32>
    %346 = vector.extract_strided_slice %326 {offsets = [0, 0], sizes = [16, 8], strides = [1, 1]} : vector<16x32xf32> to vector<16x8xf32>
    %347 = vector.extract_strided_slice %326 {offsets = [0, 8], sizes = [16, 8], strides = [1, 1]} : vector<16x32xf32> to vector<16x8xf32>
    %348 = vector.extract_strided_slice %326 {offsets = [0, 16], sizes = [16, 8], strides = [1, 1]} : vector<16x32xf32> to vector<16x8xf32>
    %349 = vector.extract_strided_slice %326 {offsets = [0, 24], sizes = [16, 8], strides = [1, 1]} : vector<16x32xf32> to vector<16x8xf32>
    %350 = vector.shape_cast %346 : vector<16x8xf32> to vector<1x16x8xf32>
    %351 = vector.shape_cast %347 : vector<16x8xf32> to vector<1x16x8xf32>
    %352 = vector.shape_cast %348 : vector<16x8xf32> to vector<1x16x8xf32>
    %353 = vector.shape_cast %349 : vector<16x8xf32> to vector<1x16x8xf32>
    %354 = tpu.concatenate %350, %351, %352, %353 in 0 : vector<1x16x8xf32>, vector<1x16x8xf32>, vector<1x16x8xf32>, vector<1x16x8xf32> -> vector<4x16x8xf32>
    "tpu.trace_start"() <{level = 10 : i32, message = "hqd,hkd->hqk"}> : () -> ()
    %cst_73 = arith.constant dense<0.000000e+00> : vector<4x16x16xf32>
    %355 = tpu.matmul %336, %345, %cst_73 {dimension_numbers = #tpu.dot_dimension_numbers<[2], [2], [1], [1], [0, 0, 0, 1, 1, 1], [0], [0]>} : vector<4x16x8xf32>, vector<4x16x8xf32>, vector<4x16x16xf32> -> vector<4x16x16xf32>
    "tpu.trace_stop"() : () -> ()
    %cst_74 = arith.constant 0.353553385 : f32
    %356 = vector.broadcast %cst_74 : f32 to vector<4x16x16xf32>
    %357 = arith.mulf %355, %356 : vector<4x16x16xf32>
    %358 = vector.shape_cast %313 : vector<16x16xf32> to vector<1x16x16xf32>
    %359 = vector.broadcast %358 : vector<1x16x16xf32> to vector<4x16x16xf32>
    %360 = arith.addf %357, %359 : vector<4x16x16xf32>
    %cst_75 = arith.constant dense<0xFF800000> : vector<4x16xf32>
    %361 = vector.multi_reduction <maximumf>, %360, %cst_75 [2] : vector<4x16x16xf32> to vector<4x16xf32>
    %362 = vector.shape_cast %361 : vector<4x16xf32> to vector<4x16x1xf32>
    %363 = vector.broadcast %362 : vector<4x16x1xf32> to vector<4x16x16xf32>
    %364 = arith.subf %360, %363 : vector<4x16x16xf32>
    %365 = math.exp %364 : vector<4x16x16xf32>
    %cst_76 = arith.constant dense<0.000000e+00> : vector<4x16xf32>
    %366 = vector.multi_reduction <add>, %365, %cst_76 [2] : vector<4x16x16xf32> to vector<4x16xf32>
    %367 = vector.shape_cast %366 : vector<4x16xf32> to vector<4x16x1xf32>
    %368 = tpu.reciprocal %367 {approx = true} : vector<4x16x1xf32> -> vector<4x16x1xf32>
    %369 = vector.broadcast %368 : vector<4x16x1xf32> to vector<4x16x16xf32>
    %370 = arith.mulf %365, %369 : vector<4x16x16xf32>
    "tpu.trace_start"() <{level = 10 : i32, message = "hqk,hkd->hqd"}> : () -> ()
    %cst_77 = arith.constant dense<0.000000e+00> : vector<4x16x8xf32>
    %371 = tpu.matmul %370, %354, %cst_77 {dimension_numbers = #tpu.dot_dimension_numbers<[2], [1], [1], [2], [0, 0, 0, 1, 1, 2], [0], [0]>} : vector<4x16x16xf32>, vector<4x16x8xf32>, vector<4x16x8xf32> -> vector<4x16x8xf32>
    "tpu.trace_stop"() : () -> ()
    %372 = vector.extract_strided_slice %371 {offsets = [0, 0, 0], sizes = [1, 16, 8], strides = [1, 1, 1]} : vector<4x16x8xf32> to vector<1x16x8xf32>
    %373 = vector.shape_cast %372 : vector<1x16x8xf32> to vector<16x8xf32>
    %374 = vector.extract_strided_slice %371 {offsets = [1, 0, 0], sizes = [1, 16, 8], strides = [1, 1, 1]} : vector<4x16x8xf32> to vector<1x16x8xf32>
    %375 = vector.shape_cast %374 : vector<1x16x8xf32> to vector<16x8xf32>
    %376 = vector.extract_strided_slice %371 {offsets = [2, 0, 0], sizes = [1, 16, 8], strides = [1, 1, 1]} : vector<4x16x8xf32> to vector<1x16x8xf32>
    %377 = vector.shape_cast %376 : vector<1x16x8xf32> to vector<16x8xf32>
    %378 = vector.extract_strided_slice %371 {offsets = [3, 0, 0], sizes = [1, 16, 8], strides = [1, 1, 1]} : vector<4x16x8xf32> to vector<1x16x8xf32>
    %379 = vector.shape_cast %378 : vector<1x16x8xf32> to vector<16x8xf32>
    %380 = tpu.concatenate %373, %375, %377, %379 in 1 : vector<16x8xf32>, vector<16x8xf32>, vector<16x8xf32>, vector<16x8xf32> -> vector<16x32xf32>
    %cst_78 = arith.constant dense<0.000000e+00> : vector<16x32xf32>
    %381 = tpu.matmul %380, %316, %cst_78 {dimension_numbers = #tpu.dot_dimension_numbers<[1], [0], [0], [1], [0, 0, 1, 1], [], []>} : vector<16x32xf32>, vector<32x32xf32>, vector<16x32xf32> -> vector<16x32xf32>
    %382 = vector.broadcast %318 : vector<1x32xf32> to vector<16x32xf32>
    %383 = arith.addf %381, %382 : vector<16x32xf32>
    %384 = arith.addf %383, %210 : vector<16x32xf32>
    %cst_79 = arith.constant dense<0.000000e+00> : vector<16xf32>
    %385 = vector.multi_reduction <add>, %384, %cst_79 [1] : vector<16x32xf32> to vector<16xf32>
    %386 = vector.shape_cast %385 : vector<16xf32> to vector<16x1xf32>
    %cst_80 = arith.constant 3.200000e+01 : f32
    %387 = vector.broadcast %cst_80 : f32 to vector<16x1xf32>
    %388 = arith.divf %386, %387 : vector<16x1xf32>
    %389 = arith.mulf %384, %384 : vector<16x32xf32>
    %cst_81 = arith.constant dense<0.000000e+00> : vector<16xf32>
    %390 = vector.multi_reduction <add>, %389, %cst_81 [1] : vector<16x32xf32> to vector<16xf32>
    %391 = vector.shape_cast %390 : vector<16xf32> to vector<16x1xf32>
    %cst_82 = arith.constant 3.200000e+01 : f32
    %392 = vector.broadcast %cst_82 : f32 to vector<16x1xf32>
    %393 = arith.divf %391, %392 : vector<16x1xf32>
    %394 = arith.mulf %388, %388 : vector<16x1xf32>
    %395 = arith.subf %393, %394 : vector<16x1xf32>
    %396 = vector.broadcast %388 : vector<16x1xf32> to vector<16x32xf32>
    %397 = arith.subf %384, %396 : vector<16x32xf32>
    %cst_83 = arith.constant 9.99999996E-13 : f32
    %398 = vector.broadcast %cst_83 : f32 to vector<16x1xf32>
    %399 = arith.addf %395, %398 : vector<16x1xf32>
    %400 = math.rsqrt %399 : vector<16x1xf32>
    %401 = vector.broadcast %400 : vector<16x1xf32> to vector<16x32xf32>
    %402 = arith.mulf %397, %401 : vector<16x32xf32>
    %403 = vector.broadcast %319 : vector<1x32xf32> to vector<16x32xf32>
    %404 = arith.mulf %402, %403 : vector<16x32xf32>
    %405 = vector.broadcast %320 : vector<1x32xf32> to vector<16x32xf32>
    %406 = arith.addf %404, %405 : vector<16x32xf32>
    %c128 = arith.constant 128 : index
    %c0_84 = arith.constant 0 : index
    %407 = vector.load %arg1[%c128, %c0_84] : memref<256x128xf32, #tpu.memory_space<vmem>>, vector<32x128xf32>
    %c160 = arith.constant 160 : index
    %c0_85 = arith.constant 0 : index
    %408 = vector.load %arg1[%c160, %c0_85] : memref<256x128xf32, #tpu.memory_space<vmem>>, vector<32x128xf32>
    %c8 = arith.constant 8 : index
    %c0_86 = arith.constant 0 : index
    %409 = vector.load %arg2[%c8, %c0_86] : memref<12x128xf32, #tpu.memory_space<vmem>>, vector<1x128xf32>
    %c9 = arith.constant 9 : index
    %c0_87 = arith.constant 0 : index
    %410 = vector.load %arg2[%c9, %c0_87] : memref<12x128xf32, #tpu.memory_space<vmem>>, vector<1x128xf32>
    %411 = vector.extract_strided_slice %410 {offsets = [0, 0], sizes = [1, 32], strides = [1, 1]} : vector<1x128xf32> to vector<1x32xf32>
    %412 = vector.extract_strided_slice %410 {offsets = [0, 32], sizes = [1, 32], strides = [1, 1]} : vector<1x128xf32> to vector<1x32xf32>
    %413 = vector.extract_strided_slice %410 {offsets = [0, 64], sizes = [1, 32], strides = [1, 1]} : vector<1x128xf32> to vector<1x32xf32>
    %cst_88 = arith.constant dense<0.000000e+00> : vector<16x128xf32>
    %414 = tpu.matmul %308, %407, %cst_88 {dimension_numbers = #tpu.dot_dimension_numbers<[1], [0], [0], [1], [0, 0, 1, 1], [], []>} : vector<16x32xf32>, vector<32x128xf32>, vector<16x128xf32> -> vector<16x128xf32>
    %415 = vector.broadcast %409 : vector<1x128xf32> to vector<16x128xf32>
    %416 = arith.addf %414, %415 : vector<16x128xf32>
    %cst_89 = arith.constant 5.000000e-01 : f32
    %417 = vector.broadcast %cst_89 : f32 to vector<16x128xf32>
    %418 = arith.mulf %416, %417 : vector<16x128xf32>
    %cst_90 = arith.constant 0.707106769 : f32
    %419 = vector.broadcast %cst_90 : f32 to vector<16x128xf32>
    %420 = arith.mulf %416, %419 : vector<16x128xf32>
    %cst_91 = arith.constant 0.000000e+00 : f32
    %421 = vector.broadcast %cst_91 : f32 to vector<16x128xf32>
    %422 = arith.cmpf oge, %420, %421 : vector<16x128xf32>
    %cst_92 = arith.constant 1.000000e+00 : f32
    %cst_93 = arith.constant -1.000000e+00 : f32
    %423 = vector.broadcast %cst_92 : f32 to vector<16x128xf32>
    %424 = vector.broadcast %cst_93 : f32 to vector<16x128xf32>
    %425 = arith.select %422, %423, %424 : vector<16x128xi1>, vector<16x128xf32>
    %426 = math.absf %420 : vector<16x128xf32>
    %cst_94 = arith.constant 0.327591091 : f32
    %427 = vector.broadcast %cst_94 : f32 to vector<16x128xf32>
    %428 = arith.mulf %427, %426 : vector<16x128xf32>
    %cst_95 = arith.constant 1.000000e+00 : f32
    %429 = vector.broadcast %cst_95 : f32 to vector<16x128xf32>
    %430 = arith.addf %429, %428 : vector<16x128xf32>
    %cst_96 = arith.constant 1.000000e+00 : f32
    %431 = vector.broadcast %cst_96 : f32 to vector<16x128xf32>
    %432 = arith.divf %431, %430 : vector<16x128xf32>
    %cst_97 = arith.constant 1.06140542 : f32
    %433 = vector.broadcast %cst_97 : f32 to vector<16x128xf32>
    %434 = arith.mulf %433, %432 : vector<16x128xf32>
    %cst_98 = arith.constant -1.45315206 : f32
    %435 = vector.broadcast %cst_98 : f32 to vector<16x128xf32>
    %436 = arith.addf %434, %435 : vector<16x128xf32>
    %437 = arith.mulf %436, %432 : vector<16x128xf32>
    %cst_99 = arith.constant 1.42141378 : f32
    %438 = vector.broadcast %cst_99 : f32 to vector<16x128xf32>
    %439 = arith.addf %437, %438 : vector<16x128xf32>
    %440 = arith.mulf %439, %432 : vector<16x128xf32>
    %cst_100 = arith.constant -0.284496725 : f32
    %441 = vector.broadcast %cst_100 : f32 to vector<16x128xf32>
    %442 = arith.addf %440, %441 : vector<16x128xf32>
    %443 = arith.mulf %442, %432 : vector<16x128xf32>
    %cst_101 = arith.constant 0.254829586 : f32
    %444 = vector.broadcast %cst_101 : f32 to vector<16x128xf32>
    %445 = arith.addf %443, %444 : vector<16x128xf32>
    %446 = arith.mulf %445, %432 : vector<16x128xf32>
    %cst_102 = arith.constant 0.000000e+00 : f32
    %447 = vector.broadcast %cst_102 : f32 to vector<16x128xf32>
    %448 = arith.subf %447, %426 : vector<16x128xf32>
    %449 = arith.mulf %448, %426 : vector<16x128xf32>
    %450 = math.exp %449 : vector<16x128xf32>
    %451 = arith.mulf %446, %450 : vector<16x128xf32>
    %cst_103 = arith.constant 1.000000e+00 : f32
    %452 = vector.broadcast %cst_103 : f32 to vector<16x128xf32>
    %453 = arith.subf %452, %451 : vector<16x128xf32>
    %454 = arith.mulf %425, %453 : vector<16x128xf32>
    %cst_104 = arith.constant 1.000000e+00 : f32
    %455 = vector.broadcast %cst_104 : f32 to vector<16x128xf32>
    %456 = arith.addf %455, %454 : vector<16x128xf32>
    %457 = arith.mulf %418, %456 : vector<16x128xf32>
    %cst_105 = arith.constant dense<0.000000e+00> : vector<16x32xf32>
    %458 = tpu.matmul %457, %408, %cst_105 {dimension_numbers = #tpu.dot_dimension_numbers<[1], [1], [0], [0], [0, 0, 1, 0], [], []>} : vector<16x128xf32>, vector<32x128xf32>, vector<16x32xf32> -> vector<16x32xf32>
    %459 = vector.broadcast %411 : vector<1x32xf32> to vector<16x32xf32>
    %460 = arith.addf %458, %459 : vector<16x32xf32>
    %461 = arith.addf %460, %308 : vector<16x32xf32>
    %cst_106 = arith.constant dense<0.000000e+00> : vector<16xf32>
    %462 = vector.multi_reduction <add>, %461, %cst_106 [1] : vector<16x32xf32> to vector<16xf32>
    %463 = vector.shape_cast %462 : vector<16xf32> to vector<16x1xf32>
    %cst_107 = arith.constant 3.200000e+01 : f32
    %464 = vector.broadcast %cst_107 : f32 to vector<16x1xf32>
    %465 = arith.divf %463, %464 : vector<16x1xf32>
    %466 = arith.mulf %461, %461 : vector<16x32xf32>
    %cst_108 = arith.constant dense<0.000000e+00> : vector<16xf32>
    %467 = vector.multi_reduction <add>, %466, %cst_108 [1] : vector<16x32xf32> to vector<16xf32>
    %468 = vector.shape_cast %467 : vector<16xf32> to vector<16x1xf32>
    %cst_109 = arith.constant 3.200000e+01 : f32
    %469 = vector.broadcast %cst_109 : f32 to vector<16x1xf32>
    %470 = arith.divf %468, %469 : vector<16x1xf32>
    %471 = arith.mulf %465, %465 : vector<16x1xf32>
    %472 = arith.subf %470, %471 : vector<16x1xf32>
    %473 = vector.broadcast %465 : vector<16x1xf32> to vector<16x32xf32>
    %474 = arith.subf %461, %473 : vector<16x32xf32>
    %cst_110 = arith.constant 9.99999996E-13 : f32
    %475 = vector.broadcast %cst_110 : f32 to vector<16x1xf32>
    %476 = arith.addf %472, %475 : vector<16x1xf32>
    %477 = math.rsqrt %476 : vector<16x1xf32>
    %478 = vector.broadcast %477 : vector<16x1xf32> to vector<16x32xf32>
    %479 = arith.mulf %474, %478 : vector<16x32xf32>
    %480 = vector.broadcast %412 : vector<1x32xf32> to vector<16x32xf32>
    %481 = arith.mulf %479, %480 : vector<16x32xf32>
    %482 = vector.broadcast %413 : vector<1x32xf32> to vector<16x32xf32>
    %483 = arith.addf %481, %482 : vector<16x32xf32>
    %c192 = arith.constant 192 : index
    %c0_111 = arith.constant 0 : index
    %484 = vector.load %arg1[%c192, %c0_111] : memref<256x128xf32, #tpu.memory_space<vmem>>, vector<32x128xf32>
    %c224 = arith.constant 224 : index
    %c0_112 = arith.constant 0 : index
    %485 = vector.load %arg1[%c224, %c0_112] : memref<256x128xf32, #tpu.memory_space<vmem>>, vector<32x128xf32>
    %c10 = arith.constant 10 : index
    %c0_113 = arith.constant 0 : index
    %486 = vector.load %arg2[%c10, %c0_113] : memref<12x128xf32, #tpu.memory_space<vmem>>, vector<1x128xf32>
    %c11 = arith.constant 11 : index
    %c0_114 = arith.constant 0 : index
    %487 = vector.load %arg2[%c11, %c0_114] : memref<12x128xf32, #tpu.memory_space<vmem>>, vector<1x128xf32>
    %488 = vector.extract_strided_slice %487 {offsets = [0, 0], sizes = [1, 32], strides = [1, 1]} : vector<1x128xf32> to vector<1x32xf32>
    %489 = vector.extract_strided_slice %487 {offsets = [0, 32], sizes = [1, 32], strides = [1, 1]} : vector<1x128xf32> to vector<1x32xf32>
    %490 = vector.extract_strided_slice %487 {offsets = [0, 64], sizes = [1, 32], strides = [1, 1]} : vector<1x128xf32> to vector<1x32xf32>
    %cst_115 = arith.constant dense<0.000000e+00> : vector<16x128xf32>
    %491 = tpu.matmul %406, %484, %cst_115 {dimension_numbers = #tpu.dot_dimension_numbers<[1], [0], [0], [1], [0, 0, 1, 1], [], []>} : vector<16x32xf32>, vector<32x128xf32>, vector<16x128xf32> -> vector<16x128xf32>
    %492 = vector.broadcast %486 : vector<1x128xf32> to vector<16x128xf32>
    %493 = arith.addf %491, %492 : vector<16x128xf32>
    %cst_116 = arith.constant 5.000000e-01 : f32
    %494 = vector.broadcast %cst_116 : f32 to vector<16x128xf32>
    %495 = arith.mulf %493, %494 : vector<16x128xf32>
    %cst_117 = arith.constant 0.707106769 : f32
    %496 = vector.broadcast %cst_117 : f32 to vector<16x128xf32>
    %497 = arith.mulf %493, %496 : vector<16x128xf32>
    %cst_118 = arith.constant 0.000000e+00 : f32
    %498 = vector.broadcast %cst_118 : f32 to vector<16x128xf32>
    %499 = arith.cmpf oge, %497, %498 : vector<16x128xf32>
    %cst_119 = arith.constant 1.000000e+00 : f32
    %cst_120 = arith.constant -1.000000e+00 : f32
    %500 = vector.broadcast %cst_119 : f32 to vector<16x128xf32>
    %501 = vector.broadcast %cst_120 : f32 to vector<16x128xf32>
    %502 = arith.select %499, %500, %501 : vector<16x128xi1>, vector<16x128xf32>
    %503 = math.absf %497 : vector<16x128xf32>
    %cst_121 = arith.constant 0.327591091 : f32
    %504 = vector.broadcast %cst_121 : f32 to vector<16x128xf32>
    %505 = arith.mulf %504, %503 : vector<16x128xf32>
    %cst_122 = arith.constant 1.000000e+00 : f32
    %506 = vector.broadcast %cst_122 : f32 to vector<16x128xf32>
    %507 = arith.addf %506, %505 : vector<16x128xf32>
    %cst_123 = arith.constant 1.000000e+00 : f32
    %508 = vector.broadcast %cst_123 : f32 to vector<16x128xf32>
    %509 = arith.divf %508, %507 : vector<16x128xf32>
    %cst_124 = arith.constant 1.06140542 : f32
    %510 = vector.broadcast %cst_124 : f32 to vector<16x128xf32>
    %511 = arith.mulf %510, %509 : vector<16x128xf32>
    %cst_125 = arith.constant -1.45315206 : f32
    %512 = vector.broadcast %cst_125 : f32 to vector<16x128xf32>
    %513 = arith.addf %511, %512 : vector<16x128xf32>
    %514 = arith.mulf %513, %509 : vector<16x128xf32>
    %cst_126 = arith.constant 1.42141378 : f32
    %515 = vector.broadcast %cst_126 : f32 to vector<16x128xf32>
    %516 = arith.addf %514, %515 : vector<16x128xf32>
    %517 = arith.mulf %516, %509 : vector<16x128xf32>
    %cst_127 = arith.constant -0.284496725 : f32
    %518 = vector.broadcast %cst_127 : f32 to vector<16x128xf32>
    %519 = arith.addf %517, %518 : vector<16x128xf32>
    %520 = arith.mulf %519, %509 : vector<16x128xf32>
    %cst_128 = arith.constant 0.254829586 : f32
    %521 = vector.broadcast %cst_128 : f32 to vector<16x128xf32>
    %522 = arith.addf %520, %521 : vector<16x128xf32>
    %523 = arith.mulf %522, %509 : vector<16x128xf32>
    %cst_129 = arith.constant 0.000000e+00 : f32
    %524 = vector.broadcast %cst_129 : f32 to vector<16x128xf32>
    %525 = arith.subf %524, %503 : vector<16x128xf32>
    %526 = arith.mulf %525, %503 : vector<16x128xf32>
    %527 = math.exp %526 : vector<16x128xf32>
    %528 = arith.mulf %523, %527 : vector<16x128xf32>
    %cst_130 = arith.constant 1.000000e+00 : f32
    %529 = vector.broadcast %cst_130 : f32 to vector<16x128xf32>
    %530 = arith.subf %529, %528 : vector<16x128xf32>
    %531 = arith.mulf %502, %530 : vector<16x128xf32>
    %cst_131 = arith.constant 1.000000e+00 : f32
    %532 = vector.broadcast %cst_131 : f32 to vector<16x128xf32>
    %533 = arith.addf %532, %531 : vector<16x128xf32>
    %534 = arith.mulf %495, %533 : vector<16x128xf32>
    %cst_132 = arith.constant dense<0.000000e+00> : vector<16x32xf32>
    %535 = tpu.matmul %534, %485, %cst_132 {dimension_numbers = #tpu.dot_dimension_numbers<[1], [1], [0], [0], [0, 0, 1, 0], [], []>} : vector<16x128xf32>, vector<32x128xf32>, vector<16x32xf32> -> vector<16x32xf32>
    %536 = vector.broadcast %488 : vector<1x32xf32> to vector<16x32xf32>
    %537 = arith.addf %535, %536 : vector<16x32xf32>
    %538 = arith.addf %537, %406 : vector<16x32xf32>
    %cst_133 = arith.constant dense<0.000000e+00> : vector<16xf32>
    %539 = vector.multi_reduction <add>, %538, %cst_133 [1] : vector<16x32xf32> to vector<16xf32>
    %540 = vector.shape_cast %539 : vector<16xf32> to vector<16x1xf32>
    %cst_134 = arith.constant 3.200000e+01 : f32
    %541 = vector.broadcast %cst_134 : f32 to vector<16x1xf32>
    %542 = arith.divf %540, %541 : vector<16x1xf32>
    %543 = arith.mulf %538, %538 : vector<16x32xf32>
    %cst_135 = arith.constant dense<0.000000e+00> : vector<16xf32>
    %544 = vector.multi_reduction <add>, %543, %cst_135 [1] : vector<16x32xf32> to vector<16xf32>
    %545 = vector.shape_cast %544 : vector<16xf32> to vector<16x1xf32>
    %cst_136 = arith.constant 3.200000e+01 : f32
    %546 = vector.broadcast %cst_136 : f32 to vector<16x1xf32>
    %547 = arith.divf %545, %546 : vector<16x1xf32>
    %548 = arith.mulf %542, %542 : vector<16x1xf32>
    %549 = arith.subf %547, %548 : vector<16x1xf32>
    %550 = vector.broadcast %542 : vector<16x1xf32> to vector<16x32xf32>
    %551 = arith.subf %538, %550 : vector<16x32xf32>
    %cst_137 = arith.constant 9.99999996E-13 : f32
    %552 = vector.broadcast %cst_137 : f32 to vector<16x1xf32>
    %553 = arith.addf %549, %552 : vector<16x1xf32>
    %554 = math.rsqrt %553 : vector<16x1xf32>
    %555 = vector.broadcast %554 : vector<16x1xf32> to vector<16x32xf32>
    %556 = arith.mulf %551, %555 : vector<16x32xf32>
    %557 = vector.broadcast %489 : vector<1x32xf32> to vector<16x32xf32>
    %558 = arith.mulf %556, %557 : vector<16x32xf32>
    %559 = vector.broadcast %490 : vector<1x32xf32> to vector<16x32xf32>
    %560 = arith.addf %558, %559 : vector<16x32xf32>
    %561 = tpu.concatenate %483, %560 in 1 : vector<16x32xf32>, vector<16x32xf32> -> vector<16x64xf32>
    %c0_138 = arith.constant 0 : index
    %c0_139 = arith.constant 0 : index
    %562 = vector.load %arg5[%c0_138, %c0_139] : memref<16x64xf32, #tpu.memory_space<vmem>>, vector<16x64xf32>
    tpu.vector_store %arg5[%c0_138, %c0_139], %561 {strides = array<i32>} : memref<16x64xf32, #tpu.memory_space<vmem>>, vector<16x64xf32>,
    return
  }
}

</mosaic_0001>

<bundles_post_ra>
// kernel: cme_forward.1
= control target key start
LH: loop header
LB: loop body
LE: loop exit
PB: predicated region body
PF: predicated region fallthrough
CT: control target
= control target key end

     0   :  { %10 = vsyncpa [#allocation3], 0  ;;  %s6683_s18 = smov [#allocation2]   ;;  %s7753_s0 = inlined_call_operand.vmem [shape: f32[16,64], index: 0, kind: input, shape index: {}]   ;;  %s7754_s1 = inlined_call_operand.hbm [shape: f32[256,128], index: 1, kind: input, shape index: {}]   ;;  %s7755_s2 = inlined_call_operand.vmem [shape: f32[12,128], index: 2, kind: input, shape index: {}]   ;;  %s7756_s3 = inlined_call_operand.vmem [shape: f32[4,16,16], index: 3, kind: input, shape index: {}]   ;;  %s7757_s4 = inlined_call_operand.vmem [shape: f32[16,128], index: 4, kind: input, shape index: {}]   ;;  %s7758_s5 = inlined_call_operand.vmem [shape: f32[16,64], index: 5, kind: output, shape index: {}]  }
   0x1   :  { %s18_s19 = sshll.u32 %s6683_s18, 4  ;;  %s6659_s22 = scalar_lea.hbm %s7754_s1, 4096  ;;  %s19_s19 = int_to_ptr.vmem [resolvable:$true] %s18_s19 }
   0x2   :  { %p6660_p0 = scmp.ne.s32.totalorder %s7754_s1, %s6659_s22  ;;  %p6663_p1 = scmp.lt.u32.totalorder %s6659_s22, %s7754_s1 }
   0x4   :  { %p6665_p2 = pnand %p6663_p1, %p6660_p0 }
   0x6   :  { %6668 = shalt.err (!%p6665_p2)
}
   0x7   :  { %s6669_s27 = scalar_lea.vmem %s19_s19, 4096  ;;  %p6674_p4 = scmp.lt.s32.totalorder %s19_s19, %s19_s19 }
   0x8   :  { %p6670_p3 = scmp.ne.s32.totalorder %s19_s19, %s6669_s27  ;;  %p6675_p5 = scmp.lt.s32.totalorder %s6669_s27, %s6669_s27 }
   0xa   :  { %p6676_p6 = por %p6675_p5, %p6674_p4 }
   0xc   :  { %p6677_p7 = pnand %p6676_p6, %p6670_p3 }
   0xe   :  { %6680 = shalt.err (!%p6677_p7)
}
   0xf   :  { %s6684_s28 = smov 128   ;;  %s6685_s29 = smov 8  }
  0x10   :  { %24 = dma.hbm_to_vmem [thread:$0]  %s7754_s1, 4096, %s19_s19, [#allocation3], %s6684_s28, %s6684_s28, %s6685_s29  }
  0x11   :  { %6681 = dma.done.wait [#allocation3], 4096  }
  0x12   :  { %6682 = vsyncadd [#allocation3], 4294963200  ;;  %v36_v0 = vld [vmem:[#allocation2] sm:$0xff]  ;;  %v37_v1 = vld [vmem:[#allocation2 + $0x8] sm:$0xff]  ;;  %vm50_vm0 = vcmask 261120   ;;  %s6686_s9 = smov 96  }
  0x13   :  { %v38_v2 = vld [vmem:[#allocation2 + $0x10] sm:$0xff]  ;;  %v6738_v3 = vpack.i.bf16 %v37_v1, %v36_v0  ;;  %v39_v4 = vld [vmem:[#allocation2 + $0x18] sm:$0xff]  ;;  %v6743_v5 = vld [vmem:[%s7753_s0] sm:$0xff]  ;;  %v5936_v6 = vpack.c.bf16 %v37_v1, %v36_v0  ;;  %vm279_vm1 = vcmask 64512   ;;  %s6687_s16 = smov 112   ;;  %s6688_s17 = smov 120  }
  0x14   :  { %132 = vrot.lane.b32.xlu1 %v6743_v5, %s6686_s9  ;;  %v5940_v7 = vpack.c.bf16 %v39_v4, %v38_v2  ;;  %5566 = vmatprep.mubr.msk.f32.mxu0 %vm50_vm0, %v6743_v5  ;;  %v6751_v8 = vpack.i.bf16 %v39_v4, %v38_v2  ;;  %v6756_v9 = vld [vmem:[%s7753_s0 + $0x8] sm:$0xff]  ;;  %v6765_v10 = vld [vmem:[%s7755_s2] ss:$0 sm:$0xff]  ;;  %vm6797_vm2 = vmpackc.low %vm279_vm1, %vm279_vm1  ;;  %s6689_s18 = smov 104   ;;  %vm628_vm3 = vcmask 130048   ;;  %s6690_s23 = smov 32  }
  0x15   :  { %6221 = vrot.lane.b32.xlu0 %v6738_v3, %s6686_s9  ;;  %5937 = vmatprep.subr.bf16.mxu0 %v5936_v6  ;;  %v6784_v26 = vld [vmem:[%s7757_s4 + $0x8] sm:$0xff]  ;;  %v6789_v29 = vld [vmem:[%s7757_s4] sm:$0xff]  ;;  %s6691_s24 = smov 16   ;;  %s6692_s25 = smov 24   ;;  %vm1093_vm4 = vcmask 195584   ;;  %v5307_v36 = vld [vmem:[%s7756_s3 + $0x38] sm:$0xff] }
  0x16   :  { %5939 = vmatpush3.bf16.msra.mxu0 %v5936_v6  ;;  %v43_v57 = vld [vmem:[%s7756_s3 + $0x8] sm:$0xff]  ;;  %v42_v60 = vld [vmem:[%s7756_s3] sm:$0xff]  ;;  %s6693_s21 = smov 64   ;;  %vm5200_vm9 = vcmask 523264  }
  0x17   :  { %5941 = vmatprep.subr.bf16.mxu0 %v5940_v7 }
  0x18   :  { %134 = vrot.lane.b32.xlu1 %v6756_v9, %s6686_s9 }
  0x19   :  { %6226 = vrot.lane.b32.xlu0 %v6751_v8, %s6686_s9 }
  0x1a   :  { %5943 = vmatpush3.bf16.msra.mxu0 %v5940_v7 }
  0x1d   :  { %5567 = vmatmul.mubr.msk.f32.vlgmr.msra.gmra.mrb[0].mxu0 %vm50_vm0, %v6756_v9  ;;  %153 = vrot.lane.b32.xlu0 %v6765_v10, %s6686_s9 }
  0x86   :  { %v6771_v11 = vpop.permute.xlu1 %132 }
  0x87   :  { %v6222_v12 = vpop.permute.xlu0 %6221  ;;  %5577 = vmatprep.mubr.msk.f32.mxu1 %vm50_vm0, %v6771_v11 }
  0x88   :  { %v6224_v13 = vunpack.i.h.bf16 %v6222_v12  ;;  %v6223_v14 = vunpack.i.l.bf16 %v6222_v12 }
  0x8a   :  { %v5944_v15 = vpack.c.bf16 %v6224_v13, %v6223_v14  ;;  %v6775_v20 = vpop.permute.xlu1 %134 }
  0x8b   :  { %v6227_v16 = vpop.permute.xlu0 %6226 }
  0x8c   :  { %v6229_v17 = vunpack.i.h.bf16 %v6227_v16  ;;  %v6228_v18 = vunpack.i.l.bf16 %v6227_v16  ;;  %5945 = vmatprep.subr.bf16.mxu1 %v5944_v15 }
  0x8d   :  { %5947 = vmatpush3.bf16.msra.mxu1 %v5944_v15 }
  0x8e   :  { %v5948_v19 = vpack.c.bf16 %v6229_v17, %v6228_v18 }
  0x8f   :  { %v154_v24 = vpop.permute.xlu0 %153 }
  0x90   :  { %5949 = vmatprep.subr.bf16.mxu1 %v5948_v19 }
  0x91   :  { %5951 = vmatpush3.bf16.msra.mxu1 %v5948_v19 }
  0x94   :  { %5578 = vmatmul.mubr.msk.f32.vlgmr.msra.gmra.mrb[0].mxu1 %vm50_vm0, %v6775_v20 }
  0xf0   :  { %v5568_v21 = vpop.f32.mrb[0].mxu0 }
  0xf1   :  { %v123_v22 = vpop.f32.mrb[1].mxu0  ;;  %v129_v37 = vadd.f32 %v5568_v21, %v6765_v10 }
  0xf2   :  { %v124_v23 = vadd.f32 %v6765_v10, %v123_v22 }
  0xf4   :  { %5584 = vmatprep.mubr.msk.f32.mxu0 %vm279_vm1, %v124_v23 }
 0x167   :  { %v5579_v25 = vpop.f32.mrb[0].mxu1 }
 0x168   :  { %v232_v27 = vadd.f32 %v5579_v25, %v154_v24  ;;  %v226_v28 = vpop.f32.mrb[1].mxu1 }
 0x169   :  { %v227_v30 = vadd.f32 %v226_v28, %v154_v24 }
 0x16a   :  { %v236_v31 = vadd.f32 %v232_v27, %v6784_v26 }
 0x16b   :  { %v235_v32 = vadd.f32 %v227_v30, %v6789_v29  ;;  %v6793_v33 = vpack.i.bf16 %v232_v27, %v227_v30 }
 0x16d   :  { %v6235_v34 = vpack.i.bf16 %v236_v31, %v235_v32  ;;  %v5952_v35 = vpack.c.bf16 %v236_v31, %v235_v32 }
 0x16f   :  { %6236 = vrot.lane.b32.xlu0 %v6235_v34, %s6687_s16  ;;  %6231 = vrot.lane.b32.xlu1 %v6235_v34, %s6688_s17 }
 0x170   :  { %5954 = vmatprep.subr.msk.bf16.mxu0 %vm6797_vm2, %v5952_v35 }
 0x171   :  { %5957 = vmatpush3.bf16.xpose.msk.msra.mxu0 %vm6797_vm2, %v5952_v35 }
 0x173   :  { %6241 = vrot.lane.b32.xlu1 %v6235_v34, %s6689_s18  ;;  %239 = vrot.lane.b32.xlu0 %v124_v23, %s6688_s17 }
 0x177   :  { %241 = vrot.lane.b32.xlu1 %v129_v37, %s6688_s17  ;;  %243 = vrot.lane.b32.xlu0 %v124_v23, %s6687_s16 }
 0x178   :  { %5585 = vmatmul.mubr.msk.f32.vlgmr.msra.gmra.mrb[2].mxu0 %vm279_vm1, %v129_v37 }
 0x17b   :  { %245 = vrot.lane.b32.xlu1 %v129_v37, %s6687_s16  ;;  %247 = vrot.lane.b32.xlu0 %v124_v23, %s6689_s18 }
 0x17f   :  { %249 = vrot.lane.b32.xlu1 %v129_v37, %s6689_s18 }
 0x1e1   :  { %v6237_v38 = vpop.permute.xlu0 %6236  ;;  %v6232_v39 = vpop.permute.xlu1 %6231 }
 0x1e2   :  { %v6239_v40 = vunpack.i.h.bf16 %v6237_v38  ;;  %v6238_v41 = vunpack.i.l.bf16 %v6237_v38  ;;  %v6234_v42 = vunpack.i.h.bf16 %v6232_v39  ;;  %v6233_v43 = vunpack.i.l.bf16 %v6232_v39 }
 0x1e4   :  { %v5964_v44 = vpack.c.bf16 %v6239_v40, %v6238_v41  ;;  %v5958_v45 = vpack.c.bf16 %v6234_v42, %v6233_v43 }
 0x1e5   :  { %v6242_v46 = vpop.permute.xlu1 %6241  ;;  %v240_v47 = vpop.permute.xlu0 %239 }
 0x1e6   :  { %v6244_v48 = vunpack.i.h.bf16 %v6242_v46  ;;  %v6243_v49 = vunpack.i.l.bf16 %v6242_v46  ;;  %5960 = vmatprep.subr.msk.bf16.mxu1 %vm6797_vm2, %v5958_v45  ;;  %5966 = vmatprep.subr.msk.bf16.mxu0 %vm6797_vm2, %v5964_v44 }
 0x1e7   :  { %5963 = vmatpush3.bf16.xpose.msk.msra.mxu1 %vm6797_vm2, %v5958_v45  ;;  %5969 = vmatpush3.bf16.xpose.msk.msra.mxu0 %vm6797_vm2, %v5964_v44 }
 0x1e8   :  { %v5970_v50 = vpack.c.bf16 %v6244_v48, %v6243_v49  ;;  %5591 = vmatprep.mubr.msk.f32.mxu1 %vm279_vm1, %v240_v47 }
 0x1e9   :  { %v242_v51 = vpop.permute.xlu1 %241  ;;  %v244_v52 = vpop.permute.xlu0 %243 }
 0x1ea   :  { %5972 = vmatprep.subr.msk.bf16.mxu1 %vm6797_vm2, %v5970_v50  ;;  %5598 = vmatprep.mubr.msk.f32.mxu0 %vm279_vm1, %v244_v52 }
 0x1ed   :  { %v246_v53 = vpop.permute.xlu1 %245  ;;  %v248_v54 = vpop.permute.xlu0 %247 }
 0x1ee   :  { %5592 = vmatmul.mubr.msk.f32.vlgmr.msra.gmra.mrb[2].mxu1 %vm279_vm1, %v242_v51  ;;  %5599 = vmatmul.mubr.msk.f32.vlgmr.msra.gmra.mrb[4].mxu0 %vm279_vm1, %v246_v53 }
 0x1ef   :  { %5975 = vmatpush3.bf16.xpose.msk.msra.mxu1 %vm6797_vm2, %v5970_v50  ;;  %5605 = vmatprep.mubr.msk.f32.mxu1 %vm279_vm1, %v248_v54 }
 0x1f1   :  { %v250_v55 = vpop.permute.xlu1 %249 }
 0x1f6   :  { %5606 = vmatmul.mubr.msk.f32.vlgmr.msra.gmra.mrb[4].mxu1 %vm279_vm1, %v250_v55 }
 0x24b   :  { %v5586_v56 = vpop.f32.mrb[2].mxu0 }
 0x24c   :  { %v613_v58 = vmul.f32 0.35355338, %v5586_v56  ;;  %v354_v59 = vpop.f32.mrb[3].mxu0 }
 0x24d   :  { %v612_v61 = vmul.f32 0.35355338, %v354_v59 }
 0x24e   :  { %v621_v62 = vadd.f32 %v613_v58, %v43_v57 }
 0x24f   :  { %v6840_v63 = vadd.f32 %v612_v61, %v42_v60 }
 0x250   :  { %v632_v0 = vsel %vm628_vm3, %v621_v62, -inf }
 0x251   :  { %633 = vmax.xlane.f32.xlu1 %v632_v0  ;;  %v629_v1 = vsel %vm628_vm3, %v6840_v63, -inf }
 0x252   :  { %630 = vmax.xlane.f32.xlu0 %v629_v1 }
 0x2c1   :  { %v5593_v2 = vpop.f32.mrb[2].mxu1  ;;  %v5600_v4 = vpop.f32.mrb[4].mxu0 }
 0x2c2   :  { %v615_v6 = vmul.f32 0.35355338, %v5593_v2  ;;  %v437_v7 = vpop.f32.mrb[3].mxu1  ;;  %v520_v12 = vpop.f32.mrb[5].mxu0  ;;  %v617_v17 = vmul.f32 0.35355338, %v5600_v4 }
 0x2c3   :  { %v614_v13 = vmul.f32 0.35355338, %v437_v7  ;;  %v616_v14 = vmul.f32 0.35355338, %v520_v12 }
 0x2c4   :  { %v6845_v15 = vadd.f32 %v615_v6, %v43_v57  ;;  %v6851_v27 = vadd.f32 %v617_v17, %v43_v57 }
 0x2c5   :  { %v624_v16 = vadd.f32 %v616_v14, %v42_v60  ;;  %v622_v19 = vadd.f32 %v614_v13, %v42_v60 }
 0x2c6   :  { %v638_v18 = vsel %vm628_vm3, %v6845_v15, -inf  ;;  %v644_v31 = vsel %vm628_vm3, %v6851_v27, -inf }
 0x2c7   :  { %639 = vmax.xlane.f32.xlu0 %v638_v18  ;;  %v641_v21 = vsel %vm628_vm3, %v624_v16, -inf  ;;  %v635_v25 = vsel %vm628_vm3, %v622_v19, -inf }
 0x2c8   :  { %642 = vmax.xlane.f32.xlu1 %v641_v21 }
 0x2c9   :  { %v5607_v22 = vpop.f32.mrb[4].mxu1 }
 0x2ca   :  { %v619_v23 = vmul.f32 0.35355338, %v5607_v22  ;;  %v603_v24 = vpop.f32.mrb[5].mxu1 }
 0x2cb   :  { %v618_v28 = vmul.f32 0.35355338, %v603_v24  ;;  %636 = vmax.xlane.f32.xlu0 %v635_v25 }
 0x2cc   :  { %v627_v32 = vadd.f32 %v619_v23, %v43_v57 }
 0x2cd   :  { %v626_v30 = vadd.f32 %v618_v28, %v42_v60 }
 0x2ce   :  { %v650_v35 = vsel %vm628_vm3, %v627_v32, -inf }
 0x2cf   :  { %645 = vmax.xlane.f32.xlu0 %v644_v31  ;;  %v647_v34 = vsel %vm628_vm3, %v626_v30, -inf }
 0x2d0   :  { %648 = vmax.xlane.f32.xlu1 %v647_v34 }
 0x2d3   :  { %651 = vmax.xlane.f32.xlu0 %v650_v35 }
 0x2de   :  { %v634_v37 = vpop.xlane.xlu1 %633 }
 0x2df   :  { %v654_v38 = vsub.f32 %v621_v62, %v634_v37  ;;  %v631_v42 = vpop.xlane.xlu0 %630 }
 0x2e0   :  { %v653_v4 = vsub.f32 %v6840_v63, %v631_v42 }
 0x2e1   :  { %6246 = vrot.lane.b32.xlu1 %v6793_v33, %s6688_s17  ;;  %v663_v39 = vmul.f32 1.442695, %v654_v38 }
 0x2e2   :  { %v661_v6 = vmul.f32 1.442695, %v653_v4 }
 0x2e3   :  { %6490 = vpow2.f32 %v663_v39  ;;  %v1237_v39 = vld [vmem:[#allocation2 + $0x20] sm:$0xff] }
 0x2e5   :  { %6256 = vrot.lane.b32.xlu1 %v6793_v33, %s6689_s18 }
 0x2e9   :  { %6251 = vrot.lane.b32.xlu0 %v6793_v33, %s6687_s16 }
 0x2ed   :  { %6261 = vrot.lane.b32.xlu0 %v6793_v33, %s6686_s9  ;;  %v6865_v40 = vpop.eup %6490 }
 0x2ee   :  { %v680_v41 = vsel %vm628_vm3, %v6865_v40, 0.0 }
 0x30c   :  { %681 = vadd.xlane.f32.xlu0 %v680_v41  ;;  %v1238_v41 = vld [vmem:[#allocation2 + $0x28] sm:$0xff] }
 0x354   :  { %v640_v43 = vpop.xlane.xlu0 %639 }
 0x355   :  { %v643_v44 = vpop.xlane.xlu1 %642  ;;  %v656_v7 = vsub.f32 %v6845_v15, %v640_v43 }
 0x356   :  { %v657_v45 = vsub.f32 %v624_v16, %v643_v44 }
 0x357   :  { %v667_v12 = vmul.f32 1.442695, %v656_v7 }
 0x358   :  { %v637_v46 = vpop.xlane.xlu0 %636  ;;  %v669_v48 = vmul.f32 1.442695, %v657_v45 }
 0x359   :  { %v655_v47 = vsub.f32 %v622_v19, %v637_v46 }
 0x35b   :  { %v665_v49 = vmul.f32 1.442695, %v655_v47 }
 0x35c   :  { %v646_v50 = vpop.xlane.xlu0 %645 }
 0x35d   :  { %6492 = vpow2.f32 %v665_v49  ;;  %v649_v33 = vpop.xlane.xlu1 %648  ;;  %v658_v13 = vsub.f32 %v6851_v27, %v646_v50 }
 0x35e   :  { %v659_v51 = vsub.f32 %v626_v30, %v649_v33  ;;  %6494 = vpow2.f32 %v669_v48 }
 0x35f   :  { %v671_v16 = vmul.f32 1.442695, %v658_v13 }
 0x360   :  { %v673_v52 = vmul.f32 1.442695, %v659_v51  ;;  %v652_v53 = vpop.xlane.xlu0 %651 }
 0x361   :  { %v6247_v54 = vpop.permute.xlu1 %6246  ;;  %v660_v17 = vsub.f32 %v627_v32, %v652_v53 }
 0x362   :  { %6496 = vpow2.f32 %v673_v52  ;;  %6266 = vrot.lane.b32.xlu1 %v6247_v54, %s6686_s9 }
 0x363   :  { %6498 = vpow2.f32 %v661_v6  ;;  %v675_v18 = vmul.f32 1.442695, %v660_v17 }
 0x364   :  { %v6252_v55 = vpop.permute.xlu0 %6251  ;;  %6500 = vpow2.f32 %v667_v12 }
 0x365   :  { %v6257_v14 = vpop.permute.xlu1 %6256  ;;  %6502 = vpow2.f32 %v671_v16 }
 0x366   :  { %6504 = vpow2.f32 %v675_v18 }
 0x367   :  { %v6870_v56 = vpop.eup %6492 }
 0x368   :  { %v6262_v57 = vpop.permute.xlu0 %6261  ;;  %v683_v58 = vsel %vm628_vm3, %v6870_v56, 0.0  ;;  %v6874_v59 = vpop.eup %6494 }
 0x369   :  { %v6264_v60 = vunpack.i.h.bf16 %v6262_v57  ;;  %v6263_v61 = vunpack.i.l.bf16 %v6262_v57  ;;  %684 = vadd.xlane.f32.xlu0 %v683_v58  ;;  %v689_v0 = vsel %vm628_vm3, %v6874_v59, 0.0 }
 0x36b   :  { %v5976_v62 = vpack.c.bf16 %v6264_v60, %v6263_v61 }
 0x36c   :  { %v6497_v1 = vpop.eup %6496 }
 0x36d   :  { %5977 = vmatprep.subr.bf16.mxu0 %v5976_v62  ;;  %690 = vadd.xlane.f32.xlu0 %v689_v0  ;;  %v695_v2 = vsel %vm628_vm3, %v6497_v1, 0.0  ;;  %v6499_v19 = vpop.eup %6498 }
 0x36e   :  { %5979 = vmatpush3.bf16.msra.mxu0 %v5976_v62  ;;  %v677_v21 = vsel %vm628_vm3, %v6499_v19, 0.0  ;;  %v6501_v63 = vpop.eup %6500 }
 0x36f   :  { %v686_v15 = vsel %vm628_vm3, %v6501_v63, 0.0  ;;  %v6885_v22 = vpop.eup %6502 }
 0x370   :  { %v692_v23 = vsel %vm628_vm3, %v6885_v22, 0.0  ;;  %v6889_v24 = vpop.eup %6504 }
 0x371   :  { %696 = vadd.xlane.f32.xlu0 %v695_v2  ;;  %v698_v25 = vsel %vm628_vm3, %v6889_v24, 0.0  ;;  %v1240_v2 = vld [vmem:[#allocation2 + $0x38] sm:$0xff] }
 0x386   :  { %678 = vadd.xlane.f32.xlu1 %v677_v21 }
 0x387   :  { %6276 = vrot.lane.b32.xlu0 %v6257_v14, %s6686_s9 }
 0x38a   :  { %687 = vadd.xlane.f32.xlu1 %v686_v15 }
 0x38b   :  { %6286 = vrot.lane.b32.xlu0 %v6751_v8, %s6690_s23  ;;  %v6000_v8 = vpack.c.bf16 %v1238_v41, %v1237_v39 }
 0x38e   :  { %693 = vadd.xlane.f32.xlu1 %v692_v23 }
 0x392   :  { %699 = vadd.xlane.f32.xlu1 %v698_v25 }
 0x399   :  { %v682_v32 = vpop.xlane.xlu0 %681 }
 0x3a3   :  { %6271 = vrot.lane.b32.xlu1 %v6252_v55, %s6686_s9 }
 0x3a7   :  { %6281 = vrot.lane.b32.xlu1 %v6738_v3, %s6690_s23 }
 0x3d4   :  { %v6267_v27 = vpop.permute.xlu1 %6266 }
 0x3d5   :  { %v6269_v28 = vunpack.i.h.bf16 %v6267_v27  ;;  %v6268_v30 = vunpack.i.l.bf16 %v6267_v27 }
 0x3d7   :  { %v5980_v31 = vpack.c.bf16 %v6269_v28, %v6268_v30 }
 0x3d9   :  { %5981 = vmatprep.subr.bf16.mxu0 %v5980_v31 }
 0x3f6   :  { %v685_v34 = vpop.xlane.xlu0 %684 }
 0x3fa   :  { %v691_v35 = vpop.xlane.xlu0 %690 }
 0x3fe   :  { %v697_v37 = vpop.xlane.xlu0 %696 }
 0x3ff   :  { %6506 = vrcp.f32 %v697_v37 }
 0x400   :  { %6508 = vrcp.f32 %v682_v32 }
 0x401   :  { %6510 = vrcp.f32 %v685_v34 }
 0x402   :  { %v6277_v38 = vpop.permute.xlu0 %6276 }
 0x403   :  { %v6279_v42 = vunpack.i.h.bf16 %v6277_v38  ;;  %v6278_v43 = vunpack.i.l.bf16 %v6277_v38  ;;  %v6931_v38 = vld [vmem:[%s7755_s2 + $0x2] ss:$0 sm:$0xff] }
 0x405   :  { %v5988_v44 = vpack.c.bf16 %v6279_v42, %v6278_v43 }
 0x406   :  { %v6287_v18 = vpop.permute.xlu0 %6286 }
 0x407   :  { %5989 = vmatprep.subr.bf16.mxu1 %v5988_v44  ;;  %v6288_v21 = vunpack.i.l.bf16 %v6287_v18 }
 0x408   :  { %5991 = vmatpush3.bf16.msra.mxu1 %v5988_v44 }
 0x409   :  { %v6507_v3 = vpop.eup %6506  ;;  %6001 = vmatprep.subr.bf16.mxu1 %v6000_v8 }
 0x40a   :  { %v715_v45 = vmul.f32 %v6507_v3, %v6497_v1  ;;  %v6509_v49 = vpop.eup %6508 }
 0x40b   :  { %v6511_v50 = vpop.eup %6510  ;;  %v710_v53 = vmul.f32 %v6509_v49, %v6865_v40 }
 0x40c   :  { %5633 = vmatprep.mubr.msk.f32.mxu1 %vm628_vm3, %v715_v45  ;;  %v711_v55 = vmul.f32 %v6511_v50, %v6870_v56  ;;  %v1239_v56 = vld [vmem:[#allocation2 + $0x30] sm:$0xff] }
 0x40d   :  { %v6004_v12 = vpack.c.bf16 %v1240_v2, %v1239_v56  ;;  %v6923_v37 = vpack.i.bf16 %v1240_v2, %v1239_v56 }
 0x413   :  { %v679_v46 = vpop.xlane.xlu1 %678 }
 0x414   :  { %6512 = vrcp.f32 %v679_v46 }
 0x415   :  { %6514 = vrcp.f32 %v691_v35 }
 0x417   :  { %v688_v47 = vpop.xlane.xlu1 %687 }
 0x418   :  { %6516 = vrcp.f32 %v688_v47 }
 0x41b   :  { %v694_v48 = vpop.xlane.xlu1 %693 }
 0x41c   :  { %6518 = vrcp.f32 %v694_v48 }
 0x41e   :  { %v6513_v33 = vpop.eup %6512 }
 0x41f   :  { %v700_v51 = vpop.xlane.xlu1 %699  ;;  %v709_v52 = vmul.f32 %v6513_v33, %v6499_v19  ;;  %v6515_v54 = vpop.eup %6514  ;;  %v6289_v19 = vunpack.i.h.bf16 %v6287_v18 }
 0x420   :  { %6520 = vrcp.f32 %v700_v51  ;;  %v713_v0 = vmul.f32 %v6515_v54, %v6874_v59  ;;  %v6915_v59 = vpack.i.bf16 %v1238_v41, %v1237_v39 }
 0x421   :  { %5612 = vmatprep.mubr.msk.f32.mxu0 %vm628_vm3, %v709_v52  ;;  %v5996_v15 = vpack.c.bf16 %v6289_v19, %v6288_v21 }
 0x422   :  { %v6517_v57 = vpop.eup %6516  ;;  %5613 = vmatmul.mubr.msk.f32.vlgmr.msra.gmra.mrb[6].mxu0 %vm628_vm3, %v710_v53  ;;  %6291 = vrot.lane.b32.xlu0 %v6915_v59, %s6686_s9 }
 0x423   :  { %5983 = vmatpush3.bf16.msra.mxu0 %v5980_v31  ;;  %5619 = vmatprep.mubr.msk.f32.mxu0 %vm628_vm3, %v711_v55  ;;  %v6272_v58 = vpop.permute.xlu1 %6271  ;;  %v712_v60 = vmul.f32 %v6517_v57, %v6501_v63 }
 0x424   :  { %v6274_v61 = vunpack.i.h.bf16 %v6272_v58  ;;  %v6273_v62 = vunpack.i.l.bf16 %v6272_v58 }
 0x426   :  { %5620 = vmatmul.mubr.msk.f32.vlgmr.msra.gmra.mrb[8].mxu0 %vm628_vm3, %v712_v60  ;;  %v5984_v40 = vpack.c.bf16 %v6274_v61, %v6273_v62  ;;  %v6519_v1 = vpop.eup %6518 }
 0x427   :  { %5626 = vmatprep.mubr.msk.f32.mxu0 %vm628_vm3, %v713_v0  ;;  %v714_v6 = vmul.f32 %v6519_v1, %v6885_v22  ;;  %v6282_v13 = vpop.permute.xlu1 %6281 }
 0x428   :  { %5985 = vmatprep.subr.bf16.mxu0 %v5984_v40  ;;  %v6284_v14 = vunpack.i.h.bf16 %v6282_v13  ;;  %v6283_v16 = vunpack.i.l.bf16 %v6282_v13 }
 0x429   :  { %5987 = vmatpush3.bf16.msra.mxu0 %v5984_v40 }
 0x42a   :  { %v6521_v4 = vpop.eup %6520  ;;  %v5992_v17 = vpack.c.bf16 %v6284_v14, %v6283_v16 }
 0x42b   :  { %v716_v7 = vmul.f32 %v6521_v4, %v6889_v24 }
 0x42c   :  { %5627 = vmatmul.mubr.msk.f32.vlgmr.msra.gmra.mrb[10].mxu0 %vm628_vm3, %v714_v6  ;;  %5993 = vmatprep.subr.bf16.mxu0 %v5992_v17 }
 0x42d   :  { %5634 = vmatmul.mubr.msk.f32.vlgmr.msra.gmra.mrb[6].mxu1 %vm628_vm3, %v716_v7  ;;  %5995 = vmatpush3.bf16.msra.mxu0 %v5992_v17 }
 0x42e   :  { %6003 = vmatpush3.bf16.msra.mxu1 %v6000_v8  ;;  %5655 = vmatprep.mubr.msk.f32.mxu1 %vm50_vm0, %v6771_v11 }
 0x42f   :  { %6005 = vmatprep.subr.bf16.mxu1 %v6004_v12  ;;  %5997 = vmatprep.subr.bf16.mxu0 %v5996_v15 }
 0x431   :  { %5999 = vmatpush3.bf16.msra.mxu0 %v5996_v15 }
 0x432   :  { %6007 = vmatpush3.bf16.msra.mxu1 %v6004_v12 }
 0x435   :  { %5656 = vmatmul.mubr.msk.f32.vlgmr.msra.gmra.mrb[8].mxu1 %vm50_vm0, %v6775_v20 }
 0x494   :  { %v6292_v63 = vpop.permute.xlu0 %6291 }
 0x495   :  { %v6294_v22 = vunpack.i.h.bf16 %v6292_v63  ;;  %v6293_v23 = vunpack.i.l.bf16 %v6292_v63 }
 0x497   :  { %v6008_v24 = vpack.c.bf16 %v6294_v22, %v6293_v23 }
 0x499   :  { %6009 = vmatprep.subr.bf16.mxu0 %v6008_v24 }
 0x4f5   :  { %v5614_v25 = vpop.f32.mrb[6].mxu0 }
 0x4f6   :  { %v795_v27 = vpop.f32.mrb[7].mxu0 }
 0x4f9   :  { %v5621_v28 = vpop.f32.mrb[8].mxu0 }
 0x4fa   :  { %1069 = vrot.lane.b32.xlu0 %v5621_v28, %s6685_s29  ;;  %v882_v30 = vpop.f32.mrb[9].mxu0 }
 0x4fb   :  { %1067 = vrot.lane.b32.xlu1 %v882_v30, %s6685_s29 }
 0x4ff   :  { %v5628_v31 = vpop.f32.mrb[10].mxu0 }
 0x500   :  { %v5635_v32 = vpop.f32.mrb[6].mxu1  ;;  %1077 = vrot.lane.b32.xlu1 %v5628_v31, %s6691_s24  ;;  %v969_v34 = vpop.f32.mrb[11].mxu0 }
 0x501   :  { %v1056_v35 = vpop.f32.mrb[7].mxu1 }
 0x502   :  { %1083 = vrot.lane.b32.xlu0 %v1056_v35, %s6692_s25 }
 0x504   :  { %1075 = vrot.lane.b32.xlu1 %v969_v34, %s6691_s24  ;;  %v6996_v34 = vld [vmem:[%s7756_s3 + $0x18] sm:$0xff] }
 0x506   :  { %6296 = vrot.lane.b32.xlu0 %v6923_v37, %s6686_s9 }
 0x508   :  { %v5657_v39 = vpop.f32.mrb[8].mxu1  ;;  %1085 = vrot.lane.b32.xlu1 %v5635_v32, %s6692_s25 }
 0x509   :  { %v1318_v41 = vpop.f32.mrb[9].mxu1  ;;  %v1324_v7 = vadd.f32 %v5657_v39, %v6931_v38 }
 0x50a   :  { %v1319_v42 = vadd.f32 %v6931_v38, %v1318_v41  ;;  %1424 = vrot.lane.b32.xlu0 %v6789_v29, %s6686_s9  ;;  %v7001_v41 = vld [vmem:[%s7756_s3 + $0x10] sm:$0xff] }
 0x50c   :  { %5673 = vmatprep.mubr.msk.f32.mxu1 %vm279_vm1, %v1319_v42  ;;  %1344 = vrot.lane.b32.xlu1 %v6931_v38, %s6686_s9 }
 0x510   :  { %1426 = vrot.lane.b32.xlu1 %v6784_v26, %s6686_s9 }
 0x56c   :  { %v1070_v44 = vpop.permute.xlu0 %1069 }
 0x56d   :  { %v1068_v43 = vpop.permute.xlu1 %1067  ;;  %v1090_v49 = vsel %vm279_vm1, %v5614_v25, %v1070_v44 }
 0x56e   :  { %v1089_v45 = vsel %vm279_vm1, %v795_v27, %v1068_v43 }
 0x572   :  { %v1078_v8 = vpop.permute.xlu1 %1077 }
 0x573   :  { %v1092_v26 = vsel %vm628_vm3, %v1090_v49, %v1078_v8 }
 0x574   :  { %v1084_v3 = vpop.permute.xlu0 %1083 }
 0x576   :  { %v1076_v46 = vpop.permute.xlu1 %1075 }
 0x577   :  { %v1091_v47 = vsel %vm628_vm3, %v1089_v45, %v1076_v46 }
 0x578   :  { %v1094_v29 = vsel %vm1093_vm4, %v1091_v47, %v1084_v3  ;;  %v6297_v48 = vpop.permute.xlu0 %6296 }
 0x579   :  { %5644 = vmatprep.mubr.msk.f32.mxu0 %vm50_vm0, %v1094_v29  ;;  %v6299_v50 = vunpack.i.h.bf16 %v6297_v48  ;;  %v6298_v33 = vunpack.i.l.bf16 %v6297_v48 }
 0x57a   :  { %v1086_v51 = vpop.permute.xlu1 %1085 }
 0x57b   :  { %v1095_v52 = vsel %vm1093_vm4, %v1092_v26, %v1086_v51  ;;  %v6012_v53 = vpack.c.bf16 %v6299_v50, %v6298_v33 }
 0x57c   :  { %5645 = vmatmul.mubr.msk.f32.vlgmr.msra.gmra.mrb[12].mxu0 %vm50_vm0, %v1095_v52  ;;  %v1425_v0 = vpop.permute.xlu0 %1424 }
 0x57d   :  { %6011 = vmatpush3.bf16.msra.mxu0 %v6008_v24  ;;  %5666 = vmatprep.mubr.msk.f32.mxu0 %vm50_vm0, %v6743_v5 }
 0x57e   :  { %6013 = vmatprep.subr.bf16.mxu0 %v6012_v53  ;;  %v1345_v57 = vpop.permute.xlu1 %1344 }
 0x581   :  { %6015 = vmatpush3.bf16.msra.mxu0 %v6012_v53 }
 0x582   :  { %v1427_v60 = vpop.permute.xlu1 %1426 }
 0x584   :  { %5667 = vmatmul.mubr.msk.f32.vlgmr.msra.gmra.mrb[14].mxu0 %vm50_vm0, %v6756_v9 }
 0x64f   :  { %v6954_v54 = vpop.f32.mrb[12].mxu0 }
 0x650   :  { %v6956_v55 = vpop.f32.mrb[13].mxu0 }
 0x657   :  { %v5668_v58 = vpop.f32.mrb[14].mxu0 }
 0x658   :  { %v1419_v61 = vadd.f32 %v5668_v58, %v1345_v57  ;;  %v1413_v62 = vpop.f32.mrb[15].mxu0 }
 0x659   :  { %v1414_v40 = vadd.f32 %v1413_v62, %v1345_v57 }
 0x65a   :  { %v1431_v1 = vadd.f32 %v1427_v60, %v1419_v61 }
 0x65b   :  { %v1430_v56 = vadd.f32 %v1425_v0, %v1414_v40  ;;  %v6958_v2 = vpack.i.bf16 %v1419_v61, %v1414_v40 }
 0x65d   :  { %v6305_v4 = vpack.i.bf16 %v1431_v1, %v1430_v56  ;;  %v6016_v6 = vpack.c.bf16 %v1431_v1, %v1430_v56 }
 0x65f   :  { %6306 = vrot.lane.b32.xlu1 %v6305_v4, %s6689_s18  ;;  %6301 = vrot.lane.b32.xlu0 %v6305_v4, %s6688_s17 }
 0x660   :  { %6018 = vmatprep.subr.msk.bf16.mxu1 %vm6797_vm2, %v6016_v6 }
 0x661   :  { %6021 = vmatpush3.bf16.xpose.msk.msra.mxu1 %vm6797_vm2, %v6016_v6 }
 0x663   :  { %1436 = vrot.lane.b32.xlu1 %v1324_v7, %s6688_s17  ;;  %1434 = vrot.lane.b32.xlu0 %v1319_v42, %s6688_s17 }
 0x667   :  { %1444 = vrot.lane.b32.xlu1 %v1324_v7, %s6689_s18  ;;  %1442 = vrot.lane.b32.xlu0 %v1319_v42, %s6689_s18 }
 0x668   :  { %5674 = vmatmul.mubr.msk.f32.vlgmr.msra.gmra.mrb[10].mxu1 %vm279_vm1, %v1324_v7 }
 0x66b   :  { %1438 = vrot.lane.b32.xlu1 %v1319_v42, %s6687_s16  ;;  %6311 = vrot.lane.b32.xlu0 %v6305_v4, %s6687_s16 }
 0x66f   :  { %1440 = vrot.lane.b32.xlu0 %v1324_v7, %s6687_s16 }
 0x6d1   :  { %v6307_v12 = vpop.permute.xlu1 %6306  ;;  %v6302_v13 = vpop.permute.xlu0 %6301 }
 0x6d2   :  { %v6309_v14 = vunpack.i.h.bf16 %v6307_v12  ;;  %v6308_v16 = vunpack.i.l.bf16 %v6307_v12  ;;  %v6304_v17 = vunpack.i.h.bf16 %v6302_v13  ;;  %v6303_v18 = vunpack.i.l.bf16 %v6302_v13 }
 0x6d4   :  { %v6022_v19 = vpack.c.bf16 %v6304_v17, %v6303_v18  ;;  %v6034_v15 = vpack.c.bf16 %v6309_v14, %v6308_v16 }
 0x6d5   :  { %v1437_v21 = vpop.permute.xlu1 %1436  ;;  %v1435_v63 = vpop.permute.xlu0 %1434 }
 0x6d6   :  { %6024 = vmatprep.subr.msk.bf16.mxu0 %vm6797_vm2, %v6022_v19  ;;  %5680 = vmatprep.mubr.msk.f32.mxu0 %vm279_vm1, %v1435_v63 }
 0x6d7   :  { %6027 = vmatpush3.bf16.xpose.msk.msra.mxu0 %vm6797_vm2, %v6022_v19 }
 0x6d8   :  { %6036 = vmatprep.subr.msk.bf16.mxu0 %vm6797_vm2, %v6034_v15 }
 0x6d9   :  { %v1445_v22 = vpop.permute.xlu1 %1444  ;;  %v1443_v23 = vpop.permute.xlu0 %1442 }
 0x6dd   :  { %v1439_v24 = vpop.permute.xlu1 %1438  ;;  %v6312_v25 = vpop.permute.xlu0 %6311 }
 0x6de   :  { %v6314_v27 = vunpack.i.h.bf16 %v6312_v25  ;;  %v6313_v28 = vunpack.i.l.bf16 %v6312_v25  ;;  %5681 = vmatmul.mubr.msk.f32.vlgmr.msra.gmra.mrb[16].mxu0 %vm279_vm1, %v1437_v21  ;;  %5687 = vmatprep.mubr.msk.f32.mxu1 %vm279_vm1, %v1439_v24 }
 0x6df   :  { %6039 = vmatpush3.bf16.xpose.msk.msra.mxu0 %vm6797_vm2, %v6034_v15  ;;  %5694 = vmatprep.mubr.msk.f32.mxu0 %vm279_vm1, %v1443_v23 }
 0x6e0   :  { %v6028_v30 = vpack.c.bf16 %v6314_v27, %v6313_v28 }
 0x6e1   :  { %v1441_v31 = vpop.permute.xlu0 %1440 }
 0x6e2   :  { %6030 = vmatprep.subr.msk.bf16.mxu1 %vm6797_vm2, %v6028_v30 }
 0x6e3   :  { %6033 = vmatpush3.bf16.xpose.msk.msra.mxu1 %vm6797_vm2, %v6028_v30 }
 0x6e6   :  { %5695 = vmatmul.mubr.msk.f32.vlgmr.msra.gmra.mrb[18].mxu0 %vm279_vm1, %v1445_v22 }
 0x6ea   :  { %5688 = vmatmul.mubr.msk.f32.vlgmr.msra.gmra.mrb[12].mxu1 %vm279_vm1, %v1441_v31 }
 0x73b   :  { %v5675_v32 = vpop.f32.mrb[10].mxu1 }
 0x73c   :  { %v1807_v35 = vmul.f32 0.35355338, %v5675_v32  ;;  %v1548_v39 = vpop.f32.mrb[11].mxu1 }
 0x73d   :  { %v1806_v42 = vmul.f32 0.35355338, %v1548_v39 }
 0x73e   :  { %v1815_v43 = vadd.f32 %v6996_v34, %v1807_v35 }
 0x73f   :  { %v1814_v44 = vadd.f32 %v7001_v41, %v1806_v42 }
 0x740   :  { %v1825_v8 = vsel %vm628_vm3, %v1815_v43, -inf }
 0x741   :  { %1826 = vmax.xlane.f32.xlu0 %v1825_v8  ;;  %v1822_v3 = vsel %vm628_vm3, %v1814_v44, -inf }
 0x742   :  { %1823 = vmax.xlane.f32.xlu1 %v1822_v3 }
 0x7b1   :  { %v5682_v45 = vpop.f32.mrb[16].mxu0 }
 0x7b2   :  { %v1809_v46 = vmul.f32 0.35355338, %v5682_v45  ;;  %v1631_v47 = vpop.f32.mrb[17].mxu0 }
 0x7b3   :  { %v1808_v29 = vmul.f32 0.35355338, %v1631_v47 }
 0x7b4   :  { %v1817_v48 = vadd.f32 %v6996_v34, %v1809_v46 }
 0x7b5   :  { %v1816_v49 = vadd.f32 %v7001_v41, %v1808_v29 }
 0x7b6   :  { %v1831_v50 = vsel %vm628_vm3, %v1817_v48, -inf }
 0x7b7   :  { %1832 = vmax.xlane.f32.xlu1 %v1831_v50  ;;  %v1828_v33 = vsel %vm628_vm3, %v1816_v49, -inf }
 0x7b8   :  { %1829 = vmax.xlane.f32.xlu0 %v1828_v33 }
 0x7b9   :  { %v5696_v26 = vpop.f32.mrb[18].mxu0 }
 0x7ba   :  { %v1813_v51 = vmul.f32 0.35355338, %v5696_v26  ;;  %v1797_v52 = vpop.f32.mrb[19].mxu0 }
 0x7bb   :  { %v1812_v53 = vmul.f32 0.35355338, %v1797_v52 }
 0x7bc   :  { %v1821_v57 = vadd.f32 %v6996_v34, %v1813_v51 }
 0x7bd   :  { %v7012_v58 = vpop.f32.mrb[12].mxu1  ;;  %v7015_v60 = vadd.f32 %v7001_v41, %v1812_v53 }
 0x7be   :  { %v7017_v61 = vpop.f32.mrb[13].mxu1  ;;  %v1843_v62 = vsel %vm628_vm3, %v1821_v57, -inf }
 0x7bf   :  { %1844 = vmax.xlane.f32.xlu1 %v1843_v62  ;;  %v1840_v0 = vsel %vm628_vm3, %v7015_v60, -inf  ;;  %v1810_v52 = vmul.f32 0.35355338, %v7017_v61  ;;  %v7085_v62 = vld [vmem:[#allocation2 + $0x40] sm:$0xff]  ;;  %v7091_v61 = vld [vmem:[#allocation2 + $0x50] sm:$0xff] }
 0x7c0   :  { %1841 = vmax.xlane.f32.xlu0 %v1840_v0  ;;  %v7087_v0 = vld [vmem:[#allocation2 + $0x48] sm:$0xff] }
 0x7c1   :  { %v7074_v53 = vadd.f32 %v7001_v41, %v1810_v52  ;;  %v6430_v41 = vpack.i.bf16 %v7087_v0, %v7085_v62 }
 0x7ce   :  { %v1827_v40 = vpop.xlane.xlu0 %1826 }
 0x7cf   :  { %v1847_v1 = vsub.f32 %v1815_v43, %v1827_v40  ;;  %v1824_v7 = vpop.xlane.xlu1 %1823  ;;  %v7093_v40 = vld [vmem:[#allocation2 + $0x58] sm:$0xff] }
 0x7d0   :  { %6316 = vrot.lane.b32.xlu1 %v6958_v2, %s6688_s17  ;;  %v1846_v63 = vsub.f32 %v1814_v44, %v1824_v7 }
 0x7d1   :  { %v1856_v56 = vmul.f32 1.442695, %v1847_v1  ;;  %v6435_v1 = vpack.i.bf16 %v7093_v40, %v7091_v61 }
 0x7d2   :  { %v1854_v31 = vmul.f32 1.442695, %v1846_v63 }
 0x7d3   :  { %6522 = vpow2.f32 %v1856_v56  ;;  %v1811_v56 = vmul.f32 0.35355338, %v7012_v58  ;;  %v7115_v58 = vld [vmem:[%s7757_s4 + $0x8] sm:$0xff] }
 0x7d4   :  { %6321 = vrot.lane.b32.xlu1 %v6958_v2, %s6689_s18 }
 0x7d6   :  { %1108 = vrot.lane.b32.xlu0 %v6765_v10, %s6690_s23 }
 0x7d8   :  { %6326 = vrot.lane.b32.xlu1 %v6958_v2, %s6686_s9 }
 0x7dd   :  { %v7030_v4 = vpop.eup %6522 }
 0x7de   :  { %v1873_v6 = vsel %vm628_vm3, %v7030_v4, 0.0 }
 0x7fc   :  { %1874 = vadd.xlane.f32.xlu1 %v1873_v6  ;;  %v7101_v6 = vadd.f32 %v6996_v34, %v1811_v56 }
 0x7fe   :  { %v1837_v7 = vsel %vm628_vm3, %v7101_v6, -inf }
 0x844   :  { %v1833_v12 = vpop.xlane.xlu1 %1832 }
 0x845   :  { %v1849_v13 = vsub.f32 %v1817_v48, %v1833_v12  ;;  %v1830_v14 = vpop.xlane.xlu0 %1829 }
 0x846   :  { %v1848_v16 = vsub.f32 %v1816_v49, %v1830_v14 }
 0x847   :  { %v1860_v17 = vmul.f32 1.442695, %v1849_v13 }
 0x848   :  { %v1858_v10 = vmul.f32 1.442695, %v1848_v16 }
 0x849   :  { %6524 = vpow2.f32 %v1860_v17 }
 0x84a   :  { %6526 = vpow2.f32 %v1858_v10 }
 0x84b   :  { %6528 = vpow2.f32 %v1854_v31 }
 0x84c   :  { %v1845_v18 = vpop.xlane.xlu1 %1844 }
 0x84d   :  { %v1842_v19 = vpop.xlane.xlu0 %1841  ;;  %v1853_v32 = vsub.f32 %v1821_v57, %v1845_v18  ;;  %v7079_v57 = vld [vmem:[%s7755_s2 + $0x1] ss:$0 sm:$0xff] }
 0x84e   :  { %v1852_v50 = vsub.f32 %v7015_v60, %v1842_v19  ;;  %v1834_v60 = vsel %vm628_vm3, %v7074_v53, -inf }
 0x84f   :  { %v1868_v42 = vmul.f32 1.442695, %v1853_v32 }
 0x850   :  { %v6317_v21 = vpop.permute.xlu1 %6316  ;;  %v1866_v33 = vmul.f32 1.442695, %v1852_v50 }
 0x851   :  { %v1109_v15 = vpop.permute.xlu0 %1108  ;;  %6530 = vpow2.f32 %v1868_v42 }
 0x852   :  { %v1184_v22 = vadd.f32 %v6956_v55, %v1109_v15  ;;  %v1189_v23 = vadd.f32 %v6954_v54, %v1109_v15  ;;  %6532 = vpow2.f32 %v1866_v33 }
 0x853   :  { %v7036_v24 = vpop.eup %6524 }
 0x854   :  { %v6322_v25 = vpop.permute.xlu1 %6321  ;;  %v1879_v27 = vsel %vm628_vm3, %v7036_v24, 0.0  ;;  %v7041_v28 = vadd.f32 %v1184_v22, %v6743_v5  ;;  %v7043_v30 = vpop.eup %6526  ;;  %v7048_v55 = vadd.f32 %v1189_v23, %v6756_v9 }
 0x855   :  { %1880 = vadd.xlane.f32.xlu1 %v1879_v27  ;;  %v1876_v39 = vsel %vm628_vm3, %v7043_v30, 0.0  ;;  %v6529_v47 = vpop.eup %6528 }
 0x856   :  { %v1194_v35 = vsel %vm50_vm0, %v7041_v28, 0.0  ;;  %v1197_v44 = vsel %vm50_vm0, %v7048_v55, 0.0  ;;  %v1203_v8 = vmul.f32 %v7041_v28, %v7041_v28  ;;  %v1204_v45 = vmul.f32 %v7048_v55, %v7048_v55 }
 0x857   :  { %1195 = vadd.xlane.f32.xlu0 %v1194_v35  ;;  %v1870_v29 = vsel %vm628_vm3, %v6529_v47, 0.0 }
 0x858   :  { %v6327_v54 = vpop.permute.xlu1 %6326  ;;  %v1205_v9 = vsel %vm50_vm0, %v1203_v8, 0.0  ;;  %v1208_v46 = vsel %vm50_vm0, %v1204_v45, 0.0  ;;  %v6064_v8 = vpack.c.bf16 %v7087_v0, %v7085_v62 }
 0x859   :  { %v6329_v5 = vunpack.i.h.bf16 %v6327_v54  ;;  %v6328_v43 = vunpack.i.l.bf16 %v6327_v54  ;;  %1877 = vadd.xlane.f32.xlu1 %v1876_v39 }
 0x85b   :  { %1198 = vadd.xlane.f32.xlu0 %v1197_v44  ;;  %v6040_v3 = vpack.c.bf16 %v6329_v5, %v6328_v43  ;;  %v7061_v48 = vpop.eup %6530 }
 0x85c   :  { %v1891_v49 = vsel %vm628_vm3, %v7061_v48, 0.0  ;;  %v7068_v26 = vpop.eup %6532 }
 0x85d   :  { %6041 = vmatprep.subr.bf16.mxu1 %v6040_v3  ;;  %v1888_v51 = vsel %vm628_vm3, %v7068_v26, 0.0 }
 0x85e   :  { %6043 = vmatpush3.bf16.msra.mxu1 %v6040_v3 }
 0x85f   :  { %1206 = vadd.xlane.f32.xlu0 %v1205_v9 }
 0x863   :  { %1209 = vadd.xlane.f32.xlu0 %v1208_v46 }
 0x867   :  { %1871 = vadd.xlane.f32.xlu0 %v1870_v29 }
 0x86a   :  { %6336 = vrot.lane.b32.xlu1 %v6322_v25, %s6686_s9 }
 0x86b   :  { %1892 = vadd.xlane.f32.xlu0 %v1891_v49 }
 0x881   :  { %6331 = vrot.lane.b32.xlu0 %v6317_v21, %s6686_s9 }
 0x889   :  { %v1875_v13 = vpop.xlane.xlu1 %1874 }
 0x88a   :  { %6534 = vrcp.f32 %v1875_v13 }
 0x88e   :  { %1889 = vadd.xlane.f32.xlu1 %v1888_v51 }
 0x894   :  { %v6535_v15 = vpop.eup %6534 }
 0x895   :  { %v1903_v39 = vmul.f32 %v6535_v15, %v7030_v4 }
 0x89f   :  { %1232 = vrot.lane.b32.xlu1 %v7079_v57, %s6686_s9 }
 0x8a0   :  { %1835 = vmax.xlane.f32.xlu0 %v1834_v60 }
 0x8b6   :  { %6341 = vrot.lane.b32.xlu0 %v6958_v2, %s6687_s16  ;;  %v7108_v2 = vld [vmem:[%s7757_s4] sm:$0xff] }
 0x8ba   :  { %2528 = vrot.lane.b32.xlu0 %v7108_v2, %s6686_s9 }
 0x8be   :  { %2530 = vrot.lane.b32.xlu0 %v7115_v58, %s6686_s9 }
 0x8c3   :  { %1838 = vmax.xlane.f32.xlu1 %v1837_v7 }
 0x8e2   :  { %v1881_v16 = vpop.xlane.xlu1 %1880 }
 0x8e4   :  { %v1196_v12 = vpop.xlane.xlu0 %1195 }
 0x8e5   :  { %v1201_v4 = vmul.f32 0.03125, %v1196_v12 }
 0x8e6   :  { %v1878_v18 = vpop.xlane.xlu1 %1877 }
 0x8e7   :  { %6536 = vrcp.f32 %v1878_v18  ;;  %v1213_v9 = vmul.f32 %v1201_v4, %v1201_v4  ;;  %v1217_v51 = vsub.f32 %v7041_v28, %v1201_v4 }
 0x8e8   :  { %v1199_v14 = vpop.xlane.xlu0 %1198 }
 0x8e9   :  { %v1202_v45 = vmul.f32 0.03125, %v1199_v14 }
 0x8ea   :  { %v6337_v21 = vpop.permute.xlu1 %6336 }
 0x8eb   :  { %v6339_v31 = vunpack.i.h.bf16 %v6337_v21  ;;  %v6338_v32 = vunpack.i.l.bf16 %v6337_v21  ;;  %v1214_v29 = vmul.f32 %v1202_v45, %v1202_v45 }
 0x8ec   :  { %v1207_v17 = vpop.xlane.xlu0 %1206 }
 0x8ed   :  { %v6052_v43 = vpack.c.bf16 %v6339_v31, %v6338_v32  ;;  %v1211_v3 = vmul.f32 0.03125, %v1207_v17 }
 0x8f0   :  { %v1210_v10 = vpop.xlane.xlu0 %1209 }
 0x8f1   :  { %v6537_v25 = vpop.eup %6536  ;;  %v1212_v46 = vmul.f32 0.03125, %v1210_v10  ;;  %v6068_v10 = vpack.c.bf16 %v7093_v40, %v7091_v61 }
 0x8f2   :  { %v1904_v5 = vmul.f32 %v6537_v25, %v7043_v30  ;;  %v1215_v30 = vsub.f32 %v1211_v3, %v1213_v9 }
 0x8f3   :  { %v1216_v49 = vsub.f32 %v1212_v46, %v1214_v29  ;;  %v5276_v46 = vld [vmem:[%s7755_s2 + $0x4] ss:$0 sm:$0xff] }
 0x8f4   :  { %v1872_v34 = vpop.xlane.xlu0 %1871 }
 0x8f5   :  { %6538 = vrcp.f32 %v1872_v34  ;;  %v1220_v50 = vadd.f32 1e-12, %v1216_v49 }
 0x8f6   :  { %6540 = vrcp.f32 %v1881_v16  ;;  %v1218_v16 = vsub.f32 %v7048_v55, %v1202_v45 }
 0x8f8   :  { %v1893_v19 = vpop.xlane.xlu0 %1892 }
 0x8fc   :  { %v6332_v63 = vpop.permute.xlu0 %6331 }
 0x8fd   :  { %v6334_v22 = vunpack.i.h.bf16 %v6332_v63  ;;  %v6333_v23 = vunpack.i.l.bf16 %v6332_v63 }
 0x8ff   :  { %v6539_v27 = vpop.eup %6538  ;;  %v6044_v35 = vpack.c.bf16 %v6334_v22, %v6333_v23 }
 0x900   :  { %v1902_v54 = vmul.f32 %v6539_v27, %v6529_v47  ;;  %v6541_v42 = vpop.eup %6540  ;;  %v1219_v47 = vadd.f32 1e-12, %v1215_v30 }
 0x901   :  { %6045 = vmatprep.subr.bf16.mxu1 %v6044_v35  ;;  %v1905_v44 = vmul.f32 %v6541_v42, %v7036_v24 }
 0x902   :  { %5701 = vmatprep.mubr.msk.f32.mxu1 %vm628_vm3, %v1902_v54  ;;  %6542 = vrsqrt.f32 %v1219_v47 }
 0x903   :  { %5702 = vmatmul.mubr.msk.f32.vlgmr.msra.gmra.mrb[14].mxu1 %vm628_vm3, %v1903_v39  ;;  %6544 = vrcp.f32 %v1893_v19 }
 0x904   :  { %6047 = vmatpush3.bf16.msra.mxu1 %v6044_v35  ;;  %5708 = vmatprep.mubr.msk.f32.mxu1 %vm628_vm3, %v1904_v5 }
 0x905   :  { %6053 = vmatprep.subr.bf16.mxu1 %v6052_v43 }
 0x907   :  { %5709 = vmatmul.mubr.msk.f32.vlgmr.msra.gmra.mrb[16].mxu1 %vm628_vm3, %v1905_v44 }
 0x908   :  { %6055 = vmatpush3.bf16.msra.mxu1 %v6052_v43 }
 0x909   :  { %6065 = vmatprep.subr.bf16.mxu1 %v6064_v8 }
 0x90c   :  { %v6543_v33 = vpop.eup %6542 }
 0x90d   :  { %v1223_v52 = vmul.f32 %v6543_v33, %v1217_v51  ;;  %v6545_v60 = vpop.eup %6544 }
 0x90e   :  { %v1909_v17 = vmul.f32 %v6545_v60, %v7061_v48 }
 0x90f   :  { %v1229_v13 = vmul.f32 %v7079_v57, %v1223_v52 }
 0x91b   :  { %v1890_v24 = vpop.xlane.xlu1 %1889 }
 0x91c   :  { %6546 = vrcp.f32 %v1890_v24 }
 0x91d   :  { %6548 = vrsqrt.f32 %v1220_v50 }
 0x91f   :  { %v1233_v7 = vpop.permute.xlu1 %1232 }
 0x920   :  { %v7135_v18 = vadd.f32 %v1233_v7, %v1229_v13 }
 0x926   :  { %v6547_v56 = vpop.eup %6546 }
 0x927   :  { %v6549_v12 = vpop.eup %6548  ;;  %v1908_v14 = vmul.f32 %v6547_v56, %v7068_v26 }
 0x928   :  { %v1224_v28 = vmul.f32 %v6549_v12, %v1218_v16 }
 0x929   :  { %5722 = vmatprep.mubr.msk.f32.mxu1 %vm628_vm3, %v1908_v14 }
 0x92a   :  { %5723 = vmatmul.mubr.msk.f32.vlgmr.msra.gmra.mrb[18].mxu1 %vm628_vm3, %v1909_v17  ;;  %v1230_v55 = vmul.f32 %v7079_v57, %v1224_v28 }
 0x92b   :  { %6067 = vmatpush3.bf16.msra.mxu1 %v6064_v8  ;;  %5744 = vmatprep.mubr.msk.f32.mxu1 %vm50_vm0, %v7135_v18 }
 0x92c   :  { %6069 = vmatprep.subr.bf16.mxu1 %v6068_v10  ;;  %v7143_v34 = vadd.f32 %v1233_v7, %v1230_v55 }
 0x92d   :  { %v1836_v26 = vpop.xlane.xlu0 %1835 }
 0x92e   :  { %v1850_v48 = vsub.f32 %v7074_v53, %v1836_v26 }
 0x92f   :  { %6071 = vmatpush3.bf16.msra.mxu1 %v6068_v10 }
 0x930   :  { %v1862_v19 = vmul.f32 1.442695, %v1850_v48 }
 0x931   :  { %v6342_v25 = vpop.permute.xlu0 %6341 }
 0x932   :  { %6550 = vpow2.f32 %v1862_v19  ;;  %5745 = vmatmul.mubr.msk.f32.vlgmr.msra.gmra.mrb[20].mxu1 %vm50_vm0, %v7143_v34 }
 0x935   :  { %v2529_v45 = vpop.permute.xlu0 %2528 }
 0x939   :  { %v2531_v29 = vpop.permute.xlu0 %2530 }
 0x93c   :  { %v6551_v21 = vpop.eup %6550 }
 0x93d   :  { %v1882_v63 = vsel %vm628_vm3, %v6551_v21, 0.0 }
 0x93e   :  { %1883 = vadd.xlane.f32.xlu1 %v1882_v63 }
 0x950   :  { %v1839_v15 = vpop.xlane.xlu1 %1838 }
 0x951   :  { %v1851_v22 = vsub.f32 %v7101_v6, %v1839_v15 }
 0x953   :  { %v1864_v23 = vmul.f32 1.442695, %v1851_v22 }
 0x955   :  { %6552 = vpow2.f32 %v1864_v23 }
 0x95f   :  { %v6553_v57 = vpop.eup %6552 }
 0x960   :  { %v1885_v53 = vsel %vm628_vm3, %v6553_v57, 0.0 }
 0x961   :  { %1886 = vadd.xlane.f32.xlu1 %v1885_v53 }
 0x972   :  { %6346 = vrot.lane.b32.xlu1 %v6342_v25, %s6686_s9 }
 0x9cb   :  { %v1884_v27 = vpop.xlane.xlu1 %1883 }
 0x9cc   :  { %6554 = vrcp.f32 %v1884_v27 }
 0x9d6   :  { %v6555_v31 = vpop.eup %6554  ;;  %v7151_v32 = vpop.f32.mrb[14].mxu1 }
 0x9d7   :  { %v7153_v35 = vpop.f32.mrb[15].mxu1  ;;  %v1906_v54 = vmul.f32 %v6555_v31, %v6551_v21 }
 0x9d9   :  { %5715 = vmatprep.mubr.msk.f32.mxu0 %vm628_vm3, %v1906_v54 }
 0x9da   :  { %v5710_v6 = vpop.f32.mrb[16].mxu1 }
 0x9db   :  { %v2075_v39 = vpop.f32.mrb[17].mxu1 }
 0x9ee   :  { %v1887_v42 = vpop.xlane.xlu1 %1886 }
 0x9ef   :  { %6556 = vrcp.f32 %v1887_v42 }
 0x9f2   :  { %v6347_v5 = vpop.permute.xlu1 %6346 }
 0x9f3   :  { %v6349_v43 = vunpack.i.h.bf16 %v6347_v5  ;;  %v6348_v44 = vunpack.i.l.bf16 %v6347_v5 }
 0x9f5   :  { %v6048_v8 = vpack.c.bf16 %v6349_v43, %v6348_v44 }
 0x9f7   :  { %6049 = vmatprep.subr.bf16.mxu0 %v6048_v8 }
 0x9f8   :  { %6051 = vmatpush3.bf16.msra.mxu0 %v6048_v8 }
 0x9f9   :  { %v6557_v4 = vpop.eup %6556 }
 0x9fa   :  { %v1907_v3 = vmul.f32 %v6557_v4, %v6553_v57 }
 0x9fc   :  { %5716 = vmatmul.mubr.msk.f32.vlgmr.msra.gmra.mrb[20].mxu0 %vm628_vm3, %v1907_v3 }
 0x9fd   :  { %v5724_v9 = vpop.f32.mrb[18].mxu1 }
 0x9fe   :  { %v2249_v30 = vpop.f32.mrb[19].mxu1 }
 0xa05   :  { %v5746_v47 = vpop.f32.mrb[20].mxu1 }
 0xa06   :  { %v7160_v49 = vadd.f32 %v5746_v47, %v5276_v46  ;;  %v2517_v50 = vpop.f32.mrb[21].mxu1 }
 0xa07   :  { %v7162_v24 = vadd.f32 %v5276_v46, %v2517_v50 }
 0xa08   :  { %v2535_v33 = vadd.f32 %v2531_v29, %v7160_v49 }
 0xa09   :  { %v2534_v51 = vadd.f32 %v2529_v45, %v7162_v24 }
 0xa0b   :  { %v6350_v52 = vpack.i.bf16 %v2535_v33, %v2534_v51 }
 0xa0d   :  { %6351 = vrot.lane.b32.xlu0 %v6350_v52, %s6688_s17  ;;  %6356 = vrot.lane.b32.xlu1 %v6350_v52, %s6689_s18 }
 0xa7f   :  { %v6352_v60 = vpop.permute.xlu0 %6351  ;;  %v6357_v56 = vpop.permute.xlu1 %6356 }
 0xa80   :  { %6361 = vrot.lane.b32.xlu0 %v6352_v60, %s6686_s9  ;;  %6366 = vrot.lane.b32.xlu1 %v6357_v56, %s6686_s9 }
 0xa84   :  { %2538 = vrot.lane.b32.xlu0 %v7162_v24, %s6688_s17  ;;  %2540 = vrot.lane.b32.xlu1 %v7160_v49, %s6688_s17 }
 0xa88   :  { %2546 = vrot.lane.b32.xlu0 %v7162_v24, %s6689_s18  ;;  %2548 = vrot.lane.b32.xlu1 %v7160_v49, %s6689_s18 }
 0xa8c   :  { %6371 = vrot.lane.b32.xlu0 %v6350_v52, %s6687_s16  ;;  %6376 = vrot.lane.b32.xlu1 %v6915_v59, %s6690_s23 }
 0xa90   :  { %6381 = vrot.lane.b32.xlu0 %v6923_v37, %s6690_s23  ;;  %2260 = vrot.lane.b32.xlu1 %v2075_v39, %s6685_s29 }
 0xa94   :  { %2262 = vrot.lane.b32.xlu0 %v5710_v6, %s6685_s29 }
 0xa98   :  { %6386 = vrot.lane.b32.xlu0 %v6350_v52, %s6686_s9  ;;  %v5275_v52 = vld [vmem:[%s7756_s3 + $0x28] sm:$0xff] }
 0xa9c   :  { %2276 = vrot.lane.b32.xlu0 %v2249_v30, %s6692_s25 }
 0xacf   :  { %v5717_v7 = vpop.f32.mrb[20].mxu0 }
 0xad0   :  { %v2162_v12 = vpop.f32.mrb[21].mxu0 }
 0xad1   :  { %2268 = vrot.lane.b32.xlu1 %v2162_v12, %s6691_s24 }
 0xad5   :  { %2270 = vrot.lane.b32.xlu1 %v5717_v7, %s6691_s24  ;;  %v5274_v7 = vld [vmem:[%s7756_s3 + $0x20] sm:$0xff] }
 0xad9   :  { %2278 = vrot.lane.b32.xlu1 %v5724_v9, %s6692_s25 }
 0xadd   :  { %2542 = vrot.lane.b32.xlu1 %v7162_v24, %s6687_s16 }
 0xaf2   :  { %v6362_v59 = vpop.permute.xlu0 %6361  ;;  %v6367_v37 = vpop.permute.xlu1 %6366 }
 0xaf3   :  { %v6364_v13 = vunpack.i.h.bf16 %v6362_v59  ;;  %v6363_v14 = vunpack.i.l.bf16 %v6362_v59  ;;  %v6369_v16 = vunpack.i.h.bf16 %v6367_v37  ;;  %v6368_v17 = vunpack.i.l.bf16 %v6367_v37 }
 0xaf5   :  { %v6078_v10 = vpack.c.bf16 %v6364_v13, %v6363_v14  ;;  %v6090_v55 = vpack.c.bf16 %v6369_v16, %v6368_v17 }
 0xaf6   :  { %v7192_v28 = vpop.permute.xlu0 %2538  ;;  %v7194_v26 = vpop.permute.xlu1 %2540 }
 0xaf7   :  { %6080 = vmatprep.subr.msk.bf16.mxu1 %vm6797_vm2, %v6078_v10  ;;  %5758 = vmatprep.mubr.msk.f32.mxu1 %vm279_vm1, %v7192_v28 }
 0xaf8   :  { %6083 = vmatpush3.bf16.xpose.msk.msra.mxu1 %vm6797_vm2, %v6078_v10 }
 0xaf9   :  { %6092 = vmatprep.subr.msk.bf16.mxu1 %vm6797_vm2, %v6090_v55 }
 0xafa   :  { %v7204_v48 = vpop.permute.xlu0 %2546  ;;  %v7206_v19 = vpop.permute.xlu1 %2548 }
 0xafe   :  { %v6372_v21 = vpop.permute.xlu0 %6371  ;;  %v6377_v63 = vpop.permute.xlu1 %6376 }
 0xaff   :  { %v6379_v15 = vunpack.i.h.bf16 %v6377_v63  ;;  %v6378_v22 = vunpack.i.l.bf16 %v6377_v63  ;;  %5759 = vmatmul.mubr.msk.f32.vlgmr.msra.gmra.mrb[22].mxu1 %vm279_vm1, %v7194_v26  ;;  %6391 = vrot.lane.b32.xlu0 %v6372_v21, %s6686_s9 }
 0xb00   :  { %6095 = vmatpush3.bf16.xpose.msk.msra.mxu1 %vm6797_vm2, %v6090_v55  ;;  %5772 = vmatprep.mubr.msk.f32.mxu1 %vm279_vm1, %v7204_v48 }
 0xb01   :  { %v6056_v23 = vpack.c.bf16 %v6379_v15, %v6378_v22 }
 0xb02   :  { %v6382_v57 = vpop.permute.xlu0 %6381  ;;  %v2261_v5 = vpop.permute.xlu1 %2260 }
 0xb03   :  { %v6384_v53 = vunpack.i.h.bf16 %v6382_v57  ;;  %v6383_v25 = vunpack.i.l.bf16 %v6382_v57  ;;  %6057 = vmatprep.subr.bf16.mxu0 %v6056_v23  ;;  %2544 = vrot.lane.b32.xlu0 %v7160_v49, %s6687_s16  ;;  %v2282_v43 = vsel %vm279_vm1, %v7153_v35, %v2261_v5 }
 0xb04   :  { %6059 = vmatpush3.bf16.msra.mxu0 %v6056_v23 }
 0xb05   :  { %v6060_v27 = vpack.c.bf16 %v6384_v53, %v6383_v25 }
 0xb06   :  { %v2263_v31 = vpop.permute.xlu0 %2262 }
 0xb07   :  { %5773 = vmatmul.mubr.msk.f32.vlgmr.msra.gmra.mrb[24].mxu1 %vm279_vm1, %v7206_v19  ;;  %6061 = vmatprep.subr.bf16.mxu0 %v6060_v27  ;;  %v2283_v30 = vsel %vm279_vm1, %v7151_v32, %v2263_v31 }
 0xb08   :  { %6063 = vmatpush3.bf16.msra.mxu0 %v6060_v27 }
 0xb0a   :  { %v6387_v54 = vpop.permute.xlu0 %6386 }
 0xb0b   :  { %v6389_v6 = vunpack.i.h.bf16 %v6387_v54  ;;  %v6388_v39 = vunpack.i.l.bf16 %v6387_v54 }
 0xb0d   :  { %v6072_v42 = vpack.c.bf16 %v6389_v6, %v6388_v39 }
 0xb0e   :  { %v2277_v8 = vpop.permute.xlu0 %2276 }
 0xb0f   :  { %6074 = vmatprep.subr.msk.bf16.mxu0 %vm6797_vm2, %v6072_v42 }
 0xb43   :  { %v2269_v44 = vpop.permute.xlu1 %2268 }
 0xb44   :  { %v2284_v4 = vsel %vm628_vm3, %v2282_v43, %v2269_v44 }
 0xb45   :  { %v2286_v3 = vsel %vm1093_vm4, %v2284_v4, %v2277_v8 }
 0xb46   :  { %5733 = vmatprep.mubr.msk.f32.mxu0 %vm50_vm0, %v2286_v3 }
 0xb47   :  { %v2271_v9 = vpop.permute.xlu1 %2270 }
 0xb48   :  { %v2285_v45 = vsel %vm628_vm3, %v2283_v30, %v2271_v9 }
 0xb4b   :  { %v2279_v46 = vpop.permute.xlu1 %2278 }
 0xb4c   :  { %v2287_v47 = vsel %vm1093_vm4, %v2285_v45, %v2279_v46 }
 0xb4d   :  { %5734 = vmatmul.mubr.msk.f32.vlgmr.msra.gmra.mrb[22].mxu0 %vm50_vm0, %v2287_v47 }
 0xb4e   :  { %6077 = vmatpush3.bf16.xpose.msk.msra.mxu0 %vm6797_vm2, %v6072_v42  ;;  %5751 = vmatprep.mubr.msk.f32.mxu0 %vm279_vm1, %v7162_v24 }
 0xb4f   :  { %v7235_v35 = vpop.permute.xlu1 %2542 }
 0xb55   :  { %5752 = vmatmul.mubr.msk.f32.vlgmr.msra.gmra.mrb[24].mxu0 %vm279_vm1, %v7160_v49 }
 0xb56   :  { %5765 = vmatprep.mubr.msk.f32.mxu0 %vm279_vm1, %v7235_v35 }
 0xb71   :  { %v6392_v32 = vpop.permute.xlu0 %6391 }
 0xb72   :  { %v6394_v29 = vunpack.i.h.bf16 %v6392_v32  ;;  %v6393_v50 = vunpack.i.l.bf16 %v6392_v32 }
 0xb74   :  { %v6084_v33 = vpack.c.bf16 %v6394_v29, %v6393_v50 }
 0xb75   :  { %v7245_v51 = vpop.permute.xlu0 %2544 }
 0xb76   :  { %6086 = vmatprep.subr.msk.bf16.mxu0 %vm6797_vm2, %v6084_v33 }
 0xb77   :  { %6089 = vmatpush3.bf16.xpose.msk.msra.mxu0 %vm6797_vm2, %v6084_v33 }
 0xb7e   :  { %5766 = vmatmul.mubr.msk.f32.vlgmr.msra.gmra.mrb[26].mxu0 %vm279_vm1, %v7245_v51 }
 0xbd2   :  { %v5760_v60 = vpop.f32.mrb[22].mxu1 }
 0xbd3   :  { %v2915_v56 = vmul.f32 0.35355338, %v5760_v60  ;;  %v2729_v12 = vpop.f32.mrb[23].mxu1 }
 0xbd4   :  { %v2914_v59 = vmul.f32 0.35355338, %v2729_v12 }
 0xbd5   :  { %v7255_v37 = vadd.f32 %v5275_v52, %v2915_v56 }
 0xbd6   :  { %v2922_v13 = vadd.f32 %v5274_v7, %v2914_v59 }
 0xbd7   :  { %v2937_v14 = vsel %vm628_vm3, %v7255_v37, -inf }
 0xbd8   :  { %2938 = vmax.xlane.f32.xlu0 %v2937_v14  ;;  %v2934_v16 = vsel %vm628_vm3, %v2922_v13, -inf }
 0xbd9   :  { %2935 = vmax.xlane.f32.xlu1 %v2934_v16 }
 0xbda   :  { %v5774_v17 = vpop.f32.mrb[24].mxu1 }
 0xbdb   :  { %v2919_v10 = vmul.f32 0.35355338, %v5774_v17  ;;  %v2903_v55 = vpop.f32.mrb[25].mxu1  ;;  %v6400_v17 = vpack.i.bf16 %v7206_v19, %v7204_v48 }
 0xbdc   :  { %v2918_v21 = vmul.f32 0.35355338, %v2903_v55 }
 0xbdd   :  { %v7260_v63 = vadd.f32 %v5275_v52, %v2919_v10  ;;  %v6395_v10 = vpack.i.bf16 %v7194_v26, %v7192_v28 }
 0xbde   :  { %v7262_v15 = vadd.f32 %v5274_v7, %v2918_v21 }
 0xbdf   :  { %v2949_v22 = vsel %vm628_vm3, %v7260_v63, -inf }
 0xbe0   :  { %2950 = vmax.xlane.f32.xlu1 %v2949_v22  ;;  %v2946_v23 = vsel %vm628_vm3, %v7262_v15, -inf }
 0xbe1   :  { %2947 = vmax.xlane.f32.xlu0 %v2946_v23 }
 0xbf7   :  { %2300 = vrot.lane.b32.xlu0 %v6931_v38, %s6690_s23 }
 0xc20   :  { %v5735_v57 = vpop.f32.mrb[22].mxu0 }
 0xc21   :  { %v2375_v53 = vpop.f32.mrb[23].mxu0 }
 0xc28   :  { %v5753_v25 = vpop.f32.mrb[24].mxu0 }
 0xc29   :  { %v2642_v27 = vpop.f32.mrb[25].mxu0  ;;  %v2913_v31 = vmul.f32 0.35355338, %v5753_v25 }
 0xc2a   :  { %v2912_v54 = vmul.f32 0.35355338, %v2642_v27 }
 0xc2b   :  { %v7272_v39 = vadd.f32 %v5275_v52, %v2913_v31 }
 0xc2c   :  { %v7270_v6 = vadd.f32 %v5274_v7, %v2912_v54 }
 0xc2d   :  { %v2931_v5 = vsel %vm628_vm3, %v7272_v39, -inf }
 0xc2e   :  { %v2928_v42 = vsel %vm628_vm3, %v7270_v6, -inf }
 0xc2f   :  { %2929 = vmax.xlane.f32.xlu1 %v2928_v42 }
 0xc33   :  { %2932 = vmax.xlane.f32.xlu1 %v2931_v5 }
 0xc51   :  { %v5767_v43 = vpop.f32.mrb[26].mxu0 }
 0xc52   :  { %v2816_v38 = vpop.f32.mrb[27].mxu0  ;;  %v2917_v44 = vmul.f32 0.35355338, %v5767_v43  ;;  %v7335_v43 = vld [vmem:[%s7755_s2 + $0x3] ss:$0 sm:$0xff] }
 0xc53   :  { %v2916_v8 = vmul.f32 0.35355338, %v2816_v38 }
 0xc54   :  { %v7280_v3 = vadd.f32 %v5275_v52, %v2917_v44  ;;  %v7340_v44 = vld [vmem:[#allocation2 + $0x60] sm:$0xff] }
 0xc55   :  { %v7278_v4 = vadd.f32 %v5274_v7, %v2916_v8  ;;  %v7342_v8 = vld [vmem:[#allocation2 + $0x68] sm:$0xff] }
 0xc56   :  { %v2943_v30 = vsel %vm628_vm3, %v7280_v3, -inf }
 0xc57   :  { %v2940_v9 = vsel %vm628_vm3, %v7278_v4, -inf }
 0xc58   :  { %2941 = vmax.xlane.f32.xlu1 %v2940_v9  ;;  %v7344_v9 = vld [vmem:[#allocation2 + $0x70] sm:$0xff] }
 0xc5c   :  { %2944 = vmax.xlane.f32.xlu1 %v2943_v30  ;;  %v7346_v30 = vld [vmem:[#allocation2 + $0x78] sm:$0xff] }
 0xc65   :  { %v2939_v32 = vpop.xlane.xlu0 %2938 }
 0xc66   :  { %v2936_v45 = vpop.xlane.xlu1 %2935  ;;  %v2955_v55 = vsub.f32 %v7255_v37, %v2939_v32 }
 0xc67   :  { %v2954_v46 = vsub.f32 %v2922_v13, %v2936_v45  ;;  %v6480_v45 = vpack.i.bf16 %v7342_v8, %v7340_v44 }
 0xc68   :  { %v2966_v22 = vmul.f32 1.442695, %v2955_v55 }
 0xc69   :  { %v2964_v47 = vmul.f32 1.442695, %v2954_v46  ;;  %v6485_v46 = vpack.i.bf16 %v7346_v30, %v7344_v9 }
 0xc6b   :  { %6558 = vpow2.f32 %v2964_v47 }
 0xc6c   :  { %6560 = vpow2.f32 %v2966_v22  ;;  %v6410_v22 = vpack.i.bf16 %v7245_v51, %v7235_v35 }
 0xc6d   :  { %v2951_v21 = vpop.xlane.xlu1 %2950 }
 0xc6e   :  { %v2948_v29 = vpop.xlane.xlu0 %2947  ;;  %v2959_v23 = vsub.f32 %v7260_v63, %v2951_v21 }
 0xc72   :  { %v2301_v50 = vpop.permute.xlu0 %2300 }
 0xc73   :  { %v2376_v33 = vadd.f32 %v2375_v53, %v2301_v50  ;;  %v2381_v60 = vadd.f32 %v5735_v57, %v2301_v50  ;;  %v2974_v57 = vmul.f32 1.442695, %v2959_v23  ;;  %v2958_v53 = vsub.f32 %v7262_v15, %v2948_v29 }
 0xc75   :  { %v7286_v56 = vpop.eup %6558  ;;  %v7289_v52 = vadd.f32 %v2376_v33, %v6771_v11  ;;  %v7294_v12 = vadd.f32 %v2381_v60, %v6775_v20  ;;  %6562 = vpow2.f32 %v2974_v57  ;;  %v2972_v48 = vmul.f32 1.442695, %v2958_v53 }
 0xc76   :  { %v2982_v7 = vsel %vm628_vm3, %v7286_v56, 0.0  ;;  %v7315_v19 = vpop.eup %6560 }
 0xc77   :  { %2983 = vadd.xlane.f32.xlu0 %v2982_v7  ;;  %v2388_v59 = vsel %vm50_vm0, %v7289_v52, 0.0  ;;  %v2391_v13 = vsel %vm50_vm0, %v7294_v12, 0.0  ;;  %v2396_v14 = vmul.f32 %v7289_v52, %v7289_v52  ;;  %v2397_v16 = vmul.f32 %v7294_v12, %v7294_v12 }
 0xc78   :  { %2389 = vadd.xlane.f32.xlu1 %v2388_v59  ;;  %6564 = vpow2.f32 %v2972_v48  ;;  %v2985_v28 = vsel %vm628_vm3, %v7315_v19, 0.0 }
 0xc79   :  { %v2398_v11 = vsel %vm50_vm0, %v2396_v14, 0.0  ;;  %v2401_v20 = vsel %vm50_vm0, %v2397_v16, 0.0 }
 0xc7c   :  { %2392 = vadd.xlane.f32.xlu1 %v2391_v13 }
 0xc7f   :  { %v7319_v26 = vpop.eup %6562 }
 0xc80   :  { %2399 = vadd.xlane.f32.xlu1 %v2398_v11  ;;  %v2997_v63 = vsel %vm628_vm3, %v7319_v26, 0.0 }
 0xc82   :  { %v7323_v27 = vpop.eup %6564 }
 0xc83   :  { %v2994_v54 = vsel %vm628_vm3, %v7323_v27, 0.0 }
 0xc84   :  { %2402 = vadd.xlane.f32.xlu1 %v2401_v20  ;;  %v6405_v20 = vpack.i.bf16 %v7160_v49, %v7162_v24 }
 0xc8d   :  { %6401 = vrot.lane.b32.xlu0 %v6400_v17, %s6693_s21 }
 0xc95   :  { %6396 = vrot.lane.b32.xlu1 %v6395_v10, %s6693_s21 }
 0xcb9   :  { %2986 = vadd.xlane.f32.xlu1 %v2985_v28 }
 0xcbc   :  { %v2930_v25 = vpop.xlane.xlu1 %2929 }
 0xcbd   :  { %2998 = vadd.xlane.f32.xlu1 %v2997_v63 }
 0xcc0   :  { %v2933_v37 = vpop.xlane.xlu1 %2932 }
 0xcc1   :  { %v2953_v15 = vsub.f32 %v7272_v39, %v2933_v37  ;;  %2995 = vadd.xlane.f32.xlu1 %v2994_v54  ;;  %v2952_v39 = vsub.f32 %v7270_v6, %v2930_v25 }
 0xcc3   :  { %v2962_v31 = vmul.f32 1.442695, %v2953_v15  ;;  %v2960_v38 = vmul.f32 1.442695, %v2952_v39 }
 0xcc5   :  { %6566 = vpow2.f32 %v2962_v31 }
 0xcc6   :  { %6568 = vpow2.f32 %v2960_v38 }
 0xccf   :  { %v7328_v42 = vpop.eup %6566 }
 0xcd0   :  { %v2979_v5 = vsel %vm628_vm3, %v7328_v42, 0.0  ;;  %v7354_v60 = vpop.eup %6568 }
 0xcd1   :  { %2980 = vadd.xlane.f32.xlu0 %v2979_v5  ;;  %v2976_v7 = vsel %vm628_vm3, %v7354_v60, 0.0 }
 0xcd2   :  { %2425 = vrot.lane.b32.xlu1 %v7335_v43, %s6686_s9 }
 0xce5   :  { %v2942_v47 = vpop.xlane.xlu1 %2941 }
 0xce6   :  { %v2956_v32 = vsub.f32 %v7278_v4, %v2942_v47 }
 0xce8   :  { %v2968_v6 = vmul.f32 1.442695, %v2956_v32 }
 0xce9   :  { %v2945_v29 = vpop.xlane.xlu1 %2944 }
 0xcea   :  { %6570 = vpow2.f32 %v2968_v6  ;;  %v2957_v50 = vsub.f32 %v7280_v3, %v2945_v29  ;;  %v6120_v6 = vpack.c.bf16 %v7342_v8, %v7340_v44 }
 0xcec   :  { %v2970_v33 = vmul.f32 1.442695, %v2957_v50 }
 0xcee   :  { %6572 = vpow2.f32 %v2970_v33 }
 0xcf4   :  { %v7358_v59 = vpop.eup %6570 }
 0xcf5   :  { %v2988_v13 = vsel %vm628_vm3, %v7358_v59, 0.0 }
 0xcf6   :  { %2977 = vadd.xlane.f32.xlu1 %v2976_v7 }
 0xcf8   :  { %v7362_v4 = vpop.eup %6572 }
 0xcf9   :  { %v2991_v14 = vsel %vm628_vm3, %v7362_v4, 0.0 }
 0xcfa   :  { %2989 = vadd.xlane.f32.xlu1 %v2988_v13  ;;  %2992 = vadd.xlane.f32.xlu0 %v2991_v14 }
 0xd04   :  { %v2984_v3 = vpop.xlane.xlu0 %2983 }
 0xd05   :  { %6574 = vrcp.f32 %v2984_v3  ;;  %v2390_v11 = vpop.xlane.xlu1 %2389 }
 0xd08   :  { %v6402_v23 = vpop.permute.xlu0 %6401 }
 0xd09   :  { %v2393_v16 = vpop.xlane.xlu1 %2392  ;;  %v6404_v24 = vunpack.i.h.bf16 %v6402_v23  ;;  %v6403_v57 = vunpack.i.l.bf16 %v6402_v23 }
 0xd0a   :  { %v2395_v37 = vmul.f32 0.03125, %v2393_v16 }
 0xd0b   :  { %6406 = vrot.lane.b32.xlu1 %v6405_v20, %s6693_s21  ;;  %v6108_v25 = vpack.c.bf16 %v6404_v24, %v6403_v57 }
 0xd0d   :  { %v2400_v17 = vpop.xlane.xlu1 %2399 }
 0xd0e   :  { %v2404_v35 = vmul.f32 0.03125, %v2400_v17 }
 0xd0f   :  { %v6575_v10 = vpop.eup %6574  ;;  %3637 = vrot.lane.b32.xlu1 %v7108_v2, %s6693_s21 }
 0xd10   :  { %v3010_v55 = vmul.f32 %v6575_v10, %v7286_v56  ;;  %6411 = vrot.lane.b32.xlu0 %v6410_v22, %s6693_s21  ;;  %v2394_v56 = vmul.f32 0.03125, %v2390_v11 }
 0xd11   :  { %v2403_v21 = vpop.xlane.xlu1 %2402 }
 0xd12   :  { %5786 = vmatprep.mubr.msk.f32.mxu1 %vm628_vm3, %v3010_v55  ;;  %v2406_v51 = vmul.f32 %v2394_v56, %v2394_v56  ;;  %v2405_v63 = vmul.f32 0.03125, %v2403_v21  ;;  %v2410_v50 = vsub.f32 %v7289_v52, %v2394_v56  ;;  %v6124_v52 = vpack.c.bf16 %v7346_v30, %v7344_v9 }
 0xd13   :  { %3639 = vrot.lane.b32.xlu1 %v7115_v58, %s6693_s21  ;;  %v2407_v58 = vmul.f32 %v2395_v37, %v2395_v37 }
 0xd14   :  { %v2408_v28 = vsub.f32 %v2404_v35, %v2406_v51 }
 0xd15   :  { %v6397_v49 = vpop.permute.xlu1 %6396  ;;  %v2409_v54 = vsub.f32 %v2405_v63, %v2407_v58 }
 0xd16   :  { %v6399_v53 = vunpack.i.h.bf16 %v6397_v49  ;;  %v6398_v48 = vunpack.i.l.bf16 %v6397_v49  ;;  %v2412_v15 = vadd.f32 1e-12, %v2408_v28 }
 0xd17   :  { %v2413_v39 = vadd.f32 1e-12, %v2409_v54 }
 0xd18   :  { %v6100_v2 = vpack.c.bf16 %v6399_v53, %v6398_v48 }
 0xd1a   :  { %6101 = vmatprep.subr.bf16.mxu1 %v6100_v2 }
 0xd1b   :  { %6103 = vmatpush3.bf16.msra.mxu1 %v6100_v2 }
 0xd1c   :  { %6109 = vmatprep.subr.bf16.mxu1 %v6108_v25 }
 0xd46   :  { %v2987_v31 = vpop.xlane.xlu1 %2986 }
 0xd47   :  { %6576 = vrcp.f32 %v2987_v31 }
 0xd48   :  { %6578 = vrsqrt.f32 %v2412_v15 }
 0xd4a   :  { %v2999_v5 = vpop.xlane.xlu1 %2998 }
 0xd4b   :  { %6580 = vrcp.f32 %v2999_v5 }
 0xd4e   :  { %v2996_v38 = vpop.xlane.xlu1 %2995 }
 0xd4f   :  { %6582 = vrcp.f32 %v2996_v38 }
 0xd50   :  { %6584 = vrsqrt.f32 %v2413_v39 }
 0xd51   :  { %v6577_v47 = vpop.eup %6576 }
 0xd52   :  { %v3011_v32 = vmul.f32 %v6577_v47, %v7315_v19  ;;  %v6579_v29 = vpop.eup %6578  ;;  %v2426_v14 = vpop.permute.xlu1 %2425  ;;  %v2411_v19 = vsub.f32 %v7294_v12, %v2395_v37 }
 0xd53   :  { %v2416_v33 = vmul.f32 %v6579_v29, %v2410_v50 }
 0xd54   :  { %5787 = vmatmul.mubr.msk.f32.vlgmr.msra.gmra.mrb[26].mxu1 %vm628_vm3, %v3011_v32 }
 0xd55   :  { %6111 = vmatpush3.bf16.msra.mxu1 %v6108_v25  ;;  %v6581_v7 = vpop.eup %6580  ;;  %v2422_v11 = vmul.f32 %v7335_v43, %v2416_v33 }
 0xd56   :  { %6121 = vmatprep.subr.bf16.mxu1 %v6120_v6  ;;  %v3015_v20 = vmul.f32 %v6581_v7, %v7319_v26 }
 0xd57   :  { %v7389_v17 = vadd.f32 %v2426_v14, %v2422_v11 }
 0xd59   :  { %v6583_v13 = vpop.eup %6582 }
 0xd5a   :  { %v6585_v3 = vpop.eup %6584  ;;  %v3014_v16 = vmul.f32 %v6583_v13, %v7323_v27 }
 0xd5b   :  { %v2417_v10 = vmul.f32 %v6585_v3, %v2411_v19 }
 0xd5c   :  { %5800 = vmatprep.mubr.msk.f32.mxu1 %vm628_vm3, %v3014_v16 }
 0xd5d   :  { %5801 = vmatmul.mubr.msk.f32.vlgmr.msra.gmra.mrb[28].mxu1 %vm628_vm3, %v3015_v20  ;;  %v2423_v27 = vmul.f32 %v7335_v43, %v2417_v10 }
 0xd5e   :  { %6123 = vmatpush3.bf16.msra.mxu1 %v6120_v6  ;;  %5822 = vmatprep.mubr.msk.f32.mxu1 %vm50_vm0, %v7389_v17  ;;  %v2981_v26 = vpop.xlane.xlu0 %2980 }
 0xd5f   :  { %6125 = vmatprep.subr.bf16.mxu1 %v6124_v52  ;;  %v7396_v12 = vadd.f32 %v2426_v14, %v2423_v27 }
 0xd62   :  { %6127 = vmatpush3.bf16.msra.mxu1 %v6124_v52 }
 0xd65   :  { %5823 = vmatmul.mubr.msk.f32.vlgmr.msra.gmra.mrb[30].mxu1 %vm50_vm0, %v7396_v12 }
 0xd83   :  { %v2978_v55 = vpop.xlane.xlu1 %2977 }
 0xd84   :  { %6586 = vrcp.f32 %v2978_v55 }
 0xd85   :  { %6588 = vrcp.f32 %v2981_v26 }
 0xd87   :  { %v2990_v21 = vpop.xlane.xlu1 %2989  ;;  %v2993_v22 = vpop.xlane.xlu0 %2992 }
 0xd88   :  { %6590 = vrcp.f32 %v2990_v21 }
 0xd89   :  { %6592 = vrcp.f32 %v2993_v22 }
 0xd8b   :  { %v6407_v23 = vpop.permute.xlu1 %6406  ;;  %v6412_v48 = vpop.permute.xlu0 %6411 }
 0xd8c   :  { %v6409_v49 = vunpack.i.h.bf16 %v6407_v23  ;;  %v6408_v24 = vunpack.i.l.bf16 %v6407_v23  ;;  %v6414_v25 = vunpack.i.h.bf16 %v6412_v48  ;;  %v6413_v56 = vunpack.i.l.bf16 %v6412_v48 }
 0xd8e   :  { %v6587_v57 = vpop.eup %6586  ;;  %v6096_v53 = vpack.c.bf16 %v6409_v49, %v6408_v24  ;;  %v6104_v28 = vpack.c.bf16 %v6414_v25, %v6413_v56 }
 0xd8f   :  { %v6589_v43 = vpop.eup %6588  ;;  %v3008_v2 = vmul.f32 %v6587_v57, %v7354_v60  ;;  %v3638_v5 = vpop.permute.xlu1 %3637 }
 0xd90   :  { %6097 = vmatprep.subr.bf16.mxu0 %v6096_v53  ;;  %v3009_v51 = vmul.f32 %v6589_v43, %v7328_v42  ;;  %v7411_v42 = vld [vmem:[%s7755_s2 + $0x6] ss:$0 sm:$0xff] }
 0xd91   :  { %6099 = vmatpush3.bf16.msra.mxu0 %v6096_v53  ;;  %5779 = vmatprep.mubr.msk.f32.mxu0 %vm628_vm3, %v3008_v2 }
 0xd92   :  { %v6591_v35 = vpop.eup %6590  ;;  %6105 = vmatprep.subr.bf16.mxu0 %v6104_v28 }
 0xd93   :  { %v3012_v37 = vmul.f32 %v6591_v35, %v7358_v59  ;;  %v6593_v63 = vpop.eup %6592  ;;  %v3640_v39 = vpop.permute.xlu1 %3639 }
 0xd94   :  { %5780 = vmatmul.mubr.msk.f32.vlgmr.msra.gmra.mrb[28].mxu0 %vm628_vm3, %v3009_v51  ;;  %v3013_v60 = vmul.f32 %v6593_v63, %v7362_v4 }
 0xd95   :  { %6107 = vmatpush3.bf16.msra.mxu0 %v6104_v28  ;;  %5793 = vmatprep.mubr.msk.f32.mxu0 %vm628_vm3, %v3012_v37 }
 0xd98   :  { %5794 = vmatmul.mubr.msk.f32.vlgmr.msra.gmra.mrb[30].mxu0 %vm628_vm3, %v3013_v60 }
 0xe27   :  { %v5788_v15 = vpop.f32.mrb[26].mxu1 }
 0xe28   :  { %v3181_v58 = vpop.f32.mrb[27].mxu1 }
 0xe30   :  { %v5802_v31 = vpop.f32.mrb[28].mxu1 }
 0xe31   :  { %v3355_v54 = vpop.f32.mrb[29].mxu1 }
 0xe38   :  { %v5824_v59 = vpop.f32.mrb[30].mxu1 }
 0xe39   :  { %v7414_v38 = vadd.f32 %v5824_v59, %v7411_v42  ;;  %v3626_v47 = vpop.f32.mrb[31].mxu1 }
 0xe3a   :  { %v7417_v4 = vadd.f32 %v7411_v42, %v3626_v47 }
 0xe3b   :  { %v3644_v32 = vadd.f32 %v3640_v39, %v7414_v38 }
 0xe3c   :  { %v3643_v6 = vadd.f32 %v3638_v5, %v7417_v4 }
 0xe3e   :  { %v6420_v29 = vpack.i.bf16 %v3644_v32, %v3643_v6 }
 0xe40   :  { %6421 = vrot.lane.b32.xlu0 %v6420_v29, %s6687_s16  ;;  %6416 = vrot.lane.b32.xlu1 %v6420_v29, %s6688_s17 }
 0xe44   :  { %6431 = vrot.lane.b32.xlu0 %v6430_v41, %s6690_s23  ;;  %6426 = vrot.lane.b32.xlu1 %v6420_v29, %s6689_s18 }
 0xe48   :  { %3366 = vrot.lane.b32.xlu0 %v3181_v58, %s6685_s29  ;;  %6436 = vrot.lane.b32.xlu1 %v6435_v1, %s6690_s23 }
 0xe4c   :  { %3368 = vrot.lane.b32.xlu1 %v5788_v15, %s6685_s29 }
 0xe50   :  { %3382 = vrot.lane.b32.xlu1 %v3355_v54, %s6692_s25 }
 0xe54   :  { %6441 = vrot.lane.b32.xlu1 %v6420_v29, %s6686_s9 }
 0xe58   :  { %3384 = vrot.lane.b32.xlu1 %v5802_v31, %s6692_s25 }
 0xe67   :  { %v5781_v50 = vpop.f32.mrb[28].mxu0 }
 0xe68   :  { %v3094_v62 = vpop.f32.mrb[29].mxu0 }
 0xe6b   :  { %v5795_v0 = vpop.f32.mrb[30].mxu0 }
 0xe6c   :  { %v3268_v41 = vpop.f32.mrb[31].mxu0 }
 0xe6d   :  { %3374 = vrot.lane.b32.xlu0 %v3268_v41, %s6691_s24 }
 0xe71   :  { %3376 = vrot.lane.b32.xlu0 %v5795_v0, %s6691_s24 }
 0xeb2   :  { %v6422_v33 = vpop.permute.xlu0 %6421  ;;  %v6417_v7 = vpop.permute.xlu1 %6416 }
 0xeb3   :  { %6446 = vrot.lane.b32.xlu0 %v6417_v7, %s6686_s9  ;;  %v5306_v7 = vld [vmem:[%s7756_s3 + $0x30] sm:$0xff] }
 0xeb6   :  { %v6432_v61 = vpop.permute.xlu0 %6431  ;;  %v6427_v40 = vpop.permute.xlu1 %6426 }
 0xeb7   :  { %v6434_v1 = vunpack.i.h.bf16 %v6432_v61  ;;  %v6433_v13 = vunpack.i.l.bf16 %v6432_v61  ;;  %6456 = vrot.lane.b32.xlu1 %v6427_v40, %s6686_s9  ;;  %6451 = vrot.lane.b32.xlu0 %v6422_v33, %s6686_s9 }
 0xeb9   :  { %v6112_v14 = vpack.c.bf16 %v6434_v1, %v6433_v13 }
 0xeba   :  { %v6437_v3 = vpop.permute.xlu1 %6436  ;;  %v3367_v21 = vpop.permute.xlu0 %3366 }
 0xebb   :  { %v6439_v11 = vunpack.i.h.bf16 %v6437_v3  ;;  %v6438_v16 = vunpack.i.l.bf16 %v6437_v3  ;;  %6113 = vmatprep.subr.bf16.mxu0 %v6112_v14  ;;  %3649 = vrot.lane.b32.xlu1 %v7414_v38, %s6688_s17  ;;  %v3388_v22 = vsel %vm279_vm1, %v3094_v62, %v3367_v21 }
 0xebc   :  { %6115 = vmatpush3.bf16.msra.mxu0 %v6112_v14  ;;  %3647 = vrot.lane.b32.xlu0 %v7417_v4, %s6688_s17 }
 0xebd   :  { %v6116_v19 = vpack.c.bf16 %v6439_v11, %v6438_v16 }
 0xebe   :  { %v3369_v20 = vpop.permute.xlu1 %3368 }
 0xebf   :  { %6117 = vmatprep.subr.bf16.mxu0 %v6116_v19  ;;  %3653 = vrot.lane.b32.xlu1 %v7414_v38, %s6687_s16  ;;  %v3389_v57 = vsel %vm279_vm1, %v5781_v50, %v3369_v20 }
 0xec0   :  { %6119 = vmatpush3.bf16.msra.mxu0 %v6116_v19  ;;  %3651 = vrot.lane.b32.xlu0 %v7417_v4, %s6687_s16 }
 0xec2   :  { %v3383_v52 = vpop.permute.xlu1 %3382 }
 0xec3   :  { %3657 = vrot.lane.b32.xlu1 %v7414_v38, %s6689_s18 }
 0xec4   :  { %3655 = vrot.lane.b32.xlu0 %v7417_v4, %s6689_s18 }
 0xec6   :  { %v6442_v10 = vpop.permute.xlu1 %6441 }
 0xec7   :  { %v6444_v27 = vunpack.i.h.bf16 %v6442_v10  ;;  %v6443_v26 = vunpack.i.l.bf16 %v6442_v10 }
 0xec9   :  { %v6128_v55 = vpack.c.bf16 %v6444_v27, %v6443_v26 }
 0xeca   :  { %v3385_v43 = vpop.permute.xlu1 %3384 }
 0xecb   :  { %6130 = vmatprep.subr.msk.bf16.mxu0 %vm6797_vm2, %v6128_v55 }
 0xedf   :  { %v3375_v23 = vpop.permute.xlu0 %3374 }
 0xee0   :  { %v3390_v49 = vsel %vm628_vm3, %v3388_v22, %v3375_v23 }
 0xee1   :  { %v3392_v24 = vsel %vm1093_vm4, %v3390_v49, %v3383_v52 }
 0xee2   :  { %5811 = vmatprep.mubr.msk.f32.mxu0 %vm50_vm0, %v3392_v24 }
 0xee3   :  { %v3377_v53 = vpop.permute.xlu0 %3376 }
 0xee4   :  { %v3391_v48 = vsel %vm628_vm3, %v3389_v57, %v3377_v53 }
 0xee5   :  { %v3393_v2 = vsel %vm1093_vm4, %v3391_v48, %v3385_v43 }
 0xee6   :  { %5812 = vmatmul.mubr.msk.f32.vlgmr.msra.gmra.mrb[32].mxu0 %vm50_vm0, %v3393_v2 }
 0xee7   :  { %6133 = vmatpush3.bf16.xpose.msk.msra.mxu0 %vm6797_vm2, %v6128_v55  ;;  %5829 = vmatprep.mubr.msk.f32.mxu0 %vm279_vm1, %v7417_v4 }
 0xeee   :  { %5830 = vmatmul.mubr.msk.f32.vlgmr.msra.gmra.mrb[34].mxu0 %vm279_vm1, %v7414_v38 }
 0xf25   :  { %v6447_v25 = vpop.permute.xlu0 %6446 }
 0xf26   :  { %v6449_v56 = vunpack.i.h.bf16 %v6447_v25  ;;  %v6448_v35 = vunpack.i.l.bf16 %v6447_v25 }
 0xf28   :  { %v6134_v51 = vpack.c.bf16 %v6449_v56, %v6448_v35 }
 0xf29   :  { %v6457_v28 = vpop.permute.xlu1 %6456  ;;  %v6452_v37 = vpop.permute.xlu0 %6451 }
 0xf2a   :  { %v6459_v63 = vunpack.i.h.bf16 %v6457_v28  ;;  %v6458_v60 = vunpack.i.l.bf16 %v6457_v28  ;;  %v6454_v15 = vunpack.i.h.bf16 %v6452_v37  ;;  %v6453_v58 = vunpack.i.l.bf16 %v6452_v37  ;;  %6136 = vmatprep.subr.msk.bf16.mxu1 %vm6797_vm2, %v6134_v51 }
 0xf2b   :  { %6139 = vmatpush3.bf16.xpose.msk.msra.mxu1 %vm6797_vm2, %v6134_v51 }
 0xf2c   :  { %v6146_v31 = vpack.c.bf16 %v6459_v63, %v6458_v60  ;;  %v6140_v54 = vpack.c.bf16 %v6454_v15, %v6453_v58 }
 0xf2d   :  { %v7474_v5 = vpop.permute.xlu1 %3649 }
 0xf2e   :  { %v7476_v59 = vpop.permute.xlu0 %3647  ;;  %6142 = vmatprep.subr.msk.bf16.mxu0 %vm6797_vm2, %v6140_v54  ;;  %6148 = vmatprep.subr.msk.bf16.mxu1 %vm6797_vm2, %v6146_v31 }
 0xf2f   :  { %v6465_v39 = vpack.i.bf16 %v7474_v5, %v7476_v59  ;;  %5836 = vmatprep.mubr.msk.f32.mxu1 %vm279_vm1, %v7476_v59  ;;  %6145 = vmatpush3.bf16.xpose.msk.msra.mxu0 %vm6797_vm2, %v6140_v54 }
 0xf31   :  { %v7488_v47 = vpop.permute.xlu1 %3653 }
 0xf32   :  { %v7490_v32 = vpop.permute.xlu0 %3651  ;;  %5837 = vmatmul.mubr.msk.f32.vlgmr.msra.gmra.mrb[32].mxu1 %vm279_vm1, %v7474_v5 }
 0xf33   :  { %v6470_v6 = vpack.i.bf16 %v7488_v47, %v7490_v32  ;;  %5843 = vmatprep.mubr.msk.f32.mxu0 %vm279_vm1, %v7490_v32  ;;  %6151 = vmatpush3.bf16.xpose.msk.msra.mxu1 %vm6797_vm2, %v6146_v31 }
 0xf35   :  { %v7506_v50 = vpop.permute.xlu1 %3657 }
 0xf36   :  { %v7500_v29 = vpop.permute.xlu0 %3655  ;;  %5844 = vmatmul.mubr.msk.f32.vlgmr.msra.gmra.mrb[36].mxu0 %vm279_vm1, %v7488_v47 }
 0xf37   :  { %5850 = vmatprep.mubr.msk.f32.mxu1 %vm279_vm1, %v7500_v29 }
 0xf3a   :  { %5851 = vmatmul.mubr.msk.f32.vlgmr.msra.gmra.mrb[34].mxu1 %vm279_vm1, %v7506_v50 }
 0xfb9   :  { %v7510_v62 = vpop.f32.mrb[32].mxu0 }
 0xfba   :  { %v7512_v0 = vpop.f32.mrb[33].mxu0 }
 0xfc1   :  { %v5831_v41 = vpop.f32.mrb[34].mxu0 }
 0xfc2   :  { %v4022_v33 = vmul.f32 0.35355338, %v5831_v41  ;;  %v3751_v61 = vpop.f32.mrb[35].mxu0 }
 0xfc3   :  { %v4021_v40 = vmul.f32 0.35355338, %v3751_v61 }
 0xfc4   :  { %v4030_v1 = vadd.f32 %v5307_v36, %v4022_v33 }
 0xfc5   :  { %v4029_v13 = vadd.f32 %v5306_v7, %v4021_v40 }
 0xfc6   :  { %v4040_v14 = vsel %vm628_vm3, %v4030_v1, -inf }
 0xfc7   :  { %4041 = vmax.xlane.f32.xlu1 %v4040_v14  ;;  %v4037_v3 = vsel %vm628_vm3, %v4029_v13, -inf }
 0xfc8   :  { %4038 = vmax.xlane.f32.xlu0 %v4037_v3 }
0x1005   :  { %v5838_v11 = vpop.f32.mrb[32].mxu1 }
0x1006   :  { %v4024_v16 = vmul.f32 0.35355338, %v5838_v11  ;;  %v3838_v19 = vpop.f32.mrb[33].mxu1 }
0x1007   :  { %v4023_v20 = vmul.f32 0.35355338, %v3838_v19 }
0x1008   :  { %v4032_v52 = vadd.f32 %v5307_v36, %v4024_v16 }
0x1009   :  { %v5845_v10 = vpop.f32.mrb[36].mxu0  ;;  %v4031_v27 = vadd.f32 %v5306_v7, %v4023_v20 }
0x100a   :  { %v4026_v26 = vmul.f32 0.35355338, %v5845_v10  ;;  %v3925_v55 = vpop.f32.mrb[37].mxu0  ;;  %v4046_v21 = vsel %vm628_vm3, %v4032_v52, -inf }
0x100b   :  { %v4025_v22 = vmul.f32 0.35355338, %v3925_v55  ;;  %4047 = vmax.xlane.f32.xlu0 %v4046_v21  ;;  %v4043_v48 = vsel %vm628_vm3, %v4031_v27, -inf }
0x100c   :  { %v4034_v23 = vadd.f32 %v5307_v36, %v4026_v26 }
0x100d   :  { %v5852_v49 = vpop.f32.mrb[34].mxu1  ;;  %v4033_v24 = vadd.f32 %v5306_v7, %v4025_v22 }
0x100e   :  { %v4028_v57 = vmul.f32 0.35355338, %v5852_v49  ;;  %v4012_v53 = vpop.f32.mrb[35].mxu1  ;;  %v4052_v43 = vsel %vm628_vm3, %v4034_v23, -inf }
0x100f   :  { %v4027_v2 = vmul.f32 0.35355338, %v4012_v53  ;;  %4053 = vmax.xlane.f32.xlu1 %v4052_v43  ;;  %4044 = vmax.xlane.f32.xlu0 %v4043_v48  ;;  %v4049_v35 = vsel %vm628_vm3, %v4033_v24, -inf }
0x1010   :  { %v4036_v25 = vadd.f32 %v5307_v36, %v4028_v57 }
0x1011   :  { %v4035_v56 = vadd.f32 %v5306_v7, %v4027_v2 }
0x1012   :  { %v4058_v51 = vsel %vm628_vm3, %v4036_v25, -inf }
0x1013   :  { %4050 = vmax.xlane.f32.xlu0 %v4049_v35  ;;  %4059 = vmax.xlane.f32.xlu1 %v4058_v51  ;;  %v4055_v28 = vsel %vm628_vm3, %v4035_v56, -inf }
0x1017   :  { %4056 = vmax.xlane.f32.xlu0 %v4055_v28  ;;  %v6475_v28 = vpack.i.bf16 %v7506_v50, %v7500_v29 }
0x1054   :  { %v4042_v37 = vpop.xlane.xlu1 %4041 }
0x1055   :  { %v4062_v63 = vsub.f32 %v4030_v1, %v4042_v37  ;;  %v4039_v60 = vpop.xlane.xlu0 %4038  ;;  %v6460_v37 = vpack.i.bf16 %v7414_v38, %v7417_v4 }
0x1056   :  { %v4061_v15 = vsub.f32 %v4029_v13, %v4039_v60 }
0x1057   :  { %v4071_v58 = vmul.f32 1.442695, %v4062_v63 }
0x1058   :  { %v4069_v31 = vmul.f32 1.442695, %v4061_v15 }
0x1059   :  { %6594 = vpow2.f32 %v4071_v58 }
0x105a   :  { %6596 = vpow2.f32 %v4069_v31 }
0x1063   :  { %v7528_v54 = vpop.eup %6594 }
0x1064   :  { %v6597_v36 = vpop.eup %6596  ;;  %v4088_v41 = vsel %vm628_vm3, %v7528_v54, 0.0 }
0x1065   :  { %4089 = vadd.xlane.f32.xlu1 %v4088_v41  ;;  %v4085_v33 = vsel %vm628_vm3, %v6597_v36, 0.0 }
0x1066   :  { %4086 = vadd.xlane.f32.xlu0 %v4085_v33 }
0x1098   :  { %v4048_v7 = vpop.xlane.xlu0 %4047 }
0x1099   :  { %v4064_v61 = vsub.f32 %v4032_v52, %v4048_v7 }
0x109b   :  { %v4075_v40 = vmul.f32 1.442695, %v4064_v61 }
0x109c   :  { %v4054_v1 = vpop.xlane.xlu1 %4053  ;;  %v4045_v14 = vpop.xlane.xlu0 %4044 }
0x109d   :  { %6598 = vpow2.f32 %v4075_v40  ;;  %v4066_v13 = vsub.f32 %v4034_v23, %v4054_v1  ;;  %v4063_v3 = vsub.f32 %v4031_v27, %v4045_v14 }
0x109f   :  { %v4079_v11 = vmul.f32 1.442695, %v4066_v13  ;;  %v4073_v16 = vmul.f32 1.442695, %v4063_v3 }
0x10a0   :  { %v4051_v19 = vpop.xlane.xlu0 %4050  ;;  %v4060_v20 = vpop.xlane.xlu1 %4059 }
0x10a1   :  { %6600 = vpow2.f32 %v4079_v11  ;;  %v4065_v10 = vsub.f32 %v4033_v24, %v4051_v19  ;;  %v4068_v26 = vsub.f32 %v4036_v25, %v4060_v20 }
0x10a2   :  { %6602 = vpow2.f32 %v4073_v16 }
0x10a3   :  { %v4077_v55 = vmul.f32 1.442695, %v4065_v10  ;;  %v4083_v21 = vmul.f32 1.442695, %v4068_v26 }
0x10a4   :  { %v4057_v22 = vpop.xlane.xlu0 %4056 }
0x10a5   :  { %6604 = vpow2.f32 %v4077_v55  ;;  %v4067_v49 = vsub.f32 %v4035_v56, %v4057_v22 }
0x10a6   :  { %6606 = vpow2.f32 %v4083_v21 }
0x10a7   :  { %v7533_v52 = vpop.eup %6598  ;;  %v4081_v57 = vmul.f32 1.442695, %v4067_v49 }
0x10a8   :  { %v4094_v27 = vsel %vm628_vm3, %v7533_v52, 0.0 }
0x10a9   :  { %6608 = vpow2.f32 %v4081_v57  ;;  %4095 = vadd.xlane.f32.xlu1 %v4094_v27 }
0x10ab   :  { %v7537_v23 = vpop.eup %6600 }
0x10ac   :  { %v6603_v53 = vpop.eup %6602  ;;  %v4100_v24 = vsel %vm628_vm3, %v7537_v23, 0.0 }
0x10ad   :  { %4101 = vadd.xlane.f32.xlu1 %v4100_v24  ;;  %v4091_v43 = vsel %vm628_vm3, %v6603_v53, 0.0 }
0x10ae   :  { %4092 = vadd.xlane.f32.xlu0 %v4091_v43 }
0x10af   :  { %v7542_v48 = vpop.eup %6604 }
0x10b0   :  { %v7544_v2 = vpop.eup %6606  ;;  %v4097_v25 = vsel %vm628_vm3, %v7542_v48, 0.0 }
0x10b1   :  { %v4106_v56 = vsel %vm628_vm3, %v7544_v2, 0.0 }
0x10b2   :  { %4107 = vadd.xlane.f32.xlu1 %v4106_v56  ;;  %4098 = vadd.xlane.f32.xlu0 %v4097_v25 }
0x10b3   :  { %v7550_v35 = vpop.eup %6608 }
0x10b4   :  { %v4103_v51 = vsel %vm628_vm3, %v7550_v35, 0.0 }
0x10b6   :  { %4104 = vadd.xlane.f32.xlu0 %v4103_v51 }
0x10c3   :  { %6466 = vrot.lane.b32.xlu1 %v6465_v39, %s6693_s21 }
0x10c7   :  { %6471 = vrot.lane.b32.xlu1 %v6470_v6, %s6693_s21 }
0x10cb   :  { %6476 = vrot.lane.b32.xlu1 %v6475_v28, %s6693_s21 }
0x10cc   :  { %6461 = vrot.lane.b32.xlu0 %v6460_v37, %s6693_s21  ;;  %v6658_v37 = vld [vmem:[%s7755_s2 + $0x4] ss:$0 sm:$0xff] }
0x10cf   :  { %6486 = vrot.lane.b32.xlu1 %v6485_v46, %s6690_s23 }
0x10d0   :  { %6481 = vrot.lane.b32.xlu0 %v6480_v45, %s6690_s23 }
0x10f2   :  { %v4090_v38 = vpop.xlane.xlu1 %4089 }
0x10f3   :  { %v4087_v5 = vpop.xlane.xlu0 %4086 }
0x10f4   :  { %6610 = vrcp.f32 %v4087_v5 }
0x10fe   :  { %v6611_v59 = vpop.eup %6610 }
0x10ff   :  { %v4117_v39 = vmul.f32 %v6611_v59, %v6597_v36 }
0x1101   :  { %5857 = vmatprep.mubr.msk.f32.mxu0 %vm628_vm3, %v4117_v39 }
0x1136   :  { %v4096_v4 = vpop.xlane.xlu1 %4095 }
0x113a   :  { %v4102_v47 = vpop.xlane.xlu1 %4101 }
0x113b   :  { %v4093_v32 = vpop.xlane.xlu0 %4092 }
0x113c   :  { %6612 = vrcp.f32 %v4093_v32 }
0x113d   :  { %6614 = vrcp.f32 %v4096_v4 }
0x113e   :  { %6616 = vrcp.f32 %v4090_v38 }
0x113f   :  { %v4108_v6 = vpop.xlane.xlu1 %4107  ;;  %v4099_v9 = vpop.xlane.xlu0 %4098 }
0x1140   :  { %6618 = vrcp.f32 %v4099_v9 }
0x1143   :  { %v6467_v30 = vpop.permute.xlu1 %6466  ;;  %v4105_v46 = vpop.xlane.xlu0 %4104 }
0x1144   :  { %v6469_v44 = vunpack.i.h.bf16 %v6467_v30  ;;  %v6468_v8 = vunpack.i.l.bf16 %v6467_v30  ;;  %6620 = vrcp.f32 %v4105_v46 }
0x1145   :  { %6622 = vrcp.f32 %v4102_v47 }
0x1146   :  { %v6613_v45 = vpop.eup %6612  ;;  %6624 = vrcp.f32 %v4108_v6  ;;  %v6156_v29 = vpack.c.bf16 %v6469_v44, %v6468_v8 }
0x1147   :  { %v6615_v50 = vpop.eup %6614  ;;  %v6472_v63 = vpop.permute.xlu1 %6471  ;;  %v4119_v15 = vmul.f32 %v6613_v45, %v6603_v53 }
0x1148   :  { %v6462_v60 = vpop.permute.xlu0 %6461  ;;  %v6474_v58 = vunpack.i.h.bf16 %v6472_v63  ;;  %v6473_v31 = vunpack.i.l.bf16 %v6472_v63  ;;  %6157 = vmatprep.subr.bf16.mxu1 %v6156_v29  ;;  %v4120_v33 = vmul.f32 %v6615_v50, %v7533_v52  ;;  %v6617_v61 = vpop.eup %6616 }
0x1149   :  { %v6464_v36 = vunpack.i.h.bf16 %v6462_v60  ;;  %v6463_v41 = vunpack.i.l.bf16 %v6462_v60  ;;  %6159 = vmatpush3.bf16.msra.mxu1 %v6156_v29  ;;  %5864 = vmatprep.mubr.msk.f32.mxu1 %vm628_vm3, %v4119_v15  ;;  %v4118_v16 = vmul.f32 %v6617_v61, %v7528_v54 }
0x114a   :  { %v6619_v1 = vpop.eup %6618  ;;  %v6160_v14 = vpack.c.bf16 %v6474_v58, %v6473_v31 }
0x114b   :  { %v6152_v7 = vpack.c.bf16 %v6464_v36, %v6463_v41  ;;  %v6477_v40 = vpop.permute.xlu1 %6476  ;;  %v4121_v10 = vmul.f32 %v6619_v1, %v7542_v48 }
0x114c   :  { %v6479_v13 = vunpack.i.h.bf16 %v6477_v40  ;;  %v6478_v3 = vunpack.i.l.bf16 %v6477_v40  ;;  %5865 = vmatmul.mubr.msk.f32.vlgmr.msra.gmra.mrb[36].mxu1 %vm628_vm3, %v4120_v33  ;;  %v6482_v49 = vpop.permute.xlu0 %6481 }
0x114d   :  { %6153 = vmatprep.subr.bf16.mxu0 %v6152_v7  ;;  %v6484_v27 = vunpack.i.h.bf16 %v6482_v49  ;;  %v6483_v53 = vunpack.i.l.bf16 %v6482_v49 }
0x114e   :  { %6155 = vmatpush3.bf16.msra.mxu0 %v6152_v7  ;;  %v6621_v11 = vpop.eup %6620  ;;  %v6164_v19 = vpack.c.bf16 %v6479_v13, %v6478_v3  ;;  %v4648_v13 = vld [vmem:[#allocation2 + $0x80] sm:$0xff]  ;;  %v4649_v3 = vld [vmem:[#allocation2 + $0x88] sm:$0xff] }
0x114f   :  { %6161 = vmatprep.subr.bf16.mxu0 %v6160_v14  ;;  %v6623_v20 = vpop.eup %6622  ;;  %v4123_v26 = vmul.f32 %v6621_v11, %v7550_v35  ;;  %v6487_v22 = vpop.permute.xlu1 %6486  ;;  %v6168_v43 = vpack.c.bf16 %v6484_v27, %v6483_v53  ;;  %v6176_v11 = vpack.c.bf16 %v4649_v3, %v4648_v13 }
0x1150   :  { %v6625_v55 = vpop.eup %6624  ;;  %6165 = vmatprep.subr.bf16.mxu1 %v6164_v19  ;;  %v4122_v21 = vmul.f32 %v6623_v20, %v7537_v23  ;;  %v6489_v52 = vunpack.i.h.bf16 %v6487_v22  ;;  %v6488_v57 = vunpack.i.l.bf16 %v6487_v22  ;;  %v4651_v20 = vld [vmem:[#allocation2 + $0x98] sm:$0xff] }
0x1151   :  { %5858 = vmatmul.mubr.msk.f32.vlgmr.msra.gmra.mrb[38].mxu0 %vm628_vm3, %v4118_v16  ;;  %6167 = vmatpush3.bf16.msra.mxu1 %v6164_v19  ;;  %v4124_v54 = vmul.f32 %v6625_v55, %v7544_v2  ;;  %v7647_v16 = vld [vmem:[%s7755_s2 + $0x7] ss:$0 sm:$0xff]  ;;  %v4650_v19 = vld [vmem:[#allocation2 + $0x90] sm:$0xff] }
0x1152   :  { %6163 = vmatpush3.bf16.msra.mxu0 %v6160_v14  ;;  %5871 = vmatprep.mubr.msk.f32.mxu0 %vm628_vm3, %v4121_v10  ;;  %v6172_v24 = vpack.c.bf16 %v6489_v52, %v6488_v57  ;;  %v6180_v10 = vpack.c.bf16 %v4651_v20, %v4650_v19  ;;  %v4919_v55 = vld [vmem:[#allocation2 + $0xc0] sm:$0xff]  ;;  %v4654_v19 = vld [vmem:[#allocation2 + $0xb0] sm:$0xff]  ;;  %v4655_v20 = vld [vmem:[#allocation2 + $0xb8] sm:$0xff] }
0x1153   :  { %5878 = vmatprep.mubr.msk.f32.mxu1 %vm628_vm3, %v4123_v26  ;;  %6169 = vmatprep.subr.bf16.mxu0 %v6168_v43  ;;  %v5305_v26 = vld [vmem:[%s7755_s2 + $0x5] ss:$0 sm:$0xff] }
0x1154   :  { %5879 = vmatmul.mubr.msk.f32.vlgmr.msra.gmra.mrb[38].mxu1 %vm628_vm3, %v4124_v54  ;;  %6177 = vmatprep.subr.bf16.mxu1 %v6176_v11 }
0x1155   :  { %5872 = vmatmul.mubr.msk.f32.vlgmr.msra.gmra.mrb[40].mxu0 %vm628_vm3, %v4122_v21  ;;  %6179 = vmatpush3.bf16.msra.mxu1 %v6176_v11  ;;  %v4920_v21 = vld [vmem:[#allocation2 + $0xc8] sm:$0xff] }
0x1156   :  { %6171 = vmatpush3.bf16.msra.mxu0 %v6168_v43  ;;  %6181 = vmatprep.subr.bf16.mxu1 %v6180_v10  ;;  %v6192_v54 = vpack.c.bf16 %v4920_v21, %v4919_v55  ;;  %v4925_v21 = vld [vmem:[#allocation2 + $0xf0] sm:$0xff] }
0x1157   :  { %6173 = vmatprep.subr.bf16.mxu0 %v6172_v24 }
0x1159   :  { %6183 = vmatpush3.bf16.msra.mxu1 %v6180_v10  ;;  %v6188_v10 = vpack.c.bf16 %v4655_v20, %v4654_v19 }
0x115a   :  { %6175 = vmatpush3.bf16.msra.mxu0 %v6172_v24  ;;  %6193 = vmatprep.subr.bf16.mxu1 %v6192_v54 }
0x121f   :  { %v5866_v23 = vpop.f32.mrb[36].mxu1 }
0x1220   :  { %4477 = vrot.lane.b32.xlu1 %v5866_v23, %s6685_s29  ;;  %v4290_v48 = vpop.f32.mrb[37].mxu1 }
0x1221   :  { %4475 = vrot.lane.b32.xlu0 %v4290_v48, %s6685_s29 }
0x1224   :  { %v5859_v2 = vpop.f32.mrb[38].mxu0 }
0x1225   :  { %v4203_v25 = vpop.f32.mrb[39].mxu0 }
0x1227   :  { %v5880_v35 = vpop.f32.mrb[38].mxu1 }
0x1228   :  { %v5873_v56 = vpop.f32.mrb[40].mxu0  ;;  %v4464_v28 = vpop.f32.mrb[39].mxu1 }
0x1229   :  { %4485 = vrot.lane.b32.xlu1 %v5873_v56, %s6691_s24  ;;  %v4377_v51 = vpop.f32.mrb[41].mxu0 }
0x122a   :  { %4483 = vrot.lane.b32.xlu0 %v4377_v51, %s6691_s24 }
0x122d   :  { %4493 = vrot.lane.b32.xlu1 %v5880_v35, %s6692_s25 }
0x122e   :  { %4491 = vrot.lane.b32.xlu0 %v4464_v28, %s6692_s25 }
0x1231   :  { %4520 = vrot.lane.b32.xlu1 %v7411_v42, %s6690_s23 }
0x1232   :  { %3411 = vrot.lane.b32.xlu0 %v6658_v37, %s6690_s23 }
0x1292   :  { %v4478_v5 = vpop.permute.xlu1 %4477 }
0x1293   :  { %v4476_v59 = vpop.permute.xlu0 %4475  ;;  %v4498_v32 = vsel %vm279_vm1, %v5859_v2, %v4478_v5 }
0x1294   :  { %v4497_v4 = vsel %vm279_vm1, %v4203_v25, %v4476_v59 }
0x129b   :  { %v4486_v39 = vpop.permute.xlu1 %4485 }
0x129c   :  { %v4484_v38 = vpop.permute.xlu0 %4483  ;;  %v4500_v42 = vsel %vm628_vm3, %v4498_v32, %v4486_v39 }
0x129d   :  { %v4499_v6 = vsel %vm628_vm3, %v4497_v4, %v4484_v38 }
0x129f   :  { %v4494_v47 = vpop.permute.xlu1 %4493 }
0x12a0   :  { %v4492_v9 = vpop.permute.xlu0 %4491  ;;  %v4502_v46 = vsel %vm1093_vm4, %v4500_v42, %v4494_v47 }
0x12a1   :  { %v4501_v30 = vsel %vm1093_vm4, %v4499_v6, %v4492_v9 }
0x12a2   :  { %5889 = vmatprep.mubr.msk.f32.mxu0 %vm50_vm0, %v4501_v30 }
0x12a3   :  { %5890 = vmatmul.mubr.msk.f32.vlgmr.msra.gmra.mrb[42].mxu0 %vm50_vm0, %v4502_v46 }
0x12a4   :  { %v3412_v44 = vpop.permute.xlu0 %3411 }
0x12a5   :  { %v3487_v8 = vadd.f32 %v7512_v0, %v3412_v44  ;;  %v3492_v45 = vadd.f32 %v7510_v62, %v3412_v44  ;;  %v4521_v62 = vpop.permute.xlu1 %4520 }
0x12a7   :  { %v7613_v29 = vadd.f32 %v3487_v8, %v7135_v18  ;;  %v7616_v50 = vadd.f32 %v3492_v45, %v7143_v34 }
0x12a9   :  { %v3500_v63 = vsel %vm50_vm0, %v7616_v50, 0.0  ;;  %v3497_v60 = vsel %vm50_vm0, %v7613_v29, 0.0  ;;  %v3505_v15 = vmul.f32 %v7613_v29, %v7613_v29  ;;  %v3506_v18 = vmul.f32 %v7616_v50, %v7616_v50 }
0x12aa   :  { %3501 = vadd.xlane.f32.xlu1 %v3500_v63  ;;  %3498 = vadd.xlane.f32.xlu0 %v3497_v60 }
0x12ab   :  { %v3507_v0 = vsel %vm50_vm0, %v3505_v15, 0.0  ;;  %v3510_v34 = vsel %vm50_vm0, %v3506_v18, 0.0  ;;  %v4921_v15 = vld [vmem:[#allocation2 + $0xd0] sm:$0xff] }
0x12ae   :  { %3508 = vadd.xlane.f32.xlu0 %v3507_v0  ;;  %v4922_v0 = vld [vmem:[#allocation2 + $0xd8] sm:$0xff] }
0x12b2   :  { %3511 = vadd.xlane.f32.xlu0 %v3510_v34 }
0x1337   :  { %v3499_v22 = vpop.xlane.xlu0 %3498  ;;  %v3502_v52 = vpop.xlane.xlu1 %3501 }
0x1338   :  { %v3503_v57 = vmul.f32 0.03125, %v3499_v22  ;;  %v3504_v53 = vmul.f32 0.03125, %v3502_v52 }
0x133a   :  { %v3515_v23 = vmul.f32 %v3503_v57, %v3503_v57  ;;  %v3516_v48 = vmul.f32 %v3504_v53, %v3504_v53  ;;  %v3520_v39 = vsub.f32 %v7616_v50, %v3504_v53  ;;  %v3519_v38 = vsub.f32 %v7613_v29, %v3503_v57 }
0x133b   :  { %v3509_v49 = vpop.xlane.xlu0 %3508 }
0x133c   :  { %v3513_v24 = vmul.f32 0.03125, %v3509_v49  ;;  %v5338_v49 = vld [vmem:[%s7755_s2 + $0x8] ss:$0 sm:$0xff] }
0x133e   :  { %v3517_v2 = vsub.f32 %v3513_v24, %v3515_v23 }
0x133f   :  { %v3512_v27 = vpop.xlane.xlu0 %3511 }
0x1340   :  { %v3514_v43 = vmul.f32 0.03125, %v3512_v27  ;;  %v3521_v56 = vadd.f32 1e-12, %v3517_v2 }
0x1342   :  { %v3518_v25 = vsub.f32 %v3514_v43, %v3516_v48  ;;  %6626 = vrsqrt.f32 %v3521_v56 }
0x1344   :  { %v3522_v35 = vadd.f32 1e-12, %v3518_v25 }
0x1346   :  { %6628 = vrsqrt.f32 %v3522_v35 }
0x134c   :  { %v6627_v51 = vpop.eup %6626 }
0x134d   :  { %v3525_v32 = vmul.f32 %v6627_v51, %v3519_v38 }
0x134f   :  { %v3531_v63 = vmul.f32 %v5305_v26, %v3525_v32 }
0x1350   :  { %v6629_v37 = vpop.eup %6628 }
0x1351   :  { %v3526_v6 = vmul.f32 %v6629_v37, %v3520_v39 }
0x1353   :  { %v3532_v60 = vmul.f32 %v5305_v26, %v3526_v6 }
0x1376   :  { %v5891_v58 = vpop.f32.mrb[42].mxu0 }
0x1377   :  { %v4601_v31 = vadd.f32 %v5891_v58, %v4521_v62  ;;  %v4595_v36 = vpop.f32.mrb[43].mxu0  ;;  %v6196_v58 = vpack.c.bf16 %v4922_v0, %v4921_v15 }
0x1378   :  { %v4596_v41 = vadd.f32 %v4595_v36, %v4521_v62 }
0x1379   :  { %v7629_v33 = vadd.f32 %v4601_v31, %v7396_v12 }
0x137a   :  { %v7632_v7 = vadd.f32 %v4596_v41, %v7389_v17 }
0x137b   :  { %v4609_v61 = vsel %vm50_vm0, %v7629_v33, 0.0  ;;  %v4615_v40 = vmul.f32 %v7629_v33, %v7629_v33 }
0x137c   :  { %4610 = vadd.xlane.f32.xlu1 %v4609_v61  ;;  %v4606_v1 = vsel %vm50_vm0, %v7632_v7, 0.0  ;;  %v4614_v14 = vmul.f32 %v7632_v7, %v7632_v7 }
0x137d   :  { %4607 = vadd.xlane.f32.xlu0 %v4606_v1  ;;  %v4619_v12 = vsel %vm50_vm0, %v4615_v40, 0.0 }
0x137e   :  { %v4616_v17 = vsel %vm50_vm0, %v4614_v14, 0.0 }
0x1380   :  { %4620 = vadd.xlane.f32.xlu1 %v4619_v12 }
0x1381   :  { %4617 = vadd.xlane.f32.xlu0 %v4616_v17 }
0x1391   :  { %4643 = vrot.lane.b32.xlu1 %v7647_v16, %s6686_s9 }
0x1397   :  { %3534 = vrot.lane.b32.xlu0 %v5305_v26, %s6686_s9  ;;  %v4924_v26 = vld [vmem:[#allocation2 + $0xe8] sm:$0xff] }
0x1409   :  { %v4611_v28 = vpop.xlane.xlu1 %4610 }
0x140a   :  { %v4613_v5 = vmul.f32 0.03125, %v4611_v28  ;;  %v4608_v59 = vpop.xlane.xlu0 %4607  ;;  %v5342_v28 = vld [vmem:[%s7755_s2 + $0xa] ss:$0 sm:$0xff] }
0x140b   :  { %v4612_v4 = vmul.f32 0.03125, %v4608_v59 }
0x140c   :  { %v4625_v9 = vmul.f32 %v4613_v5, %v4613_v5  ;;  %v4629_v31 = vsub.f32 %v7629_v33, %v4613_v5  ;;  %v4652_v33 = vld [vmem:[#allocation2 + $0xa0] sm:$0xff] }
0x140d   :  { %v4621_v47 = vpop.xlane.xlu1 %4620  ;;  %v4624_v46 = vmul.f32 %v4612_v4, %v4612_v4  ;;  %v4628_v41 = vsub.f32 %v7632_v7, %v4612_v4  ;;  %v4653_v7 = vld [vmem:[#allocation2 + $0xa8] sm:$0xff] }
0x140e   :  { %v4623_v42 = vmul.f32 0.03125, %v4621_v47  ;;  %v4618_v30 = vpop.xlane.xlu0 %4617  ;;  %v6184_v11 = vpack.c.bf16 %v4653_v7, %v4652_v33 }
0x140f   :  { %v4622_v44 = vmul.f32 0.03125, %v4618_v30 }
0x1410   :  { %v4627_v8 = vsub.f32 %v4623_v42, %v4625_v9  ;;  %6185 = vmatprep.subr.bf16.mxu0 %v6184_v11 }
0x1411   :  { %v4626_v45 = vsub.f32 %v4622_v44, %v4624_v46  ;;  %v4644_v12 = vpop.permute.xlu1 %4643  ;;  %6187 = vmatpush3.bf16.xpose.msra.mxu0 %v6184_v11 }
0x1412   :  { %v4631_v18 = vadd.f32 1e-12, %v4627_v8  ;;  %v3535_v34 = vpop.permute.xlu0 %3534  ;;  %6189 = vmatprep.subr.bf16.mxu0 %v6188_v10 }
0x1413   :  { %v4630_v50 = vadd.f32 1e-12, %v4626_v45  ;;  %v7657_v62 = vadd.f32 %v3535_v34, %v3531_v63  ;;  %v7659_v29 = vadd.f32 %v3535_v34, %v3532_v60 }
0x1414   :  { %6630 = vrsqrt.f32 %v4631_v18 }
0x1415   :  { %6632 = vrsqrt.f32 %v4630_v50  ;;  %5900 = vmatprep.mubr.msk.f32.mxu1 %vm50_vm0, %v7657_v62 }
0x1416   :  { %5901 = vmatmul.mubr.msk.f32.vlgmr.msra.gmra.mrb[40].mxu1 %vm50_vm0, %v7659_v29 }
0x1417   :  { %6195 = vmatpush3.bf16.msra.mxu1 %v6192_v54  ;;  %v4926_v54 = vld [vmem:[#allocation2 + $0xf8] sm:$0xff] }
0x1418   :  { %6197 = vmatprep.subr.bf16.mxu1 %v6196_v58  ;;  %v6204_v22 = vpack.c.bf16 %v4926_v54, %v4925_v21 }
0x1419   :  { %6191 = vmatpush3.bf16.xpose.msra.mxu0 %v6188_v10 }
0x141b   :  { %6199 = vmatpush3.bf16.msra.mxu1 %v6196_v58 }
0x141e   :  { %v6631_v36 = vpop.eup %6630 }
0x141f   :  { %v6633_v61 = vpop.eup %6632  ;;  %v4635_v40 = vmul.f32 %v6631_v36, %v4629_v31 }
0x1420   :  { %v4634_v1 = vmul.f32 %v6633_v61, %v4628_v41 }
0x1421   :  { %v4641_v14 = vmul.f32 %v7647_v16, %v4635_v40 }
0x1422   :  { %v4640_v17 = vmul.f32 %v7647_v16, %v4634_v1  ;;  %v4923_v16 = vld [vmem:[#allocation2 + $0xe0] sm:$0xff] }
0x1423   :  { %v7671_v3 = vadd.f32 %v4644_v12, %v4641_v14  ;;  %v6200_v55 = vpack.c.bf16 %v4924_v26, %v4923_v16 }
0x1424   :  { %v7669_v13 = vadd.f32 %v4644_v12, %v4640_v17 }
0x1425   :  { %6201 = vmatprep.subr.bf16.mxu1 %v6200_v55 }
0x1426   :  { %5922 = vmatprep.mubr.msk.f32.mxu1 %vm50_vm0, %v7669_v13 }
0x1427   :  { %5923 = vmatmul.mubr.msk.f32.vlgmr.msra.gmra.mrb[42].mxu1 %vm50_vm0, %v7671_v3 }
0x1428   :  { %6203 = vmatpush3.bf16.xpose.msra.mxu1 %v6200_v55 }
0x1429   :  { %6205 = vmatprep.subr.bf16.mxu1 %v6204_v22 }
0x1430   :  { %6207 = vmatpush3.bf16.xpose.msra.mxu1 %v6204_v22 }
0x14e9   :  { %v5902_v52 = vpop.f32.mrb[40].mxu1 }
0x14ea   :  { %v7680_v57 = vadd.f32 %v5902_v52, %v5338_v49  ;;  %v4734_v27 = vpop.f32.mrb[41].mxu1 }
0x14eb   :  { %v7682_v53 = vadd.f32 %v5338_v49, %v4734_v27 }
0x14ec   :  { %v7685_v24 = vmul.f32 0.70710677, %v7680_v57 }
0x14ed   :  { %v7688_v43 = vmul.f32 0.70710677, %v7682_v53 }
0x14ee   :  { %v4752_v23 = vand.u32 2147483647, %v7685_v24  ;;  %vm4748_vm5 = vcmp.ge.f32.partialorder %v7685_v24, 0.0 }
0x14ef   :  { %v4751_v48 = vand.u32 2147483647, %v7688_v43  ;;  %vm4747_vm6 = vcmp.ge.f32.partialorder %v7688_v43, 0.0  ;;  %v4743_v43 = vmul.f32 0.5, %v7682_v53 }
0x14f0   :  { %v4754_v2 = vmul.f32 0.3275911, %v4752_v23  ;;  %v4780_v51 = vsub.f32 0.0, %v4752_v23 }
0x14f1   :  { %v4753_v25 = vmul.f32 0.3275911, %v4751_v48  ;;  %v4779_v5 = vsub.f32 0.0, %v4751_v48 }
0x14f2   :  { %v4756_v56 = vadd.f32 1.0, %v4754_v2  ;;  %v4782_v38 = vmul.f32 %v4780_v51, %v4752_v23 }
0x14f3   :  { %v4755_v35 = vadd.f32 1.0, %v4753_v25  ;;  %v4781_v30 = vmul.f32 %v4779_v5, %v4751_v48 }
0x14f4   :  { %6634 = vrcp.f32 %v4756_v56  ;;  %v4785_v44 = vmul.f32 1.442695, %v4782_v38 }
0x14f5   :  { %6636 = vrcp.f32 %v4755_v35  ;;  %v4783_v34 = vmul.f32 1.442695, %v4781_v30  ;;  %v6694_v35 = vmov -1.0  }
0x14f6   :  { %6638 = vpow2.f32 %v4785_v44  ;;  %v4750_v51 = vsel %vm4748_vm5, 1.0, %v6694_v35  ;;  %v4749_v38 = vsel %vm4747_vm6, 1.0, %v6694_v35 }
0x14fa   :  { %v5924_v37 = vpop.f32.mrb[42].mxu1 }
0x14fb   :  { %v7695_v59 = vadd.f32 %v5924_v37, %v5342_v28  ;;  %v5005_v39 = vpop.f32.mrb[43].mxu1 }
0x14fc   :  { %v7697_v4 = vadd.f32 %v5342_v28, %v5005_v39 }
0x14fd   :  { %v7700_v47 = vmul.f32 0.70710677, %v7695_v59 }
0x14fe   :  { %v6635_v32 = vpop.eup %6634  ;;  %v7703_v6 = vmul.f32 0.70710677, %v7697_v4 }
0x14ff   :  { %v6637_v9 = vpop.eup %6636  ;;  %v4762_v42 = vmul.f32 1.0614054, %v6635_v32  ;;  %v5023_v46 = vand.u32 2147483647, %v7700_v47  ;;  %vm5019_vm7 = vcmp.ge.f32.partialorder %v7700_v47, 0.0 }
0x1500   :  { %v5022_v8 = vand.u32 2147483647, %v7703_v6  ;;  %v4761_v45 = vmul.f32 1.0614054, %v6637_v9  ;;  %v6639_v19 = vpop.eup %6638  ;;  %vm5018_vm8 = vcmp.ge.f32.partialorder %v7703_v6, 0.0 }
0x1501   :  { %v4764_v63 = vadd.f32 -1.4531521, %v4762_v42  ;;  %v5025_v60 = vmul.f32 0.3275911, %v5023_v46  ;;  %v5051_v17 = vsub.f32 0.0, %v5023_v46 }
0x1502   :  { %v5024_v15 = vmul.f32 0.3275911, %v5022_v8  ;;  %v4763_v0 = vadd.f32 -1.4531521, %v4761_v45  ;;  %v5050_v33 = vsub.f32 0.0, %v5022_v8 }
0x1503   :  { %v4766_v18 = vmul.f32 %v6635_v32, %v4764_v63  ;;  %v5027_v50 = vadd.f32 1.0, %v5025_v60  ;;  %v5053_v26 = vmul.f32 %v5051_v17, %v5023_v46  ;;  %v5020_v17 = vsel %vm5018_vm8, 1.0, %v6694_v35  ;;  %v5345_v6 = vld [vmem:[%s7755_s2 + $0xb] ss:$0 sm:$0xff] }
0x1504   :  { %v5026_v58 = vadd.f32 1.0, %v5024_v15  ;;  %v4765_v31 = vmul.f32 %v6637_v9, %v4763_v0  ;;  %v5052_v54 = vmul.f32 %v5050_v33, %v5022_v8  ;;  %v4744_v8 = vmul.f32 0.5, %v7680_v57 }
0x1505   :  { %v4768_v36 = vadd.f32 1.4214138, %v4766_v18  ;;  %6640 = vrcp.f32 %v5027_v50  ;;  %v5056_v25 = vmul.f32 1.442695, %v5053_v26 }
0x1506   :  { %6642 = vrcp.f32 %v5026_v58  ;;  %v4767_v41 = vadd.f32 1.4214138, %v4765_v31  ;;  %v5054_v37 = vmul.f32 1.442695, %v5052_v54 }
0x1507   :  { %v4770_v61 = vmul.f32 %v6635_v32, %v4768_v36  ;;  %6644 = vpow2.f32 %v4783_v34 }
0x1508   :  { %v4769_v40 = vmul.f32 %v6637_v9, %v4767_v41  ;;  %6646 = vpow2.f32 %v5056_v25 }
0x1509   :  { %v4772_v1 = vadd.f32 -0.28449672, %v4770_v61  ;;  %6648 = vpow2.f32 %v5054_v37 }
0x150a   :  { %v4771_v14 = vadd.f32 -0.28449672, %v4769_v40 }
0x150b   :  { %v4774_v12 = vmul.f32 %v6635_v32, %v4772_v1  ;;  %v5021_v1 = vsel %vm5019_vm7, 1.0, %v6694_v35 }
0x150c   :  { %v4773_v7 = vmul.f32 %v6637_v9, %v4771_v14 }
0x150d   :  { %v4776_v11 = vadd.f32 0.2548296, %v4774_v12 }
0x150e   :  { %v4775_v20 = vadd.f32 0.2548296, %v4773_v7 }
0x150f   :  { %v6641_v10 = vpop.eup %6640  ;;  %v4778_v16 = vmul.f32 %v6635_v32, %v4776_v11  ;;  %v5014_v11 = vmul.f32 0.5, %v7697_v4 }
0x1510   :  { %v6643_v55 = vpop.eup %6642  ;;  %v5033_v21 = vmul.f32 1.0614054, %v6641_v10  ;;  %v4777_v22 = vmul.f32 %v6637_v9, %v4775_v20  ;;  %v5015_v20 = vmul.f32 0.5, %v7695_v59 }
0x1511   :  { %v6645_v49 = vpop.eup %6644  ;;  %v4788_v52 = vmul.f32 %v6639_v19, %v4778_v16  ;;  %v5032_v27 = vmul.f32 1.0614054, %v6643_v55 }
0x1512   :  { %v5035_v23 = vadd.f32 -1.4531521, %v5033_v21  ;;  %v4787_v48 = vmul.f32 %v6645_v49, %v4777_v22  ;;  %v6647_v36 = vpop.eup %6646 }
0x1513   :  { %v4790_v2 = vsub.f32 1.0, %v4788_v52  ;;  %v5034_v56 = vadd.f32 -1.4531521, %v5032_v27  ;;  %v6649_v53 = vpop.eup %6648 }
0x1514   :  { %v5037_v28 = vmul.f32 %v6641_v10, %v5035_v23  ;;  %v4789_v5 = vsub.f32 1.0, %v4787_v48 }
0x1515   :  { %v4792_v39 = vmul.f32 %v4790_v2, %v4750_v51  ;;  %v5036_v32 = vmul.f32 %v6643_v55, %v5034_v56 }
0x1516   :  { %v5039_v9 = vadd.f32 1.4214138, %v5037_v28  ;;  %v4791_v42 = vmul.f32 %v4789_v5, %v4749_v38 }
0x1517   :  { %v4794_v24 = vadd.f32 1.0, %v4792_v39  ;;  %v5038_v30 = vadd.f32 1.4214138, %v5036_v32 }
0x1518   :  { %v5041_v46 = vmul.f32 %v6641_v10, %v5039_v9  ;;  %v4793_v44 = vadd.f32 1.0, %v4791_v42 }
0x1519   :  { %v5040_v45 = vmul.f32 %v6643_v55, %v5038_v30  ;;  %v4796_v15 = vmul.f32 %v4794_v24, %v4744_v8 }
0x151a   :  { %v5043_v63 = vadd.f32 -0.28449672, %v5041_v46  ;;  %v4795_v60 = vmul.f32 %v4793_v44, %v4743_v43 }
0x151b   :  { %v5042_v0 = vadd.f32 -0.28449672, %v5040_v45 }
0x151c   :  { %v5045_v18 = vmul.f32 %v6641_v10, %v5043_v63  ;;  %5911 = vmatprep.mubr.f32.mxu0 %v4795_v60 }
0x151d   :  { %5912 = vmatmul.mubr.f32.vlgmr.msra.gmra.mrb[44].mxu0 %v4796_v15  ;;  %v5044_v34 = vmul.f32 %v6643_v55, %v5042_v0 }
0x151e   :  { %v5047_v50 = vadd.f32 0.2548296, %v5045_v18 }
0x151f   :  { %v5046_v58 = vadd.f32 0.2548296, %v5044_v34 }
0x1520   :  { %v5049_v31 = vmul.f32 %v6641_v10, %v5047_v50 }
0x1521   :  { %v5048_v41 = vmul.f32 %v6643_v55, %v5046_v58 }
0x1522   :  { %v5059_v61 = vmul.f32 %v6647_v36, %v5049_v31 }
0x1523   :  { %v5058_v57 = vmul.f32 %v6649_v53, %v5048_v41 }
0x1524   :  { %v5061_v40 = vsub.f32 1.0, %v5059_v61 }
0x1525   :  { %v5060_v14 = vsub.f32 1.0, %v5058_v57 }
0x1526   :  { %v5063_v12 = vmul.f32 %v5061_v40, %v5021_v1 }
0x1527   :  { %v5062_v33 = vmul.f32 %v5060_v14, %v5020_v17 }
0x1528   :  { %v5065_v7 = vadd.f32 1.0, %v5063_v12 }
0x1529   :  { %v5064_v19 = vadd.f32 1.0, %v5062_v33 }
0x152a   :  { %v5067_v16 = vmul.f32 %v5065_v7, %v5015_v20 }
0x152b   :  { %v5066_v10 = vmul.f32 %v5064_v19, %v5014_v11 }
0x152d   :  { %5933 = vmatprep.mubr.f32.mxu1 %v5066_v10 }
0x152e   :  { %5934 = vmatmul.mubr.f32.vlgmr.msra.gmra.mrb[44].mxu1 %v5067_v16 }
0x15f0   :  { %v5913_v47 = vpop.f32.mrb[44].mxu0 }
0x15f1   :  { %v4867_v26 = vpop.f32.mrb[45].mxu0 }
0x1601   :  { %v5935_v55 = vpop.f32.mrb[44].mxu1 }
0x1602   :  { %v5144_v21 = vadd.f32 %v5935_v55, %v5345_v6  ;;  %v5138_v54 = vpop.f32.mrb[45].mxu1 }
0x1603   :  { %v5139_v22 = vadd.f32 %v5345_v6, %v5138_v54 }
0x1604   :  { %v5148_v49 = vadd.f32 %v5144_v21, %v7671_v3 }
0x1605   :  { %v5147_v4 = vadd.f32 %v5139_v22, %v7669_v13  ;;  %v5341_v13 = vld [vmem:[%s7755_s2 + $0x9] ss:$0 sm:$0xff] }
0x1606   :  { %v5152_v59 = vsel %vm50_vm0, %v5148_v49, 0.0  ;;  %v5158_v23 = vmul.f32 %v5148_v49, %v5148_v49  ;;  %v4873_v3 = vadd.f32 %v5913_v47, %v5341_v13  ;;  %v4868_v25 = vadd.f32 %v5341_v13, %v4867_v26 }
0x1607   :  { %5153 = vadd.xlane.f32.xlu0 %v5152_v59  ;;  %v5149_v52 = vsel %vm50_vm0, %v5147_v4, 0.0  ;;  %v5157_v27 = vmul.f32 %v5147_v4, %v5147_v4 }
0x1608   :  { %5150 = vadd.xlane.f32.xlu1 %v5149_v52  ;;  %v5162_v2 = vsel %vm50_vm0, %v5158_v23, 0.0  ;;  %v7730_v56 = vadd.f32 %v4873_v3, %v7659_v29  ;;  %v4876_v35 = vadd.f32 %v4868_v25, %v7657_v62 }
0x1609   :  { %v5159_v48 = vsel %vm50_vm0, %v5157_v27, 0.0 }
0x160a   :  { %v4881_v51 = vsel %vm50_vm0, %v7730_v56, 0.0  ;;  %v4886_v28 = vmul.f32 %v4876_v35, %v4876_v35  ;;  %v4878_v37 = vsel %vm50_vm0, %v4876_v35, 0.0  ;;  %v4887_v5 = vmul.f32 %v7730_v56, %v7730_v56 }
0x160b   :  { %5160 = vadd.xlane.f32.xlu0 %v5159_v48 }
0x160c   :  { %5163 = vadd.xlane.f32.xlu1 %v5162_v2  ;;  %v4888_v39 = vsel %vm50_vm0, %v4886_v28, 0.0  ;;  %v4891_v38 = vsel %vm50_vm0, %v4887_v5, 0.0 }
0x161d   :  { %5185 = vrot.lane.b32.xlu1 %v5345_v6, %s6693_s21 }
0x1621   :  { %5180 = vrot.lane.b32.xlu0 %v5345_v6, %s6686_s9 }
0x1640   :  { %4882 = vadd.xlane.f32.xlu0 %v4881_v51 }
0x1641   :  { %4879 = vadd.xlane.f32.xlu1 %v4878_v37 }
0x1644   :  { %4889 = vadd.xlane.f32.xlu0 %v4888_v39 }
0x1645   :  { %4892 = vadd.xlane.f32.xlu1 %v4891_v38 }
0x1656   :  { %4914 = vrot.lane.b32.xlu1 %v5341_v13, %s6693_s21 }
0x165a   :  { %4909 = vrot.lane.b32.xlu0 %v5341_v13, %s6686_s9 }
0x1694   :  { %v5154_v62 = vpop.xlane.xlu0 %5153 }
0x1695   :  { %v5151_v29 = vpop.xlane.xlu1 %5150  ;;  %v5156_v32 = vmul.f32 0.03125, %v5154_v62 }
0x1696   :  { %v5155_v9 = vmul.f32 0.03125, %v5151_v29 }
0x1697   :  { %v5168_v46 = vmul.f32 %v5156_v32, %v5156_v32  ;;  %v5172_v18 = vsub.f32 %v5148_v49, %v5156_v32 }
0x1698   :  { %v5167_v42 = vmul.f32 %v5155_v9, %v5155_v9  ;;  %v5161_v24 = vpop.xlane.xlu0 %5160  ;;  %v5171_v15 = vsub.f32 %v5147_v4, %v5155_v9 }
0x1699   :  { %v5165_v30 = vmul.f32 0.03125, %v5161_v24  ;;  %v5164_v43 = vpop.xlane.xlu1 %5163 }
0x169a   :  { %v5166_v44 = vmul.f32 0.03125, %v5164_v43 }
0x169b   :  { %v5169_v8 = vsub.f32 %v5165_v30, %v5167_v42 }
0x169c   :  { %v5170_v45 = vsub.f32 %v5166_v44, %v5168_v46  ;;  %v5181_v34 = vpop.permute.xlu0 %5180 }
0x169d   :  { %v5173_v63 = vadd.f32 1e-12, %v5169_v8  ;;  %v5186_v36 = vpop.permute.xlu1 %5185 }
0x169e   :  { %v5174_v60 = vadd.f32 1e-12, %v5170_v45 }
0x169f   :  { %6650 = vrsqrt.f32 %v5173_v63 }
0x16a0   :  { %6652 = vrsqrt.f32 %v5174_v60 }
0x16a9   :  { %v6651_v0 = vpop.eup %6650 }
0x16aa   :  { %v6653_v50 = vpop.eup %6652  ;;  %v5177_v58 = vmul.f32 %v6651_v0, %v5171_v15 }
0x16ab   :  { %v5178_v31 = vmul.f32 %v6653_v50, %v5172_v18 }
0x16ac   :  { %v5183_v41 = vmul.f32 %v5181_v34, %v5177_v58 }
0x16ad   :  { %v5184_v53 = vmul.f32 %v5181_v34, %v5178_v31 }
0x16ae   :  { %v5188_v61 = vadd.f32 %v5186_v36, %v5183_v41 }
0x16af   :  { %v5189_v57 = vadd.f32 %v5186_v36, %v5184_v53 }
0x16b0   :  { %5192 = vrot.lane.b32.xlu1 %v5188_v61, %s6690_s23 }
0x16b4   :  { %5194 = vrot.lane.b32.xlu1 %v5189_v57, %s6690_s23 }
0x16cd   :  { %v4883_v40 = vpop.xlane.xlu0 %4882 }
0x16ce   :  { %v4880_v1 = vpop.xlane.xlu1 %4879  ;;  %v4885_v11 = vmul.f32 0.03125, %v4883_v40 }
0x16cf   :  { %v4884_v14 = vmul.f32 0.03125, %v4880_v1 }
0x16d0   :  { %v4897_v10 = vmul.f32 %v4885_v11, %v4885_v11  ;;  %v4901_v49 = vsub.f32 %v7730_v56, %v4885_v11 }
0x16d1   :  { %v4890_v12 = vpop.xlane.xlu0 %4889  ;;  %v4896_v17 = vmul.f32 %v4884_v14, %v4884_v14  ;;  %v4900_v55 = vsub.f32 %v4876_v35, %v4884_v14 }
0x16d2   :  { %v4894_v33 = vmul.f32 0.03125, %v4890_v12  ;;  %v4893_v7 = vpop.xlane.xlu1 %4892 }
0x16d3   :  { %v4895_v20 = vmul.f32 0.03125, %v4893_v7 }
0x16d4   :  { %v4898_v19 = vsub.f32 %v4894_v33, %v4896_v17 }
0x16d5   :  { %v4899_v47 = vsub.f32 %v4895_v20, %v4897_v10  ;;  %v4910_v22 = vpop.permute.xlu0 %4909 }
0x16d6   :  { %v4902_v16 = vadd.f32 1e-12, %v4898_v19  ;;  %v4915_v52 = vpop.permute.xlu1 %4914 }
0x16d7   :  { %v4903_v26 = vadd.f32 1e-12, %v4899_v47 }
0x16d8   :  { %6654 = vrsqrt.f32 %v4902_v16 }
0x16d9   :  { %6656 = vrsqrt.f32 %v4903_v26 }
0x16e2   :  { %v6655_v6 = vpop.eup %6654 }
0x16e3   :  { %v4906_v21 = vmul.f32 %v6655_v6, %v4900_v55  ;;  %v6657_v54 = vpop.eup %6656 }
0x16e4   :  { %v4907_v4 = vmul.f32 %v6657_v54, %v4901_v49 }
0x16e5   :  { %v4912_v59 = vmul.f32 %v4910_v22, %v4906_v21 }
0x16e6   :  { %v4913_v27 = vmul.f32 %v4910_v22, %v4907_v4 }
0x16e7   :  { %v4917_v23 = vadd.f32 %v4915_v52, %v4912_v59 }
0x16e8   :  { %v4918_v13 = vadd.f32 %v4915_v52, %v4913_v27 }
0x1722   :  { %v5193_v48 = vpop.permute.xlu1 %5192 }
0x1723   :  { %v5198_v2 = vsel %vm50_vm0, %v4917_v23, %v5193_v48 }
0x1724   :  { %5201 = vst.msk [vmem:[%s7758_s5] sm:$0xff] %vm5200_vm9, %v5198_v2 }
0x1726   :  { %v5195_v3 = vpop.permute.xlu1 %5194 }
0x1727   :  { %v5199_v25 = vsel %vm50_vm0, %v4918_v13, %v5195_v3 }
0x1728   :  { %5202 = vst.msk [vmem:[%s7758_s5 + $0x8] sm:$0xff] %vm5200_vm9, %v5199_v25 }
0x1729   :  { %5207 = vsyncpa [#allocation3], 1 }

</bundles_post_ra>
